<compile_context>
chip_gen: v6e
topology: v6e:2x2x1
jax: 0.10.0
libtpu: 0.0.40
codegen_flags: <defaults>
</compile_context>

<pallas_src>
import functools
import math

import jax
import jax.numpy as jnp
from jax.experimental import pallas as pl
from jax.experimental.pallas import tpu as pltpu

PARAMS = {"num_classes": 10, "nz": 100, "input_size": (1, 28, 28)}
EPS = 1e-5
NEG_SLOPE = 0.2

D_IN = PARAMS["nz"] + PARAMS["num_classes"]      # 110
D_IN_PAD = 128                                   # lane-aligned K for layer 1
D_OUT = int(math.prod(PARAMS["input_size"]))     # 784
D_OUT_PAD = 896                                  # 7 * 128 -> unmasked stores
DIMS = [D_IN, 128, 256, 512, 1024, D_OUT]
PACK_W = 1024                                    # lane width of packed params

# Per-layer MAC counts (for cost estimates).
_L1_MACS = D_IN_PAD * 128
_L2_MACS = 128 * 256
_L3_MACS = 256 * 512
_L4_MACS = 512 * 1024
_L5_MACS = 1024 * D_OUT_PAD


# ----------------------------------------------------------------------------
# Small helpers
# ----------------------------------------------------------------------------
def _round_up(x, m):
    return ((x + m - 1) // m) * m


def _lrelu(h):
    # LeakyReLU(0.2) as max(x, 0.2*x): 2 VALU ops vs. cmp+mul+select.
    return jnp.maximum(h, NEG_SLOPE * h)


def _bf16_dot(h, w_ref):
    # bf16 x bf16 -> f32 accumulation on the MXU.
    return jnp.dot(h.astype(jnp.bfloat16), w_ref[...],
                   preferred_element_type=jnp.float32)


def _vmem_limit_bytes():
    # ~3/4 of physical VMEM, capped at 64 MiB: ~48 MiB on v7x (64 MiB phys),
    # 64 MiB on v5e/v6e (128 MiB phys).  Leaves headroom for double buffers.
    try:
        cap = int(pltpu.get_tpu_info().vmem_capacity_bytes)
    except Exception:
        cap = 64 << 20
    return max(32 << 20, min(64 << 20, (cap * 3) // 4))


def _cost(flops, transcendentals, operands, out_shapes):
    nbytes = sum(int(a.size) * a.dtype.itemsize for a in operands)
    nbytes += sum(int(math.prod(s.shape)) * s.dtype.itemsize for s in out_shapes)
    return pl.CostEstimate(flops=int(flops),
                           transcendentals=int(transcendentals),
                           bytes_accessed=int(nbytes))


def _full_spec(shape):
    # Whole-array block; no grid.
    return pl.BlockSpec(shape, lambda: (0,) * len(shape))


def _const_spec(shape):
    # Whole-array block, constant across the 1-D batch grid -> VMEM-resident.
    return pl.BlockSpec(shape, lambda i: (0,) * len(shape))


def _tile_spec(tb, n):
    # Batch-tiled block along the 1-D batch grid.
    return pl.BlockSpec((tb, n), lambda i: (i, 0))


def _mask_pad_rows(z, batch, tb):
    # Zero rows past the true batch so they don't pollute BN statistics.
    if batch % tb == 0:
        return z
    row = (jax.lax.broadcasted_iota(jnp.int32, (z.shape[0], 1), 0)
           + pl.program_id(0) * tb)
    return jnp.where(row < batch, z, 0.0)


def _accumulate_stats(st_ref, z, batch, tb):
    zm = _mask_pad_rows(z, batch, tb)
    upd = jnp.concatenate([jnp.sum(zm, axis=0, keepdims=True),
                           jnp.sum(zm * zm, axis=0, keepdims=True)], axis=0)
    st_ref[...] = st_ref[...] + upd


def _bn_scale_shift(st_ref, g, t, batch):
    # Fold full-batch (biased) BN statistics + affine into scale/shift.
    inv_b = 1.0 / batch
    mean = st_ref[0:1, :] * inv_b
    var = st_ref[1:2, :] * inv_b - mean * mean
    scale = g * jax.lax.rsqrt(var + EPS)
    shift = t - mean * scale
    return scale, shift


# ----------------------------------------------------------------------------
# Path A: fused whole-batch kernel (B small enough to sit in VMEM)
# ----------------------------------------------------------------------------
def _fused_kernel(x_ref, w1_ref, w2_ref, w3_ref, w4_ref, w5_ref, pp_ref,
                  out_ref):
    """5 Linear (bf16 weights, f32 acc), LeakyReLU, 3 full-batch BN, Tanh."""

    def bn(h, g, t):
        mean = jnp.mean(h, axis=0, keepdims=True)
        d = h - mean
        var = jnp.mean(d * d, axis=0, keepdims=True)
        return d * jax.lax.rsqrt(var + EPS) * g + t

    b1 = pp_ref[0:1, 0:128]
    b2 = pp_ref[1:2, 0:256]
    g2 = pp_ref[2:3, 0:256]
    t2 = pp_ref[3:4, 0:256]
    b3 = pp_ref[4:5, 0:512]
    g3 = pp_ref[5:6, 0:512]
    t3 = pp_ref[6:7, 0:512]
    b4 = pp_ref[7:8, :]
    g4 = pp_ref[8:9, :]
    t4 = pp_ref[9:10, :]
    b5 = pp_ref[10:11, 0:D_OUT_PAD]

    h = x_ref[...]                                       # (B, 128) bf16
    h = _lrelu(_bf16_dot(h, w1_ref) + b1)                # (B, 128) f32
    h = _lrelu(bn(_bf16_dot(h, w2_ref) + b2, g2, t2))    # (B, 256)
    h = _lrelu(bn(_bf16_dot(h, w3_ref) + b3, g3, t3))    # (B, 512)
    h = _lrelu(bn(_bf16_dot(h, w4_ref) + b4, g4, t4))    # (B, 1024)
    out_ref[...] = jnp.tanh(_bf16_dot(h, w5_ref) + b5)   # (B, 896), pad cols 0


def _fused_forward(x_bf16, dev, batch, vmem_limit):
    ops = (x_bf16, dev["w1"], dev["w2"], dev["w3"], dev["w4"], dev["w5"],
           dev["pp"])
    out_shape = jax.ShapeDtypeStruct((batch, D_OUT_PAD), jnp.float32)
    flops = 2 * batch * (_L1_MACS + _L2_MACS + _L3_MACS + _L4_MACS + _L5_MACS)
    return pl.pallas_call(
        _fused_kernel,
        out_shape=out_shape,
        in_specs=[_full_spec(a.shape) for a in ops],
        out_specs=_full_spec((batch, D_OUT_PAD)),
        compiler_params=pltpu.CompilerParams(vmem_limit_bytes=vmem_limit),
        cost_estimate=_cost(flops, batch * D_OUT_PAD, ops, (out_shape,)),
    )(*ops)


# ----------------------------------------------------------------------------
# Path B: batch-tiled 4-pass pipeline with exact (two-pass) full-batch BN
# ----------------------------------------------------------------------------
def _pass1_kernel(batch, tb, x_ref, w1_ref, w2_ref, pp_ref, z2_ref, st2_ref):
    # z2 = Linear2(lrelu(Linear1(x))); accumulate BN2 sum / sumsq.
    @pl.when(pl.program_id(0) == 0)
    def _init():
        st2_ref[...] = jnp.zeros_like(st2_ref)

    b1 = pp_ref[0:1, 0:128]
    b2 = pp_ref[1:2, 0:256]
    h = _lrelu(_bf16_dot(x_ref[...], w1_ref) + b1)
    z2 = _bf16_dot(h, w2_ref) + b2
    z2_ref[...] = z2
    _accumulate_stats(st2_ref, z2, batch, tb)


def _mid_pass_kernel(batch, tb, g_row, t_row, b_row, n_in, n_out,
                     z_ref, st_ref, w_ref, pp_ref, zo_ref, sto_ref):
    # z_out = Linear(lrelu(BN(z_in))); accumulate next BN's sum / sumsq.
    @pl.when(pl.program_id(0) == 0)
    def _init():
        sto_ref[...] = jnp.zeros_like(sto_ref)

    g = pp_ref[g_row:g_row + 1, 0:n_in]
    t = pp_ref[t_row:t_row + 1, 0:n_in]
    b = pp_ref[b_row:b_row + 1, 0:n_out]
    scale, shift = _bn_scale_shift(st_ref, g, t, batch)
    h = _lrelu(z_ref[...] * scale + shift)
    z = _bf16_dot(h, w_ref) + b
    zo_ref[...] = z
    _accumulate_stats(sto_ref, z, batch, tb)


def _final_pass_kernel(batch, z4_ref, st4_ref, w5_ref, pp_ref, out_ref):
    # out = tanh(Linear5(lrelu(BN4(z4)))).  No cross-tile state -> "parallel".
    g4 = pp_ref[8:9, :]
    t4 = pp_ref[9:10, :]
    b5 = pp_ref[10:11, 0:D_OUT_PAD]
    scale, shift = _bn_scale_shift(st4_ref, g4, t4, batch)
    h = _lrelu(z4_ref[...] * scale + shift)
    out_ref[...] = jnp.tanh(_bf16_dot(h, w5_ref) + b5)


def _tiled_forward(x_bf16, dev, batch, batch_tile, vmem_limit):
    f32 = jnp.float32
    pp = dev["pp"]

    tb = max(8, (int(batch_tile) // 8) * 8)          # multiple of 8
    tb = min(tb, 512, _round_up(batch, 8))           # don't over-pad tiny B
    b_pad = _round_up(batch, tb)
    if b_pad != batch:
        x_bf16 = jnp.pad(x_bf16, ((0, b_pad - batch), (0, 0)))
    nb = b_pad // tb

    seq = pltpu.CompilerParams(dimension_semantics=("arbitrary",),
                               vmem_limit_bytes=vmem_limit)
    par = pltpu.CompilerParams(dimension_semantics=("parallel",),
                               vmem_limit_bytes=vmem_limit)

    # Pass 1: x -> z2, BN2 stats.
    o1 = (jax.ShapeDtypeStruct((b_pad, 256), f32),
          jax.ShapeDtypeStruct((2, 256), f32))
    ops1 = (x_bf16, dev["w1"], dev["w2"], pp)
    z2, st2 = pl.pallas_call(
        functools.partial(_pass1_kernel, batch, tb),
        grid=(nb,),
        in_specs=[_tile_spec(tb, D_IN_PAD), _const_spec(dev["w1"].shape),
                  _const_spec(dev["w2"].shape), _const_spec(pp.shape)],
        out_specs=[_tile_spec(tb, 256), _const_spec((2, 256))],
        out_shape=o1,
        compiler_params=seq,
        cost_estimate=_cost(2 * b_pad * (_L1_MACS + _L2_MACS), 0, ops1, o1),
    )(*ops1)

    # Pass 2: z2 -> z3, BN3 stats.
    o2 = (jax.ShapeDtypeStruct((b_pad, 512), f32),
          jax.ShapeDtypeStruct((2, 512), f32))
    ops2 = (z2, st2, dev["w3"], pp)
    z3, st3 = pl.pallas_call(
        functools.partial(_mid_pass_kernel, batch, tb, 2, 3, 4, 256, 512),
        grid=(nb,),
        in_specs=[_tile_spec(tb, 256), _const_spec((2, 256)),
                  _const_spec(dev["w3"].shape), _const_spec(pp.shape)],
        out_specs=[_tile_spec(tb, 512), _const_spec((2, 512))],
        out_shape=o2,
        compiler_params=seq,
        cost_estimate=_cost(2 * b_pad * _L3_MACS, 0, ops2, o2),
    )(*ops2)

    # Pass 3: z3 -> z4, BN4 stats.
    o3 = (jax.ShapeDtypeStruct((b_pad, 1024), f32),
          jax.ShapeDtypeStruct((2, 1024), f32))
    ops3 = (z3, st3, dev["w4"], pp)
    z4, st4 = pl.pallas_call(
        functools.partial(_mid_pass_kernel, batch, tb, 5, 6, 7, 512, 1024),
        grid=(nb,),
        in_specs=[_tile_spec(tb, 512), _const_spec((2, 512)),
                  _const_spec(dev["w4"].shape), _const_spec(pp.shape)],
        out_specs=[_tile_spec(tb, 1024), _const_spec((2, 1024))],
        out_shape=o3,
        compiler_params=seq,
        cost_estimate=_cost(2 * b_pad * _L4_MACS, 0, ops3, o3),
    )(*ops3)

    # Pass 4: z4 -> tanh output.  Batch axis "parallel" (v7x megacore).
    o4 = jax.ShapeDtypeStruct((b_pad, D_OUT_PAD), f32)
    ops4 = (z4, st4, dev["w5"], pp)
    flat = pl.pallas_call(
        functools.partial(_final_pass_kernel, batch),
        grid=(nb,),
        in_specs=[_tile_spec(tb, 1024), _const_spec((2, 1024)),
                  _const_spec(dev["w5"].shape), _const_spec(pp.shape)],
        out_specs=_tile_spec(tb, D_OUT_PAD),
        out_shape=o4,
        compiler_params=par,
        cost_estimate=_cost(2 * b_pad * _L5_MACS, b_pad * D_OUT_PAD, ops4,
                            (o4,)),
    )(*ops4)
    return flat


# ----------------------------------------------------------------------------
# Parameters (PyTorch-default init) and device packing
# ----------------------------------------------------------------------------
def init_params(key, params):
    """Deterministic init mirroring PyTorch default initializers (f32)."""
    nc = params["num_classes"]
    keys = jax.random.split(key, 16)
    p = {}
    # nn.Embedding: N(0, 1), shape (num_classes, num_classes)
    p["emb"] = jax.random.normal(keys[0], (nc, nc), jnp.float32)
    # nn.Linear: U(-1/sqrt(fan_in), 1/sqrt(fan_in)); stored as (in, out).
    for li in range(5):
        fan_in, fan_out = DIMS[li], DIMS[li + 1]
        bound = 1.0 / math.sqrt(fan_in)
        p[f"w{li+1}"] = jax.random.uniform(
            keys[1 + 2 * li], (fan_in, fan_out), jnp.float32, -bound, bound)
        p[f"b{li+1}"] = jax.random.uniform(
            keys[2 + 2 * li], (fan_out,), jnp.float32, -bound, bound)
    # BatchNorm affine params: gamma=1, beta=0.
    for li, d in zip((2, 3, 4), (256, 512, 1024)):
        p[f"g{li}"] = jnp.ones((d,), jnp.float32)
        p[f"t{li}"] = jnp.zeros((d,), jnp.float32)
    return p


def pack_params(p):
    """Kernel-ready device params: bf16 padded weights + packed vectors."""
    dev = {"emb": p["emb"]}
    # W1: pad input dim 110 -> 128 with zero rows (same product).
    w1 = jnp.zeros((D_IN_PAD, 128), jnp.float32).at[:D_IN, :].set(p["w1"])
    dev["w1"] = w1.astype(jnp.bfloat16)
    dev["w2"] = p["w2"].astype(jnp.bfloat16)
    dev["w3"] = p["w3"].astype(jnp.bfloat16)
    dev["w4"] = p["w4"].astype(jnp.bfloat16)
    # W5: pad output dim 784 -> 896 with zero columns (sliced off in wrapper).
    w5 = jnp.zeros((1024, D_OUT_PAD), jnp.float32).at[:, :D_OUT].set(p["w5"])
    dev["w5"] = w5.astype(jnp.bfloat16)
    # Pack the 13 small vectors into one (11, 1024) f32 array -> single DMA.
    pp = jnp.zeros((11, PACK_W), jnp.float32)
    pp = pp.at[0, :128].set(p["b1"])
    pp = pp.at[1, :256].set(p["b2"])
    pp = pp.at[2, :256].set(p["g2"])
    pp = pp.at[3, :256].set(p["t2"])
    pp = pp.at[4, :512].set(p["b3"])
    pp = pp.at[5, :512].set(p["g3"])
    pp = pp.at[6, :512].set(p["t3"])
    pp = pp.at[7, :1024].set(p["b4"])
    pp = pp.at[8, :1024].set(p["g4"])
    pp = pp.at[9, :1024].set(p["t4"])
    pp = pp.at[10, :D_OUT].set(p["b5"])
    dev["pp"] = pp
    return dev


# ----------------------------------------------------------------------------
# Forward (Generator.forward equivalent)
# ----------------------------------------------------------------------------
def generator_forward(noise, labels, dev, params=PARAMS, *,
                      batch_tile=256, fused_max_batch=512):
    """noise: (B, nz) f32, labels: (B,) int -> (B, 1, 28, 28) f32."""
    batch = noise.shape[0]
    c, h, w = params["input_size"]

    # Glue (plain JAX): embedding gather + cat([emb, noise], -1) + lane pad
    # 110 -> 128; cast to bf16 so layer 1 feeds the MXU directly.
    emb = jnp.take(dev["emb"], labels, axis=0)
    pad = jnp.zeros((batch, D_IN_PAD - D_IN), noise.dtype)
    gen_input = jnp.concatenate([emb, noise, pad], axis=-1).astype(jnp.bfloat16)

    vmem_limit = _vmem_limit_bytes()
    if batch <= fused_max_batch:
        flat = _fused_forward(gen_input, dev, batch, vmem_limit)
    else:
        flat = _tiled_forward(gen_input, dev, batch, batch_tile, vmem_limit)

    # Crop padded rows/cols; matches x.view(B, *input_size).
    return flat[:batch, :D_OUT].reshape(batch, c, h, w)


if __name__ == "__main__":
    key = jax.random.PRNGKey(0)
    k_param, k_noise, k_label = jax.random.split(key, 3)

    p = init_params(k_param, PARAMS)
    dev = pack_params(p)

    # Small batch; deliberately not a multiple of 8 so the batch-tiled path
    # also exercises its pad-row masking of the BN statistics.
    B = 12
    noise = jax.random.normal(k_noise, (B, PARAMS["nz"]), jnp.float32)
    labels = jax.random.randint(k_label, (B,), 0, PARAMS["num_classes"],
                                jnp.int32)

    # Path A: fused whole-batch kernel (exact full-batch BatchNorm).
    out_fused = generator_forward(noise, labels, dev, PARAMS)
    # Path B: batch-tiled 4-pass pipeline with exact two-pass BN (forced via
    # fused_max_batch=0; tiny tile so several grid steps + masking run).
    out_tiled = generator_forward(noise, labels, dev, PARAMS,
                                  batch_tile=8, fused_max_batch=0)
    out_fused, out_tiled = jax.block_until_ready((out_fused, out_tiled))

    assert out_fused.shape == (B, *PARAMS["input_size"]), out_fused.shape
    assert out_tiled.shape == (B, *PARAMS["input_size"]), out_tiled.shape
    assert bool(jnp.all(jnp.isfinite(out_fused)))
    assert bool(jnp.all(jnp.isfinite(out_tiled)))
    assert bool(jnp.all(jnp.abs(out_fused) <= 1.0))   # tanh output range
    # Both paths implement identical full-batch BN train-mode semantics.
    max_diff = float(jnp.max(jnp.abs(out_fused - out_tiled)))
    assert max_diff < 2e-2, max_diff

    print("KERNEL_OK")
</pallas_src>

<mosaic_0001>
module attributes {stable_mosaic.version = 11 : i64} {
  func.func @_fused_kernel(%arg0: memref<12x128xbf16, #tpu.memory_space<vmem>>, %arg1: memref<128x128xbf16, #tpu.memory_space<vmem>>, %arg2: memref<128x256xbf16, #tpu.memory_space<vmem>>, %arg3: memref<256x512xbf16, #tpu.memory_space<vmem>>, %arg4: memref<512x1024xbf16, #tpu.memory_space<vmem>>, %arg5: memref<1024x896xbf16, #tpu.memory_space<vmem>>, %arg6: memref<11x1024xf32, #tpu.memory_space<vmem>>, %arg7: memref<12x896xf32, #tpu.memory_space<vmem>>) attributes {dimension_semantics = [], scalar_prefetch = 0 : i64, scratch_operands = 0 : i64, tpu.core_type = #tpu.core_type<tc>} {
    %c0 = arith.constant 0 : index
    %c0_0 = arith.constant 0 : index
    %0 = vector.load %arg6[%c0, %c0_0] : memref<11x1024xf32, #tpu.memory_space<vmem>>, vector<1x128xf32>
    %c1 = arith.constant 1 : index
    %c0_1 = arith.constant 0 : index
    %1 = vector.load %arg6[%c1, %c0_1] : memref<11x1024xf32, #tpu.memory_space<vmem>>, vector<1x256xf32>
    %c2 = arith.constant 2 : index
    %c0_2 = arith.constant 0 : index
    %2 = vector.load %arg6[%c2, %c0_2] : memref<11x1024xf32, #tpu.memory_space<vmem>>, vector<1x256xf32>
    %c3 = arith.constant 3 : index
    %c0_3 = arith.constant 0 : index
    %3 = vector.load %arg6[%c3, %c0_3] : memref<11x1024xf32, #tpu.memory_space<vmem>>, vector<1x256xf32>
    %c4 = arith.constant 4 : index
    %c0_4 = arith.constant 0 : index
    %4 = vector.load %arg6[%c4, %c0_4] : memref<11x1024xf32, #tpu.memory_space<vmem>>, vector<1x512xf32>
    %c5 = arith.constant 5 : index
    %c0_5 = arith.constant 0 : index
    %5 = vector.load %arg6[%c5, %c0_5] : memref<11x1024xf32, #tpu.memory_space<vmem>>, vector<1x512xf32>
    %c6 = arith.constant 6 : index
    %c0_6 = arith.constant 0 : index
    %6 = vector.load %arg6[%c6, %c0_6] : memref<11x1024xf32, #tpu.memory_space<vmem>>, vector<1x512xf32>
    %c7 = arith.constant 7 : index
    %c0_7 = arith.constant 0 : index
    %7 = vector.load %arg6[%c7, %c0_7] : memref<11x1024xf32, #tpu.memory_space<vmem>>, vector<1x1024xf32>
    %c8 = arith.constant 8 : index
    %c0_8 = arith.constant 0 : index
    %8 = vector.load %arg6[%c8, %c0_8] : memref<11x1024xf32, #tpu.memory_space<vmem>>, vector<1x1024xf32>
    %c9 = arith.constant 9 : index
    %c0_9 = arith.constant 0 : index
    %9 = vector.load %arg6[%c9, %c0_9] : memref<11x1024xf32, #tpu.memory_space<vmem>>, vector<1x1024xf32>
    %c10 = arith.constant 10 : index
    %c0_10 = arith.constant 0 : index
    %10 = vector.load %arg6[%c10, %c0_10] : memref<11x1024xf32, #tpu.memory_space<vmem>>, vector<1x896xf32>
    %c0_11 = arith.constant 0 : index
    %c0_12 = arith.constant 0 : index
    %11 = vector.load %arg0[%c0_11, %c0_12] : memref<12x128xbf16, #tpu.memory_space<vmem>>, vector<12x128xbf16>
    %c0_13 = arith.constant 0 : index
    %c0_14 = arith.constant 0 : index
    %12 = vector.load %arg1[%c0_13, %c0_14] : memref<128x128xbf16, #tpu.memory_space<vmem>>, vector<128x128xbf16>
    %cst = arith.constant dense<0.000000e+00> : vector<12x128xf32>
    %13 = tpu.matmul %11, %12, %cst {dimension_numbers = #tpu.dot_dimension_numbers<[1], [0], [0], [1], [0, 0, 1, 1], [], []>} : vector<12x128xbf16>, vector<128x128xbf16>, vector<12x128xf32> -> vector<12x128xf32>
    %14 = vector.broadcast %0 : vector<1x128xf32> to vector<12x128xf32>
    %15 = arith.addf %13, %14 : vector<12x128xf32>
    %cst_15 = arith.constant 2.000000e-01 : f32
    %16 = vector.broadcast %cst_15 : f32 to vector<12x128xf32>
    %17 = arith.mulf %16, %15 : vector<12x128xf32>
    %18 = arith.maximumf %15, %17 : vector<12x128xf32>
    %19 = arith.truncf %18 : vector<12x128xf32> to vector<12x128xbf16>
    %c0_16 = arith.constant 0 : index
    %c0_17 = arith.constant 0 : index
    %20 = vector.load %arg2[%c0_16, %c0_17] : memref<128x256xbf16, #tpu.memory_space<vmem>>, vector<128x256xbf16>
    %cst_18 = arith.constant dense<0.000000e+00> : vector<12x256xf32>
    %21 = tpu.matmul %19, %20, %cst_18 {dimension_numbers = #tpu.dot_dimension_numbers<[1], [0], [0], [1], [0, 0, 1, 1], [], []>} : vector<12x128xbf16>, vector<128x256xbf16>, vector<12x256xf32> -> vector<12x256xf32>
    %22 = vector.broadcast %1 : vector<1x256xf32> to vector<12x256xf32>
    %23 = arith.addf %21, %22 : vector<12x256xf32>
    %cst_19 = arith.constant dense<0.000000e+00> : vector<256xf32>
    %24 = vector.multi_reduction <add>, %23, %cst_19 [0] : vector<12x256xf32> to vector<256xf32>
    %25 = vector.shape_cast %24 : vector<256xf32> to vector<1x256xf32>
    %cst_20 = arith.constant 1.200000e+01 : f32
    %26 = vector.broadcast %cst_20 : f32 to vector<1x256xf32>
    %27 = arith.divf %25, %26 : vector<1x256xf32>
    %28 = vector.broadcast %27 : vector<1x256xf32> to vector<12x256xf32>
    %29 = arith.subf %23, %28 : vector<12x256xf32>
    %30 = arith.mulf %29, %29 : vector<12x256xf32>
    %cst_21 = arith.constant dense<0.000000e+00> : vector<256xf32>
    %31 = vector.multi_reduction <add>, %30, %cst_21 [0] : vector<12x256xf32> to vector<256xf32>
    %32 = vector.shape_cast %31 : vector<256xf32> to vector<1x256xf32>
    %cst_22 = arith.constant 1.200000e+01 : f32
    %33 = vector.broadcast %cst_22 : f32 to vector<1x256xf32>
    %34 = arith.divf %32, %33 : vector<1x256xf32>
    %cst_23 = arith.constant 9.99999974E-6 : f32
    %35 = vector.broadcast %cst_23 : f32 to vector<1x256xf32>
    %36 = arith.addf %34, %35 : vector<1x256xf32>
    %37 = math.rsqrt %36 : vector<1x256xf32>
    %38 = vector.broadcast %37 : vector<1x256xf32> to vector<12x256xf32>
    %39 = arith.mulf %29, %38 : vector<12x256xf32>
    %40 = vector.broadcast %2 : vector<1x256xf32> to vector<12x256xf32>
    %41 = arith.mulf %39, %40 : vector<12x256xf32>
    %42 = vector.broadcast %3 : vector<1x256xf32> to vector<12x256xf32>
    %43 = arith.addf %41, %42 : vector<12x256xf32>
    %cst_24 = arith.constant 2.000000e-01 : f32
    %44 = vector.broadcast %cst_24 : f32 to vector<12x256xf32>
    %45 = arith.mulf %44, %43 : vector<12x256xf32>
    %46 = arith.maximumf %43, %45 : vector<12x256xf32>
    %47 = arith.truncf %46 : vector<12x256xf32> to vector<12x256xbf16>
    %c0_25 = arith.constant 0 : index
    %c0_26 = arith.constant 0 : index
    %48 = vector.load %arg3[%c0_25, %c0_26] : memref<256x512xbf16, #tpu.memory_space<vmem>>, vector<256x512xbf16>
    %cst_27 = arith.constant dense<0.000000e+00> : vector<12x512xf32>
    %49 = tpu.matmul %47, %48, %cst_27 {dimension_numbers = #tpu.dot_dimension_numbers<[1], [0], [0], [1], [0, 0, 1, 1], [], []>} : vector<12x256xbf16>, vector<256x512xbf16>, vector<12x512xf32> -> vector<12x512xf32>
    %50 = vector.broadcast %4 : vector<1x512xf32> to vector<12x512xf32>
    %51 = arith.addf %49, %50 : vector<12x512xf32>
    %cst_28 = arith.constant dense<0.000000e+00> : vector<512xf32>
    %52 = vector.multi_reduction <add>, %51, %cst_28 [0] : vector<12x512xf32> to vector<512xf32>
    %53 = vector.shape_cast %52 : vector<512xf32> to vector<1x512xf32>
    %cst_29 = arith.constant 1.200000e+01 : f32
    %54 = vector.broadcast %cst_29 : f32 to vector<1x512xf32>
    %55 = arith.divf %53, %54 : vector<1x512xf32>
    %56 = vector.broadcast %55 : vector<1x512xf32> to vector<12x512xf32>
    %57 = arith.subf %51, %56 : vector<12x512xf32>
    %58 = arith.mulf %57, %57 : vector<12x512xf32>
    %cst_30 = arith.constant dense<0.000000e+00> : vector<512xf32>
    %59 = vector.multi_reduction <add>, %58, %cst_30 [0] : vector<12x512xf32> to vector<512xf32>
    %60 = vector.shape_cast %59 : vector<512xf32> to vector<1x512xf32>
    %cst_31 = arith.constant 1.200000e+01 : f32
    %61 = vector.broadcast %cst_31 : f32 to vector<1x512xf32>
    %62 = arith.divf %60, %61 : vector<1x512xf32>
    %cst_32 = arith.constant 9.99999974E-6 : f32
    %63 = vector.broadcast %cst_32 : f32 to vector<1x512xf32>
    %64 = arith.addf %62, %63 : vector<1x512xf32>
    %65 = math.rsqrt %64 : vector<1x512xf32>
    %66 = vector.broadcast %65 : vector<1x512xf32> to vector<12x512xf32>
    %67 = arith.mulf %57, %66 : vector<12x512xf32>
    %68 = vector.broadcast %5 : vector<1x512xf32> to vector<12x512xf32>
    %69 = arith.mulf %67, %68 : vector<12x512xf32>
    %70 = vector.broadcast %6 : vector<1x512xf32> to vector<12x512xf32>
    %71 = arith.addf %69, %70 : vector<12x512xf32>
    %cst_33 = arith.constant 2.000000e-01 : f32
    %72 = vector.broadcast %cst_33 : f32 to vector<12x512xf32>
    %73 = arith.mulf %72, %71 : vector<12x512xf32>
    %74 = arith.maximumf %71, %73 : vector<12x512xf32>
    %75 = arith.truncf %74 : vector<12x512xf32> to vector<12x512xbf16>
    %c0_34 = arith.constant 0 : index
    %c0_35 = arith.constant 0 : index
    %76 = vector.load %arg4[%c0_34, %c0_35] : memref<512x1024xbf16, #tpu.memory_space<vmem>>, vector<512x1024xbf16>
    %cst_36 = arith.constant dense<0.000000e+00> : vector<12x1024xf32>
    %77 = tpu.matmul %75, %76, %cst_36 {dimension_numbers = #tpu.dot_dimension_numbers<[1], [0], [0], [1], [0, 0, 1, 1], [], []>} : vector<12x512xbf16>, vector<512x1024xbf16>, vector<12x1024xf32> -> vector<12x1024xf32>
    %78 = vector.broadcast %7 : vector<1x1024xf32> to vector<12x1024xf32>
    %79 = arith.addf %77, %78 : vector<12x1024xf32>
    %cst_37 = arith.constant dense<0.000000e+00> : vector<1024xf32>
    %80 = vector.multi_reduction <add>, %79, %cst_37 [0] : vector<12x1024xf32> to vector<1024xf32>
    %81 = vector.shape_cast %80 : vector<1024xf32> to vector<1x1024xf32>
    %cst_38 = arith.constant 1.200000e+01 : f32
    %82 = vector.broadcast %cst_38 : f32 to vector<1x1024xf32>
    %83 = arith.divf %81, %82 : vector<1x1024xf32>
    %84 = vector.broadcast %83 : vector<1x1024xf32> to vector<12x1024xf32>
    %85 = arith.subf %79, %84 : vector<12x1024xf32>
    %86 = arith.mulf %85, %85 : vector<12x1024xf32>
    %cst_39 = arith.constant dense<0.000000e+00> : vector<1024xf32>
    %87 = vector.multi_reduction <add>, %86, %cst_39 [0] : vector<12x1024xf32> to vector<1024xf32>
    %88 = vector.shape_cast %87 : vector<1024xf32> to vector<1x1024xf32>
    %cst_40 = arith.constant 1.200000e+01 : f32
    %89 = vector.broadcast %cst_40 : f32 to vector<1x1024xf32>
    %90 = arith.divf %88, %89 : vector<1x1024xf32>
    %cst_41 = arith.constant 9.99999974E-6 : f32
    %91 = vector.broadcast %cst_41 : f32 to vector<1x1024xf32>
    %92 = arith.addf %90, %91 : vector<1x1024xf32>
    %93 = math.rsqrt %92 : vector<1x1024xf32>
    %94 = vector.broadcast %93 : vector<1x1024xf32> to vector<12x1024xf32>
    %95 = arith.mulf %85, %94 : vector<12x1024xf32>
    %96 = vector.broadcast %8 : vector<1x1024xf32> to vector<12x1024xf32>
    %97 = arith.mulf %95, %96 : vector<12x1024xf32>
    %98 = vector.broadcast %9 : vector<1x1024xf32> to vector<12x1024xf32>
    %99 = arith.addf %97, %98 : vector<12x1024xf32>
    %cst_42 = arith.constant 2.000000e-01 : f32
    %100 = vector.broadcast %cst_42 : f32 to vector<12x1024xf32>
    %101 = arith.mulf %100, %99 : vector<12x1024xf32>
    %102 = arith.maximumf %99, %101 : vector<12x1024xf32>
    %103 = arith.truncf %102 : vector<12x1024xf32> to vector<12x1024xbf16>
    %c0_43 = arith.constant 0 : index
    %c0_44 = arith.constant 0 : index
    %104 = vector.load %arg5[%c0_43, %c0_44] : memref<1024x896xbf16, #tpu.memory_space<vmem>>, vector<1024x896xbf16>
    %cst_45 = arith.constant dense<0.000000e+00> : vector<12x896xf32>
    %105 = tpu.matmul %103, %104, %cst_45 {dimension_numbers = #tpu.dot_dimension_numbers<[1], [0], [0], [1], [0, 0, 1, 1], [], []>} : vector<12x1024xbf16>, vector<1024x896xbf16>, vector<12x896xf32> -> vector<12x896xf32>
    %106 = vector.broadcast %10 : vector<1x896xf32> to vector<12x896xf32>
    %107 = arith.addf %105, %106 : vector<12x896xf32>
    %108 = math.tanh %107 : vector<12x896xf32>
    %c0_46 = arith.constant 0 : index
    %c0_47 = arith.constant 0 : index
    %109 = vector.load %arg7[%c0_46, %c0_47] : memref<12x896xf32, #tpu.memory_space<vmem>>, vector<12x896xf32>
    tpu.vector_store %arg7[%c0_46, %c0_47], %108 {strides = array<i32>} : memref<12x896xf32, #tpu.memory_space<vmem>>, vector<12x896xf32>,
    return
  }
}

</mosaic_0001>

<bundles_post_ra>
// kernel: tpu_custom_call.1
= control target key start
LH: loop header
LB: loop body
LE: loop exit
PB: predicated region body
PF: predicated region fallthrough
CT: control target
= control target key end

     0   :  { %12 = vsyncpa [#allocation3], 0  ;;  %s9434_s0 = inlined_call_operand.hbm [shape: bf16[12,128], index: 0, kind: input, shape index: {}]   ;;  %s9435_s1 = inlined_call_operand.hbm [shape: bf16[128,128], index: 1, kind: input, shape index: {}]   ;;  %s9436_s2 = inlined_call_operand.hbm [shape: bf16[128,256], index: 2, kind: input, shape index: {}]   ;;  %s9437_s3 = inlined_call_operand.hbm [shape: bf16[256,512], index: 3, kind: input, shape index: {}]   ;;  %s9438_s4 = inlined_call_operand.hbm [shape: bf16[512,1024], index: 4, kind: input, shape index: {}]   ;;  %s9439_s5 = inlined_call_operand.hbm [shape: bf16[1024,896], index: 5, kind: input, shape index: {}]   ;;  %s9440_s6 = inlined_call_operand.hbm [shape: f32[11,1024], index: 6, kind: input, shape index: {}]   ;;  %s9441_s7 = inlined_call_operand.hbm [shape: f32[12,896], index: 7, kind: output, shape index: {}]  }
   0x1   :  { %13 = vsyncpa [#allocation6], 0 }
   0x2   :  { %14 = vsyncpa [#allocation9], 0 }
   0x3   :  { %15 = vsyncpa [#allocation12], 0 }
   0x4   :  { %16 = vsyncpa [#allocation4], 0  ;;  %s8979_s24 = smov [#allocation5]   ;;  %s8980_s26 = smov [#allocation8]  }
   0x5   :  { %s34_s25 = sshll.u32 %s8979_s24, 4  ;;  %s58_s27 = sshll.u32 %s8980_s26, 4  ;;  %s35_s25 = int_to_ptr.vmem [resolvable:$true] %s34_s25  ;;  %s59_s27 = int_to_ptr.vmem [resolvable:$true] %s58_s27 }
   0x6   :  { %s8817_s28 = scalar_lea.vmem %s35_s25, 1024  ;;  %p8822_p1 = scmp.lt.s32.totalorder %s35_s25, %s35_s25 }
   0x7   :  { %p8818_p0 = scmp.ne.s32.totalorder %s35_s25, %s8817_s28  ;;  %p8823_p2 = scmp.lt.s32.totalorder %s8817_s28, %s8817_s28 }
   0x9   :  { %p8824_p3 = por %p8823_p2, %p8822_p1 }
   0xb   :  { %p8825_p4 = pnand %p8824_p3, %p8818_p0 }
   0xd   :  { %8828 = shalt.err (!%p8825_p4)
}
   0xe   :  { %s8981_s29 = smov 64   ;;  %s8982_s30 = smov 4  }
   0xf   :  { %40 = dma.hbm_to_vmem [thread:$0]  %s9435_s1, 1024, %s35_s25, [#allocation6], %s8981_s29, %s8981_s29, %s8982_s30  }
  0x10   :  { %s8837_s10 = scalar_lea.vmem %s59_s27, 8192  ;;  %p8842_p6 = scmp.lt.s32.totalorder %s59_s27, %s59_s27 }
  0x11   :  { %p8838_p5 = scmp.ne.s32.totalorder %s59_s27, %s8837_s10  ;;  %p8843_p7 = scmp.lt.s32.totalorder %s8837_s10, %s8837_s10 }
  0x13   :  { %p8844_p8 = por %p8843_p7, %p8842_p6 }
  0x15   :  { %p8845_p9 = pnand %p8844_p8, %p8838_p5 }
  0x17   :  { %8848 = shalt.err (!%p8845_p9)
}
  0x18   :  { %s8983_s11 = smov 256   ;;  %s8984_s12 = smov 16  }
  0x19   :  { %64 = dma.hbm_to_vmem [thread:$0]  %s9437_s3, 8192, %s59_s27, [#allocation9], %s8983_s11, %s8983_s11, %s8984_s12  }
  0x1a   :  { %s8985_s15 = smov [#allocation11]  }
  0x1b   :  { %s82_s16 = sshll.u32 %s8985_s15, 4  ;;  %s83_s16 = int_to_ptr.vmem [resolvable:$true] %s82_s16 }
  0x1c   :  { %s8857_s17 = scalar_lea.vmem %s83_s16, 57344  ;;  %p8862_p11 = scmp.lt.s32.totalorder %s83_s16, %s83_s16 }
  0x1d   :  { %p8858_p10 = scmp.ne.s32.totalorder %s83_s16, %s8857_s17  ;;  %p8863_p12 = scmp.lt.s32.totalorder %s8857_s17, %s8857_s17 }
  0x1f   :  { %p8864_p13 = por %p8863_p12, %p8862_p11 }
  0x21   :  { %p8865_p0 = pnand %p8864_p13, %p8858_p10 }
  0x23   :  { %8868 = shalt.err (!%p8865_p0)
}
  0x24   :  { %s8986_s1 = smov 448   ;;  %s8987_s18 = smov 28  }
  0x25   :  { %88 = dma.hbm_to_vmem [thread:$0]  %s9439_s5, 57344, %s83_s16, [#allocation12], %s8986_s1, %s8986_s1, %s8987_s18  }
  0x26   :  { %s8988_s21 = smov [#allocation2]   ;;  %s8989_s3 = smov [#allocation7]  }
  0x27   :  { %s22_s22 = sshll.u32 %s8988_s21, 4  ;;  %s46_s23 = sshll.u32 %s8989_s3, 4  ;;  %s23_s22 = int_to_ptr.vmem [resolvable:$true] %s22_s22  ;;  %s47_s23 = int_to_ptr.vmem [resolvable:$true] %s46_s23 }
  0x28   :  { %s8877_s24 = scalar_lea.vmem %s23_s22, 128  ;;  %p8882_p2 = scmp.lt.s32.totalorder %s23_s22, %s23_s22 }
  0x29   :  { %p8878_p1 = scmp.ne.s32.totalorder %s23_s22, %s8877_s24  ;;  %p8883_p3 = scmp.lt.s32.totalorder %s8877_s24, %s8877_s24 }
  0x2b   :  { %p8884_p4 = por %p8883_p3, %p8882_p2 }
  0x2d   :  { %p8885_p5 = pnand %p8884_p4, %p8878_p1 }
  0x2f   :  { %8888 = shalt.err (!%p8885_p5)
}
  0x30   :  { %28 = dma.hbm_to_vmem [thread:$0]  %s9434_s0, 128, %s23_s22, [#allocation3], %s8981_s29, %s8981_s29, %s8982_s30  }
  0x31   :  { %s8897_s5 = scalar_lea.vmem %s47_s23, 2048  ;;  %p8902_p7 = scmp.lt.s32.totalorder %s47_s23, %s47_s23 }
  0x32   :  { %p8898_p6 = scmp.ne.s32.totalorder %s47_s23, %s8897_s5  ;;  %p8903_p8 = scmp.lt.s32.totalorder %s8897_s5, %s8897_s5 }
  0x34   :  { %p8904_p9 = por %p8903_p8, %p8902_p7 }
  0x36   :  { %p8905_p10 = pnand %p8904_p9, %p8898_p6 }
  0x38   :  { %8908 = shalt.err (!%p8905_p10)
}
  0x39   :  { %s8990_s27 = smov 128   ;;  %s8991_s28 = smov 8  }
  0x3a   :  { %52 = dma.hbm_to_vmem [thread:$0]  %s9436_s2, 2048, %s47_s23, [#allocation6], %s8990_s27, %s8990_s27, %s8991_s28  }
  0x3b   :  { %s8992_s10 = smov [#allocation10]  }
  0x3c   :  { %s70_s11 = sshll.u32 %s8992_s10, 4  ;;  %s71_s11 = int_to_ptr.vmem [resolvable:$true] %s70_s11 }
  0x3d   :  { %s8917_s12 = scalar_lea.vmem %s71_s11, 32768  ;;  %p8922_p12 = scmp.lt.s32.totalorder %s71_s11, %s71_s11 }
  0x3e   :  { %p8918_p11 = scmp.ne.s32.totalorder %s71_s11, %s8917_s12  ;;  %p8923_p13 = scmp.lt.s32.totalorder %s8917_s12, %s8917_s12 }
  0x40   :  { %p8924_p0 = por %p8923_p13, %p8922_p12 }
  0x42   :  { %p8925_p1 = pnand %p8924_p0, %p8918_p11 }
  0x44   :  { %8928 = shalt.err (!%p8925_p1)
}
  0x45   :  { %s8993_s0 = smov 512   ;;  %s8994_s30 = smov 32  }
  0x46   :  { %76 = dma.hbm_to_vmem [thread:$0]  %s9438_s4, 32768, %s71_s11, [#allocation9], %s8993_s0, %s8993_s0, %s8994_s30  }
  0x47   :  { %s8995_s15 = smov [#allocation13]  }
  0x48   :  { %s94_s16 = sshll.u32 %s8995_s15, 4  ;;  %s95_s16 = int_to_ptr.vmem [resolvable:$true] %s94_s16 }
  0x49   :  { %s8937_s2 = scalar_lea.vmem %s95_s16, 2048  ;;  %p8942_p3 = scmp.lt.s32.totalorder %s95_s16, %s95_s16 }
  0x4a   :  { %p8938_p2 = scmp.ne.s32.totalorder %s95_s16, %s8937_s2  ;;  %p8943_p4 = scmp.lt.s32.totalorder %s8937_s2, %s8937_s2 }
  0x4c   :  { %p8944_p5 = por %p8943_p4, %p8942_p3 }
  0x4e   :  { %p8945_p6 = pnand %p8944_p5, %p8938_p2 }
  0x50   :  { %8948 = shalt.err (!%p8945_p6)
}
  0x51   :  { %s8996_s17 = smov 1024  }
  0x52   :  { %100 = dma.hbm_to_vmem [thread:$0]  %s9440_s6, 2048, %s95_s16, [#allocation12], %s8996_s17, %s8996_s17, %s8981_s29  }
  0x53   :  { %8969 = dma.done.wait [#allocation3], 128  }
  0x54   :  { %8970 = vsyncadd [#allocation3], 4294967168 }
  0x55   :  { %8971 = dma.done.wait [#allocation6], 3072  }
  0x56   :  { %8972 = vsyncadd [#allocation6], 4294964224 }
  0x57   :  { %8973 = dma.done.wait [#allocation9], 40960  }
  0x58   :  { %8974 = vsyncadd [#allocation9], 4294926336 }
  0x59   :  { %8975 = dma.done.wait [#allocation12], 59392  }
  0x5a   :  { %8976 = vsyncadd [#allocation12], 4294907904  ;;  %v8997_v0 = vmov 0.0   ;;  %vm8998_vm0 = vmmov 0   ;;  %v7984_v1 = vld [vmem:[#allocation5 + $0x38] sm:$0xff]   ;;  %v7985_v2 = vld [vmem:[#allocation5 + $0x30] sm:$0xff]  }
  0x5b   :  { %7940 = vmatprep.subr.bf16.mxu0 %v8997_v0  ;;  %7956 = vmatprep.mubr.msk.bf16.mxu0 %vm8998_vm0, %v8997_v0  ;;  %v7986_v3 = vld [vmem:[#allocation5 + $0x28] sm:$0xff]   ;;  %v7987_v4 = vld [vmem:[#allocation5 + $0x20] sm:$0xff]   ;;  %v7993_v5 = vld [vmem:[#allocation7 + $0x74] ss:$8 sps:$4 sm:$0xff]   ;;  %v8999_v26 = vmov 0   ;;  %vm420_vm1 = vcmask 1043456  }
  0x5c   :  { %7941 = vmatpush3.bf16.msra.mxu0 %v7984_v1  ;;  %v7995_v6 = vld [vmem:[#allocation7 + $0x70] ss:$8 sps:$4 sm:$0xff]   ;;  %377 = vmatprep.subr.bf16.mxu1 %v7993_v5  ;;  %v7996_v7 = vld [vmem:[#allocation7 + $0x64] ss:$8 sps:$4 sm:$0xff]   ;;  %v7998_v8 = vld [vmem:[#allocation7 + $0x60] ss:$8 sps:$4 sm:$0xff]  }
  0x5d   :  { %7942 = vmatprep.subr.bf16.mxu0 %v8997_v0  ;;  %378 = vmatpush1.bf16.msra.mxu1 %v7995_v6  ;;  %v7999_v9 = vld [vmem:[#allocation7 + $0x54] ss:$8 sps:$4 sm:$0xff]   ;;  %v8001_v11 = vld [vmem:[#allocation7 + $0x50] ss:$8 sps:$4 sm:$0xff]   ;;  %v8002_v12 = vld [vmem:[#allocation7 + $0x44] ss:$8 sps:$4 sm:$0xff]  }
  0x5e   :  { %379 = vmatprep.subr.bf16.mxu1 %v7996_v7  ;;  %v7988_v10 = vld [vmem:[#allocation5 + $0x18] sm:$0xff]   ;;  %v7989_v13 = vld [vmem:[#allocation5 + $0x10] sm:$0xff]   ;;  %v8004_v14 = vld [vmem:[#allocation7 + $0x40] ss:$8 sps:$4 sm:$0xff]   ;;  %409 = vmatprep.mubr.bf16.mxu1 %v8999_v26  ;;  %s9000_s4 = smov [#allocation14]  }
  0x5f   :  { %v8005_v15 = vld [vmem:[#allocation7 + $0x34] ss:$8 sps:$4 sm:$0xff]   ;;  %v7990_v16 = vld [vmem:[#allocation5 + $0x8] sm:$0xff]   ;;  %v8007_v17 = vld [vmem:[#allocation7 + $0x30] ss:$8 sps:$4 sm:$0xff]   ;;  %s7035_s6 = sshll.u32 %s9000_s4, 4  ;;  %s7036_s6 = int_to_ptr.vmem [resolvable:$true] %s7035_s6 }
  0x60   :  { %7943 = vmatpush3.bf16.msra.mxu0 %v7985_v2  ;;  %v7991_v18 = vld [vmem:[#allocation5] sm:$0xff]   ;;  %v7992_v19 = vld [vmem:[#allocation2] sm:$0x3f]   ;;  %s8949_s29 = scalar_lea.vmem %s7036_s6, 1792  ;;  %p8954_p8 = scmp.lt.s32.totalorder %s7036_s6, %s7036_s6 }
  0x61   :  { %7944 = vmatprep.subr.bf16.mxu0 %v8997_v0  ;;  %380 = vmatpush1.bf16.msra.mxu1 %v7998_v8  ;;  %v8008_v20 = vld [vmem:[#allocation7 + $0x24] ss:$8 sps:$4 sm:$0xff]   ;;  %v8010_v21 = vld [vmem:[#allocation7 + $0x20] ss:$8 sps:$4 sm:$0xff]   ;;  %v8011_v22 = vld [vmem:[#allocation7 + $0x14] ss:$8 sps:$4 sm:$0xff]   ;;  %p8950_p7 = scmp.ne.s32.totalorder %s7036_s6, %s8949_s29  ;;  %p8955_p9 = scmp.lt.s32.totalorder %s8949_s29, %s8949_s29 }
  0x62   :  { %381 = vmatprep.subr.bf16.mxu1 %v7999_v9  ;;  %v8013_v23 = vld [vmem:[#allocation7 + $0x10] ss:$8 sps:$4 sm:$0xff]   ;;  %v8014_v24 = vld [vmem:[#allocation7 + $0x4] ss:$8 sps:$4 sm:$0xff]   ;;  %v8016_v25 = vld [vmem:[#allocation7] ss:$8 sps:$4 sm:$0xff]  }
  0x63   :  { %v123_v27 = vld [vmem:[#allocation13] ss:$0 sm:$0xff]  ;;  %v8019_v39 = vld [vmem:[#allocation8 + $0xe4] ss:$16 sps:$4 sm:$0xff]   ;;  %v8022_v40 = vld [vmem:[#allocation8 + $0xec] ss:$16 sps:$4 sm:$0xff]   ;;  %p8956_p10 = por %p8955_p9, %p8954_p8 }
  0x64   :  { %7945 = vmatpush3.bf16.msra.mxu0 %v7986_v3  ;;  %v8017_v41 = vld [vmem:[#allocation8 + $0xe0] ss:$16 sps:$4 sm:$0xff]   ;;  %v8020_v42 = vld [vmem:[#allocation8 + $0xe8] ss:$16 sps:$4 sm:$0xff]   ;;  %v8025_v43 = vld [vmem:[#allocation8 + $0xc4] ss:$16 sps:$4 sm:$0xff]  }
  0x65   :  { %7946 = vmatprep.subr.bf16.mxu0 %v8997_v0  ;;  %382 = vmatpush1.bf16.msra.mxu1 %v8001_v11  ;;  %v8028_v44 = vld [vmem:[#allocation8 + $0xcc] ss:$16 sps:$4 sm:$0xff]   ;;  %v8023_v45 = vld [vmem:[#allocation8 + $0xc0] ss:$16 sps:$4 sm:$0xff]   ;;  %v8026_v46 = vld [vmem:[#allocation8 + $0xc8] ss:$16 sps:$4 sm:$0xff]   ;;  %p8957_p11 = pnand %p8956_p10, %p8950_p7 }
  0x66   :  { %383 = vmatprep.subr.bf16.mxu1 %v8002_v12  ;;  %v8031_v47 = vld [vmem:[#allocation8 + $0xa4] ss:$16 sps:$4 sm:$0xff]   ;;  %v8034_v48 = vld [vmem:[#allocation8 + $0xac] ss:$16 sps:$4 sm:$0xff]   ;;  %v8029_v49 = vld [vmem:[#allocation8 + $0xa0] ss:$16 sps:$4 sm:$0xff]  }
  0x67   :  { %v8032_v50 = vld [vmem:[#allocation8 + $0xa8] ss:$16 sps:$4 sm:$0xff]   ;;  %v8037_v51 = vld [vmem:[#allocation8 + $0x84] ss:$16 sps:$4 sm:$0xff]   ;;  %v8040_v52 = vld [vmem:[#allocation8 + $0x8c] ss:$16 sps:$4 sm:$0xff]  }
  0x68   :  { %7947 = vmatpush3.bf16.msra.mxu0 %v7987_v4  ;;  %v8035_v53 = vld [vmem:[#allocation8 + $0x80] ss:$16 sps:$4 sm:$0xff]   ;;  %v8038_v54 = vld [vmem:[#allocation8 + $0x88] ss:$16 sps:$4 sm:$0xff]   ;;  %v8043_v55 = vld [vmem:[#allocation8 + $0x64] ss:$16 sps:$4 sm:$0xff]  }
  0x69   :  { %7948 = vmatprep.subr.bf16.mxu0 %v8997_v0  ;;  %384 = vmatpush1.bf16.msra.mxu1 %v8004_v14  ;;  %v8046_v56 = vld [vmem:[#allocation8 + $0x6c] ss:$16 sps:$4 sm:$0xff]   ;;  %v8041_v57 = vld [vmem:[#allocation8 + $0x60] ss:$16 sps:$4 sm:$0xff]   ;;  %v8044_v58 = vld [vmem:[#allocation8 + $0x68] ss:$16 sps:$4 sm:$0xff]  }
  0x6a   :  { %385 = vmatprep.subr.bf16.mxu1 %v8005_v15  ;;  %v8049_v59 = vld [vmem:[#allocation8 + $0x44] ss:$16 sps:$4 sm:$0xff]   ;;  %v8052_v60 = vld [vmem:[#allocation8 + $0x4c] ss:$16 sps:$4 sm:$0xff]   ;;  %v8047_v61 = vld [vmem:[#allocation8 + $0x40] ss:$16 sps:$4 sm:$0xff]  }
  0x6b   :  { %v8050_v62 = vld [vmem:[#allocation8 + $0x48] ss:$16 sps:$4 sm:$0xff]   ;;  %v8055_v63 = vld [vmem:[#allocation8 + $0x24] ss:$16 sps:$4 sm:$0xff]   ;;  %v8053_v1 = vld [vmem:[#allocation8 + $0x20] ss:$16 sps:$4 sm:$0xff]  }
  0x6c   :  { %7949 = vmatpush3.bf16.msra.mxu0 %v7988_v10  ;;  %v8056_v2 = vld [vmem:[#allocation8 + $0x28] ss:$16 sps:$4 sm:$0xff]   ;;  %v8061_v3 = vld [vmem:[#allocation8 + $0x4] ss:$16 sps:$4 sm:$0xff]   ;;  %v8064_v4 = vld [vmem:[#allocation8 + $0xc] ss:$16 sps:$4 sm:$0xff]  }
  0x6d   :  { %7950 = vmatprep.subr.bf16.mxu0 %v8997_v0  ;;  %386 = vmatpush1.bf16.msra.mxu1 %v8007_v17  ;;  %v8059_v5 = vld [vmem:[#allocation8] ss:$16 sps:$4 sm:$0xff]   ;;  %v8062_v6 = vld [vmem:[#allocation8 + $0x8] ss:$16 sps:$4 sm:$0xff]   ;;  %v8067_v7 = vld [vmem:[#allocation8 + $0x1e4] ss:$16 sps:$4 sm:$0xff]  }
  0x6e   :  { %387 = vmatprep.subr.bf16.mxu1 %v8008_v20  ;;  %v8070_v8 = vld [vmem:[#allocation8 + $0x1ec] ss:$16 sps:$4 sm:$0xff]   ;;  %v8065_v9 = vld [vmem:[#allocation8 + $0x1e0] ss:$16 sps:$4 sm:$0xff]   ;;  %v8068_v10 = vld [vmem:[#allocation8 + $0x1e8] ss:$16 sps:$4 sm:$0xff]  }
  0x6f   :  { %v8073_v11 = vld [vmem:[#allocation8 + $0x1c4] ss:$16 sps:$4 sm:$0xff]   ;;  %v8076_v12 = vld [vmem:[#allocation8 + $0x1cc] ss:$16 sps:$4 sm:$0xff]   ;;  %v8074_v14 = vld [vmem:[#allocation8 + $0x1c8] ss:$16 sps:$4 sm:$0xff]  }
  0x70   :  { %7951 = vmatpush3.bf16.msra.mxu0 %v7989_v13  ;;  %v8071_v13 = vld [vmem:[#allocation8 + $0x1c0] ss:$16 sps:$4 sm:$0xff]   ;;  %v8079_v15 = vld [vmem:[#allocation8 + $0x1a4] ss:$16 sps:$4 sm:$0xff]   ;;  %v8088_v20 = vld [vmem:[#allocation8 + $0x18c] ss:$16 sps:$4 sm:$0xff]  }
  0x71   :  { %7952 = vmatprep.subr.bf16.mxu0 %v8997_v0  ;;  %388 = vmatpush1.bf16.msra.mxu1 %v8010_v21  ;;  %v8077_v17 = vld [vmem:[#allocation8 + $0x1a0] ss:$16 sps:$4 sm:$0xff]   ;;  %v8092_v26 = vld [vmem:[#allocation8 + $0x168] ss:$16 sps:$4 sm:$0xff]  }
  0x72   :  { %389 = vmatprep.subr.bf16.mxu1 %v8011_v22  ;;  %v8083_v21 = vld [vmem:[#allocation8 + $0x180] ss:$16 sps:$4 sm:$0xff]   ;;  %v8086_v22 = vld [vmem:[#allocation8 + $0x188] ss:$16 sps:$4 sm:$0xff]  }
  0x74   :  { %7953 = vmatpush3.bf16.msra.mxu0 %v7990_v16  ;;  %v8082_v16 = vld [vmem:[#allocation8 + $0x1ac] ss:$16 sps:$4 sm:$0xff]  }
  0x75   :  { %7954 = vmatprep.subr.bf16.mxu0 %v8997_v0  ;;  %390 = vmatpush1.bf16.msra.mxu1 %v8013_v23  ;;  %v8058_v0 = vld [vmem:[#allocation8 + $0x2c] ss:$16 sps:$4 sm:$0xff]   ;;  %v8091_v23 = vld [vmem:[#allocation8 + $0x164] ss:$16 sps:$4 sm:$0xff]  }
  0x76   :  { %391 = vmatprep.subr.bf16.mxu1 %v8014_v24  ;;  %v8094_v24 = vld [vmem:[#allocation8 + $0x16c] ss:$16 sps:$4 sm:$0xff]  }
  0x78   :  { %7955 = vmatpush3.bf16.msra.mxu0 %v7991_v18  ;;  %v8080_v18 = vld [vmem:[#allocation8 + $0x1a8] ss:$16 sps:$4 sm:$0xff]  }
  0x79   :  { %392 = vmatpush1.bf16.msra.mxu1 %v8016_v25  ;;  %919 = vmatprep.subr.bf16.mxu0 %v8019_v39  ;;  %v8089_v25 = vld [vmem:[#allocation8 + $0x160] ss:$16 sps:$4 sm:$0xff]   ;;  %v287_v39 = vlaneseq }
  0x7a   :  { %962 = vmatprep.subr.bf16.mxu1 %v8022_v40 }
  0x7b   :  { %7957 = vmatmul.mubr.bf16.vlgmr.msra.gmra.mxu0 %v7992_v19  ;;  %v8085_v19 = vld [vmem:[#allocation8 + $0x184] ss:$16 sps:$4 sm:$0xff]   ;;  %v9071_v40 = vshrl.u32 %v287_v39, 7 }
  0x7c   :  { %920 = vmatpush1.bf16.msra.mxu0 %v8017_v41 }
  0x7d   :  { %921 = vmatprep.subr.bf16.mxu0 %v8025_v43  ;;  %v9074_v41 = vsub.s32 0, %v9071_v40 }
  0x80   :  { %922 = vmatpush1.bf16.msra.mxu0 %v8023_v45 }
  0x81   :  { %923 = vmatprep.subr.bf16.mxu0 %v8031_v47 }
  0x84   :  { %924 = vmatpush1.bf16.msra.mxu0 %v8029_v49 }
  0x85   :  { %925 = vmatprep.subr.bf16.mxu0 %v8037_v51 }
  0x88   :  { %926 = vmatpush1.bf16.msra.mxu0 %v8035_v53 }
  0x89   :  { %927 = vmatprep.subr.bf16.mxu0 %v8043_v55 }
  0x8c   :  { %928 = vmatpush1.bf16.msra.mxu0 %v8041_v57 }
  0x8d   :  { %929 = vmatprep.subr.bf16.mxu0 %v8049_v59 }
  0x90   :  { %930 = vmatpush1.bf16.msra.mxu0 %v8047_v61 }
  0x91   :  { %931 = vmatprep.subr.bf16.mxu0 %v8055_v63 }
  0x94   :  { %932 = vmatpush1.bf16.msra.mxu0 %v8053_v1 }
  0x95   :  { %933 = vmatprep.subr.bf16.mxu0 %v8061_v3 }
  0x98   :  { %934 = vmatpush1.bf16.msra.mxu0 %v8059_v5 }
  0x99   :  { %935 = vmatprep.subr.bf16.mxu0 %v8067_v7 }
  0x9c   :  { %936 = vmatpush2.bf16.msra.mxu0 %v8065_v9 }
  0x9d   :  { %937 = vmatprep.subr.bf16.mxu0 %v8073_v11 }
  0xa0   :  { %938 = vmatpush2.bf16.msra.mxu0 %v8071_v13 }
  0xa1   :  { %939 = vmatprep.subr.bf16.mxu0 %v8079_v15 }
  0xa4   :  { %940 = vmatpush2.bf16.msra.mxu0 %v8077_v17 }
  0xa5   :  { %941 = vmatprep.subr.bf16.mxu0 %v8085_v19 }
  0xa8   :  { %942 = vmatpush2.bf16.msra.mxu0 %v8083_v21 }
  0xa9   :  { %943 = vmatprep.subr.bf16.mxu0 %v8091_v23 }
  0xac   :  { %944 = vmatpush2.bf16.msra.mxu0 %v8089_v25 }
 0x13b   :  { %v258_v28 = vpop.f32.mrf.mxu0 }
 0x13c   :  { %v259_v29 = vadd.f32 %v258_v28, %v123_v27  ;;  %v8100_v28 = vld [vmem:[#allocation8 + $0x14c] ss:$16 sps:$4 sm:$0xff]  }
 0x13d   :  { %v7958_v30 = vpop.f32.mrf.mxu0 }
 0x13e   :  { %v265_v32 = vmul.f32 0.2, %v259_v29  ;;  %v8098_v30 = vld [vmem:[#allocation8 + $0x148] ss:$16 sps:$4 sm:$0xff]  }
 0x13f   :  { %v261_v31 = vpop.f32.mrf.mxu0 }
 0x140   :  { %v262_v33 = vadd.f32 %v261_v31, %v123_v27  ;;  %v267_v36 = vmax.f32 %v259_v29, %v265_v32  ;;  %v8097_v27 = vld [vmem:[#allocation8 + $0x144] ss:$16 sps:$4 sm:$0xff]   ;;  %v8095_v29 = vld [vmem:[#allocation8 + $0x140] ss:$16 sps:$4 sm:$0xff]   ;;  %v8106_v32 = vld [vmem:[#allocation8 + $0x12c] ss:$16 sps:$4 sm:$0xff]  }
 0x141   :  { %v7959_v34 = vpop.f32.mrf.mxu0  ;;  %945 = vmatprep.subr.bf16.mxu0 %v8097_v27  ;;  %v8103_v31 = vld [vmem:[#allocation8 + $0x124] ss:$16 sps:$4 sm:$0xff]  }
 0x142   :  { %v266_v35 = vmul.f32 0.2, %v262_v33  ;;  %946 = vmatpush2.bf16.msra.mxu0 %v8095_v29  ;;  %v8104_v34 = vld [vmem:[#allocation8 + $0x128] ss:$16 sps:$4 sm:$0xff]  }
 0x143   :  { %947 = vmatprep.subr.bf16.mxu0 %v8103_v31 }
 0x144   :  { %v268_v37 = vmax.f32 %v262_v33, %v266_v35  ;;  %v8101_v33 = vld [vmem:[#allocation8 + $0x120] ss:$16 sps:$4 sm:$0xff]   ;;  %v8109_v35 = vld [vmem:[#allocation8 + $0x104] ss:$16 sps:$4 sm:$0xff]  }
 0x146   :  { %v269_v38 = vpack.c.bf16 %v268_v37, %v267_v36  ;;  %v8112_v36 = vld [vmem:[#allocation8 + $0x10c] ss:$16 sps:$4 sm:$0xff]   ;;  %948 = vmatpush2.bf16.msra.mxu0 %v8101_v33  ;;  %v8107_v37 = vld [vmem:[#allocation8 + $0x100] ss:$16 sps:$4 sm:$0xff]  }
 0x147   :  { %949 = vmatprep.subr.bf16.mxu0 %v8109_v35 }
 0x148   :  { %410 = vmatmul.mubr.bf16.vlgmr.msra.gmra.mxu1 %v269_v38  ;;  %v8110_v38 = vld [vmem:[#allocation8 + $0x108] ss:$16 sps:$4 sm:$0xff]  }
 0x149   :  { %963 = vmatpush1.bf16.msra.mxu1 %v8020_v42  ;;  %v125_v42 = vld [vmem:[#allocation13 + $0x1] ss:$8 sm:$0x3] }
 0x14a   :  { %964 = vmatprep.subr.bf16.mxu1 %v8028_v44  ;;  %950 = vmatpush2.bf16.msra.mxu0 %v8107_v37  ;;  %v9077_v44 = vsub.s32 1, %v9071_v40  ;;  %v290_v45 = vrot.slane %v125_v42, %v9074_v41  ;;  %v129_v37 = vld [vmem:[#allocation13 + $0x3] ss:$8 sm:$0x3] }
 0x14c   :  { %v294_v47 = vrot.slane %v125_v42, %v9077_v44 }
 0x14d   :  { %965 = vmatpush1.bf16.msra.mxu1 %v8026_v46 }
 0x14e   :  { %966 = vmatprep.subr.bf16.mxu1 %v8034_v48 }
 0x151   :  { %967 = vmatpush1.bf16.msra.mxu1 %v8032_v50 }
 0x152   :  { %968 = vmatprep.subr.bf16.mxu1 %v8040_v52 }
 0x155   :  { %969 = vmatpush1.bf16.msra.mxu1 %v8038_v54 }
 0x156   :  { %970 = vmatprep.subr.bf16.mxu1 %v8046_v56 }
 0x159   :  { %971 = vmatpush1.bf16.msra.mxu1 %v8044_v58 }
 0x15a   :  { %972 = vmatprep.subr.bf16.mxu1 %v8052_v60 }
 0x15d   :  { %973 = vmatpush1.bf16.msra.mxu1 %v8050_v62 }
 0x15e   :  { %974 = vmatprep.subr.bf16.mxu1 %v8058_v0 }
 0x161   :  { %975 = vmatpush1.bf16.msra.mxu1 %v8056_v2 }
 0x162   :  { %976 = vmatprep.subr.bf16.mxu1 %v8064_v4 }
 0x165   :  { %977 = vmatpush1.bf16.msra.mxu1 %v8062_v6 }
 0x166   :  { %978 = vmatprep.subr.bf16.mxu1 %v8070_v8 }
 0x169   :  { %979 = vmatpush2.bf16.msra.mxu1 %v8068_v10 }
 0x16a   :  { %980 = vmatprep.subr.bf16.mxu1 %v8076_v12 }
 0x16d   :  { %981 = vmatpush2.bf16.msra.mxu1 %v8074_v14 }
 0x16e   :  { %982 = vmatprep.subr.bf16.mxu1 %v8082_v16 }
 0x171   :  { %983 = vmatpush2.bf16.msra.mxu1 %v8080_v18 }
 0x172   :  { %984 = vmatprep.subr.bf16.mxu1 %v8088_v20 }
 0x175   :  { %985 = vmatpush2.bf16.msra.mxu1 %v8086_v22 }
 0x176   :  { %986 = vmatprep.subr.bf16.mxu1 %v8094_v24 }
 0x179   :  { %987 = vmatpush2.bf16.msra.mxu1 %v8092_v26 }
 0x17a   :  { %988 = vmatprep.subr.bf16.mxu1 %v8100_v28 }
 0x17d   :  { %989 = vmatpush2.bf16.msra.mxu1 %v8098_v30 }
 0x17e   :  { %990 = vmatprep.subr.bf16.mxu1 %v8106_v32 }
 0x181   :  { %991 = vmatpush2.bf16.msra.mxu1 %v8104_v34 }
 0x182   :  { %992 = vmatprep.subr.bf16.mxu1 %v8112_v36  ;;  %v127_v36 = vld [vmem:[#allocation13 + $0x2] ss:$8 sm:$0x3] }
 0x185   :  { %993 = vmatpush2.bf16.msra.mxu1 %v8110_v38  ;;  %v478_v38 = vrot.slane %v127_v36, %v9074_v41 }
 0x208   :  { %v411_v43 = vpop.f32.mrf.mxu1 }
 0x209   :  { %v412_v50 = vadd.f32 %v411_v43, %v290_v45 }
 0x20a   :  { %v413_v46 = vpop.f32.mrf.mxu1 }
 0x20b   :  { %v414_v54 = vadd.f32 %v413_v46, %v294_v47  ;;  %v482_v46 = vrot.slane %v127_v36, %v9077_v44 }
 0x20c   :  { %v415_v48 = vpop.f32.mrf.mxu1 }
 0x20d   :  { %v416_v49 = vadd.f32 %v415_v48, %v290_v45  ;;  %v493_v45 = vrot.slane %v129_v37, %v9074_v41  ;;  %v497_v48 = vrot.slane %v129_v37, %v9077_v44  ;;  %v1211_v37 = vld [vmem:[#allocation10 + $0xc0] sm:$0xff] }
 0x20e   :  { %v417_v51 = vpop.f32.mrf.mxu1 }
 0x20f   :  { %v421_v52 = vsel %vm420_vm1, %v416_v49, 0.0  ;;  %v418_v53 = vadd.f32 %v417_v51, %v294_v47 }
 0x210   :  { %v422_v55 = vadd.f32 %v421_v52, %v412_v50 }
 0x211   :  { %v429_v56 = vsel %vm420_vm1, %v418_v53, 0.0 }
 0x212   :  { %v423_v57 = vrot.slane %v422_v55, 4  ;;  %v430_v58 = vadd.f32 %v429_v56, %v414_v54 }
 0x214   :  { %v424_v59 = vadd.f32 %v423_v57, %v422_v55  ;;  %v431_v60 = vrot.slane %v430_v58, 4 }
 0x216   :  { %v425_v61 = vrot.slane %v424_v59, 2  ;;  %v432_v62 = vadd.f32 %v431_v60, %v430_v58 }
 0x218   :  { %v426_v63 = vadd.f32 %v425_v61, %v424_v59  ;;  %v433_v0 = vrot.slane %v432_v62, 2 }
 0x21a   :  { %v427_v1 = vrot.slane %v426_v63, 1  ;;  %v434_v2 = vadd.f32 %v433_v0, %v432_v62 }
 0x21c   :  { %v428_v3 = vadd.f32 %v427_v1, %v426_v63  ;;  %v435_v4 = vrot.slane %v434_v2, 1 }
 0x21e   :  { %v438_v5 = vmul.f32 0.083333336, %v428_v3  ;;  %v436_v6 = vadd.f32 %v435_v4, %v434_v2 }
 0x220   :  { %v440_v7 = vsub.f32 %v412_v50, %v438_v5  ;;  %v442_v8 = vsub.f32 %v416_v49, %v438_v5  ;;  %v439_v9 = vmul.f32 0.083333336, %v436_v6  ;;  %v1243_v5 = vld [vmem:[#allocation10 + $0x1c0] sm:$0xff] }
 0x221   :  { %v1247_v6 = vld [vmem:[#allocation10 + $0x1e0] sm:$0xff] }
 0x222   :  { %v444_v10 = vmul.f32 %v440_v7, %v440_v7  ;;  %v446_v11 = vmul.f32 %v442_v8, %v442_v8  ;;  %v441_v12 = vsub.f32 %v414_v54, %v439_v9  ;;  %v443_v13 = vsub.f32 %v418_v53, %v439_v9  ;;  %v1375_v9 = vld [vmem:[#allocation10 + $0x5e0] sm:$0xff] }
 0x224   :  { %v448_v14 = vsel %vm420_vm1, %v446_v11, 0.0  ;;  %v445_v15 = vmul.f32 %v441_v12, %v441_v12  ;;  %v447_v16 = vmul.f32 %v443_v13, %v443_v13 }
 0x225   :  { %v449_v17 = vadd.f32 %v448_v14, %v444_v10  ;;  %v7195_v10 = vcombine.low %v1243_v5, %v1247_v6  ;;  %v1239_v14 = vld [vmem:[#allocation10 + $0x1a0] sm:$0xff] }
 0x226   :  { %v456_v18 = vsel %vm420_vm1, %v447_v16, 0.0 }
 0x227   :  { %v450_v19 = vrot.slane %v449_v17, 4  ;;  %v457_v20 = vadd.f32 %v456_v18, %v445_v15  ;;  %v1363_v15 = vld [vmem:[#allocation10 + $0x580] sm:$0xff] }
 0x229   :  { %v451_v21 = vadd.f32 %v450_v19, %v449_v17  ;;  %v458_v22 = vrot.slane %v457_v20, 4  ;;  %v1367_v17 = vld [vmem:[#allocation10 + $0x5a0] sm:$0xff] }
 0x22a   :  { %v7315_v19 = vcombine.low %v1363_v15, %v1367_v17 }
 0x22b   :  { %v452_v23 = vrot.slane %v451_v21, 2  ;;  %v459_v24 = vadd.f32 %v458_v22, %v457_v20  ;;  %v7316_v20 = vcombine.high %v1363_v15, %v1367_v17  ;;  %v1231_v22 = vld [vmem:[#allocation10 + $0x160] sm:$0xff] }
 0x22c   :  { %v1303_v17 = vld [vmem:[#allocation10 + $0x3a0] sm:$0xff] }
 0x22d   :  { %v453_v25 = vadd.f32 %v452_v23, %v451_v21  ;;  %v460_v26 = vrot.slane %v459_v24, 2  ;;  %v1227_v21 = vld [vmem:[#allocation10 + $0x140] sm:$0xff] }
 0x22e   :  { %v1355_v23 = vld [vmem:[#allocation10 + $0x540] sm:$0xff] }
 0x22f   :  { %v454_v27 = vrot.slane %v453_v25, 1  ;;  %v461_v28 = vadd.f32 %v460_v26, %v459_v24  ;;  %v7180_v24 = vcombine.high %v1227_v21, %v1231_v22  ;;  %v7179_v26 = vcombine.low %v1227_v21, %v1231_v22 }
 0x231   :  { %v455_v29 = vadd.f32 %v454_v27, %v453_v25  ;;  %v462_v30 = vrot.slane %v461_v28, 1  ;;  %v1359_v25 = vld [vmem:[#allocation10 + $0x560] sm:$0xff] }
 0x232   :  { %v7307_v27 = vcombine.low %v1355_v23, %v1359_v25 }
 0x233   :  { %v464_v31 = vmul.f32 0.083333336, %v455_v29  ;;  %v463_v32 = vadd.f32 %v462_v30, %v461_v28  ;;  %v7308_v28 = vcombine.high %v1355_v23, %v1359_v25  ;;  %v1219_v29 = vld [vmem:[#allocation10 + $0x100] sm:$0xff] }
 0x234   :  { %v1223_v30 = vld [vmem:[#allocation10 + $0x120] sm:$0xff] }
 0x235   :  { %v466_v33 = vadd.f32 1e-05, %v464_v31  ;;  %v465_v34 = vmul.f32 0.083333336, %v463_v32  ;;  %v1347_v31 = vld [vmem:[#allocation10 + $0x500] sm:$0xff]  ;;  %v7172_v32 = vcombine.high %v1219_v29, %v1223_v30 }
 0x236   :  { %v1295_v25 = vld [vmem:[#allocation10 + $0x360] sm:$0xff] }
 0x237   :  { %8753 = vrsqrt.f32 %v466_v33  ;;  %v467_v35 = vadd.f32 1e-05, %v465_v34  ;;  %v1351_v33 = vld [vmem:[#allocation10 + $0x520] sm:$0xff]  ;;  %v7171_v34 = vcombine.low %v1219_v29, %v1223_v30 }
 0x238   :  { %v7300_v36 = vcombine.high %v1347_v31, %v1351_v33 }
 0x239   :  { %8755 = vrsqrt.f32 %v467_v35  ;;  %v7299_v35 = vcombine.low %v1347_v31, %v1351_v33  ;;  %v1287_v33 = vld [vmem:[#allocation10 + $0x320] sm:$0xff] }
 0x244   :  { %v8754_v39 = vpop.eup %8753 }
 0x245   :  { %v470_v42 = vmul.f32 %v8754_v39, %v440_v7  ;;  %v472_v43 = vmul.f32 %v8754_v39, %v442_v8  ;;  %v1371_v7 = vld [vmem:[#allocation10 + $0x5c0] sm:$0xff]  ;;  %v7196_v8 = vcombine.high %v1243_v5, %v1247_v6 }
 0x246   :  { %v8756_v47 = vpop.eup %8755  ;;  %v7323_v11 = vcombine.low %v1371_v7, %v1375_v9  ;;  %v1339_v39 = vld [vmem:[#allocation10 + $0x4c0] sm:$0xff] }
 0x247   :  { %v485_v49 = vmul.f32 %v478_v38, %v470_v42  ;;  %v487_v50 = vmul.f32 %v478_v38, %v472_v43  ;;  %v471_v51 = vmul.f32 %v8756_v47, %v441_v12  ;;  %v473_v52 = vmul.f32 %v8756_v47, %v443_v13  ;;  %2764 = vmatprep.subr.bf16.mxu0 %v7196_v8  ;;  %v1235_v13 = vld [vmem:[#allocation10 + $0x180] sm:$0xff] }
 0x248   :  { %v7324_v12 = vcombine.high %v1371_v7, %v1375_v9  ;;  %v7188_v16 = vcombine.high %v1235_v13, %v1239_v14  ;;  %v7187_v18 = vcombine.low %v1235_v13, %v1239_v14  ;;  %v1215_v38 = vld [vmem:[#allocation10 + $0xe0] sm:$0xff] }
 0x249   :  { %v502_v53 = vadd.f32 %v493_v45, %v487_v50  ;;  %v488_v54 = vmul.f32 %v482_v46, %v473_v52  ;;  %v486_v55 = vmul.f32 %v482_v46, %v471_v51  ;;  %v500_v56 = vadd.f32 %v493_v45, %v485_v49  ;;  %v1343_v43 = vld [vmem:[#allocation10 + $0x4e0] sm:$0xff] }
 0x24a   :  { %2807 = vmatprep.subr.bf16.mxu1 %v7324_v12  ;;  %v7164_v42 = vcombine.high %v1211_v37, %v1215_v38  ;;  %v7163_v45 = vcombine.low %v1211_v37, %v1215_v38  ;;  %v7291_v46 = vcombine.low %v1339_v39, %v1343_v43  ;;  %v7292_v47 = vcombine.high %v1339_v39, %v1343_v43  ;;  %v1207_v49 = vld [vmem:[#allocation10 + $0xa0] sm:$0xff] }
 0x24b   :  { %v506_v57 = vmul.f32 0.2, %v502_v53  ;;  %v501_v58 = vadd.f32 %v497_v48, %v486_v55  ;;  %v503_v59 = vadd.f32 %v497_v48, %v488_v54  ;;  %v504_v60 = vmul.f32 0.2, %v500_v56  ;;  %v1203_v48 = vld [vmem:[#allocation10 + $0x80] sm:$0xff] }
 0x24c   :  { %v1331_v50 = vld [vmem:[#allocation10 + $0x480] sm:$0xff]  ;;  %v7156_v51 = vcombine.high %v1203_v48, %v1207_v49 }
 0x24d   :  { %v505_v61 = vmul.f32 0.2, %v501_v58  ;;  %v507_v62 = vmul.f32 0.2, %v503_v59  ;;  %v508_v63 = vmax.f32 %v500_v56, %v504_v60  ;;  %v510_v0 = vmax.f32 %v502_v53, %v506_v57  ;;  %v1335_v52 = vld [vmem:[#allocation10 + $0x4a0] sm:$0xff] }
 0x24e   :  { %v7155_v53 = vcombine.low %v1203_v48, %v1207_v49  ;;  %v7283_v54 = vcombine.low %v1331_v50, %v1335_v52  ;;  %v7284_v55 = vcombine.high %v1331_v50, %v1335_v52  ;;  %v1195_v56 = vld [vmem:[#allocation10 + $0x40] sm:$0xff] }
 0x24f   :  { %v509_v1 = vmax.f32 %v501_v58, %v505_v61  ;;  %v511_v2 = vmax.f32 %v503_v59, %v507_v62  ;;  %v512_v4 = vpack.c.bf16 %v510_v0, %v508_v63  ;;  %v1199_v57 = vld [vmem:[#allocation10 + $0x60] sm:$0xff] }
 0x250   :  { %v1323_v58 = vld [vmem:[#allocation10 + $0x440] sm:$0xff]  ;;  %v7148_v59 = vcombine.high %v1195_v56, %v1199_v57  ;;  %v7147_v61 = vcombine.low %v1195_v56, %v1199_v57 }
 0x251   :  { %v513_v3 = vpack.c.bf16 %v511_v2, %v509_v1  ;;  %v1327_v60 = vld [vmem:[#allocation10 + $0x460] sm:$0xff] }
 0x252   :  { %v7275_v62 = vcombine.low %v1323_v58, %v1327_v60  ;;  %v7276_v63 = vcombine.high %v1323_v58, %v1327_v60  ;;  %v1187_v0 = vld [vmem:[#allocation10] sm:$0xff] }
 0x253   :  { %951 = vmatprep.mubr.bf16.mxu0 %v513_v3  ;;  %994 = vmatprep.mubr.bf16.mxu1 %v513_v3  ;;  %v1191_v1 = vld [vmem:[#allocation10 + $0x20] sm:$0xff] }
 0x254   :  { %952 = vmatmul.mubr.bf16.vlgmr.msra.gmra.mxu0 %v512_v4  ;;  %995 = vmatmul.mubr.bf16.vlgmr.msra.gmra.mxu1 %v512_v4  ;;  %v1315_v2 = vld [vmem:[#allocation10 + $0x400] sm:$0xff]  ;;  %v7140_v3 = vcombine.high %v1187_v0, %v1191_v1  ;;  %v7139_v5 = vcombine.low %v1187_v0, %v1191_v1 }
 0x255   :  { %2765 = vmatpush1.bf16.msra.mxu0 %v7195_v10  ;;  %2808 = vmatpush1.bf16.msra.mxu1 %v7323_v11  ;;  %v1319_v4 = vld [vmem:[#allocation10 + $0x420] sm:$0xff] }
 0x256   :  { %2766 = vmatprep.subr.bf16.mxu0 %v7188_v16  ;;  %2809 = vmatprep.subr.bf16.mxu1 %v7316_v20  ;;  %v7267_v6 = vcombine.low %v1315_v2, %v1319_v4  ;;  %v7268_v7 = vcombine.high %v1315_v2, %v1319_v4  ;;  %v1307_v8 = vld [vmem:[#allocation10 + $0x3c0] sm:$0xff] }
 0x257   :  { %v1311_v9 = vld [vmem:[#allocation10 + $0x3e0] sm:$0xff] }
 0x258   :  { %v1435_v10 = vld [vmem:[#allocation10 + $0x7c0] sm:$0xff]  ;;  %v7260_v11 = vcombine.high %v1307_v8, %v1311_v9  ;;  %v7259_v13 = vcombine.low %v1307_v8, %v1311_v9 }
 0x259   :  { %2767 = vmatpush1.bf16.msra.mxu0 %v7187_v18  ;;  %2810 = vmatpush1.bf16.msra.mxu1 %v7315_v19  ;;  %v1439_v12 = vld [vmem:[#allocation10 + $0x7e0] sm:$0xff] }
 0x25a   :  { %2768 = vmatprep.subr.bf16.mxu0 %v7180_v24  ;;  %2811 = vmatprep.subr.bf16.mxu1 %v7308_v28  ;;  %v7387_v14 = vcombine.low %v1435_v10, %v1439_v12  ;;  %v7388_v15 = vcombine.high %v1435_v10, %v1439_v12  ;;  %v1299_v16 = vld [vmem:[#allocation10 + $0x380] sm:$0xff]  ;;  %v9091_v12 = vld [vmem:[#allocation10 + $0x1e8] sm:$0xff] }
 0x25b   :  { %v1427_v18 = vld [vmem:[#allocation10 + $0x780] sm:$0xff]  ;;  %v7252_v19 = vcombine.high %v1299_v16, %v1303_v17  ;;  %v7251_v21 = vcombine.low %v1299_v16, %v1303_v17 }
 0x25c   :  { %v1431_v20 = vld [vmem:[#allocation10 + $0x7a0] sm:$0xff] }
 0x25d   :  { %2769 = vmatpush1.bf16.msra.mxu0 %v7179_v26  ;;  %2812 = vmatpush1.bf16.msra.mxu1 %v7307_v27  ;;  %v7379_v22 = vcombine.low %v1427_v18, %v1431_v20  ;;  %v7380_v23 = vcombine.high %v1427_v18, %v1431_v20  ;;  %v1291_v24 = vld [vmem:[#allocation10 + $0x340] sm:$0xff] }
 0x25e   :  { %2770 = vmatprep.subr.bf16.mxu0 %v7172_v32  ;;  %2813 = vmatprep.subr.bf16.mxu1 %v7300_v36  ;;  %v1419_v26 = vld [vmem:[#allocation10 + $0x740] sm:$0xff]  ;;  %v7244_v27 = vcombine.high %v1291_v24, %v1295_v25  ;;  %v7243_v29 = vcombine.low %v1291_v24, %v1295_v25 }
 0x25f   :  { %v1423_v28 = vld [vmem:[#allocation10 + $0x760] sm:$0xff] }
 0x260   :  { %v7371_v30 = vcombine.low %v1419_v26, %v1423_v28  ;;  %v7372_v31 = vcombine.high %v1419_v26, %v1423_v28  ;;  %v1283_v32 = vld [vmem:[#allocation10 + $0x300] sm:$0xff] }
 0x261   :  { %2771 = vmatpush1.bf16.msra.mxu0 %v7171_v34  ;;  %2814 = vmatpush1.bf16.msra.mxu1 %v7299_v35  ;;  %v1411_v34 = vld [vmem:[#allocation10 + $0x700] sm:$0xff]  ;;  %v7236_v35 = vcombine.high %v1283_v32, %v1287_v33  ;;  %v7235_v37 = vcombine.low %v1283_v32, %v1287_v33 }
 0x262   :  { %2772 = vmatprep.subr.bf16.mxu0 %v7164_v42  ;;  %2815 = vmatprep.subr.bf16.mxu1 %v7292_v47  ;;  %v1415_v36 = vld [vmem:[#allocation10 + $0x720] sm:$0xff] }
 0x263   :  { %v7363_v38 = vcombine.low %v1411_v34, %v1415_v36  ;;  %v7364_v39 = vcombine.high %v1411_v34, %v1415_v36  ;;  %v1275_v42 = vld [vmem:[#allocation10 + $0x2c0] sm:$0xff] }
 0x264   :  { %v1279_v43 = vld [vmem:[#allocation10 + $0x2e0] sm:$0xff] }
 0x265   :  { %2773 = vmatpush1.bf16.msra.mxu0 %v7163_v45  ;;  %2816 = vmatpush1.bf16.msra.mxu1 %v7291_v46  ;;  %v1403_v45 = vld [vmem:[#allocation10 + $0x6c0] sm:$0xff]  ;;  %v7228_v46 = vcombine.high %v1275_v42, %v1279_v43  ;;  %v7227_v48 = vcombine.low %v1275_v42, %v1279_v43 }
 0x266   :  { %2774 = vmatprep.subr.bf16.mxu0 %v7156_v51  ;;  %2817 = vmatprep.subr.bf16.mxu1 %v7284_v55  ;;  %v1407_v47 = vld [vmem:[#allocation10 + $0x6e0] sm:$0xff] }
 0x267   :  { %v7355_v49 = vcombine.low %v1403_v45, %v1407_v47  ;;  %v7356_v50 = vcombine.high %v1403_v45, %v1407_v47  ;;  %v1267_v51 = vld [vmem:[#allocation10 + $0x280] sm:$0xff] }
 0x268   :  { %v1271_v52 = vld [vmem:[#allocation10 + $0x2a0] sm:$0xff] }
 0x269   :  { %2775 = vmatpush1.bf16.msra.mxu0 %v7155_v53  ;;  %2818 = vmatpush1.bf16.msra.mxu1 %v7283_v54  ;;  %v1395_v53 = vld [vmem:[#allocation10 + $0x680] sm:$0xff]  ;;  %v7220_v54 = vcombine.high %v1267_v51, %v1271_v52  ;;  %v7219_v56 = vcombine.low %v1267_v51, %v1271_v52 }
 0x26a   :  { %2776 = vmatprep.subr.bf16.mxu0 %v7148_v59  ;;  %2819 = vmatprep.subr.bf16.mxu1 %v7276_v63  ;;  %v1399_v55 = vld [vmem:[#allocation10 + $0x6a0] sm:$0xff] }
 0x26b   :  { %v7347_v57 = vcombine.low %v1395_v53, %v1399_v55  ;;  %v7348_v58 = vcombine.high %v1395_v53, %v1399_v55  ;;  %v1259_v59 = vld [vmem:[#allocation10 + $0x240] sm:$0xff] }
 0x26c   :  { %v1263_v60 = vld [vmem:[#allocation10 + $0x260] sm:$0xff] }
 0x26d   :  { %2777 = vmatpush1.bf16.msra.mxu0 %v7147_v61  ;;  %2820 = vmatpush1.bf16.msra.mxu1 %v7275_v62  ;;  %v1387_v61 = vld [vmem:[#allocation10 + $0x640] sm:$0xff]  ;;  %v7212_v62 = vcombine.high %v1259_v59, %v1263_v60  ;;  %v7211_v0 = vcombine.low %v1259_v59, %v1263_v60 }
 0x26e   :  { %2778 = vmatprep.subr.bf16.mxu0 %v7140_v3  ;;  %2821 = vmatprep.subr.bf16.mxu1 %v7268_v7  ;;  %v1391_v63 = vld [vmem:[#allocation10 + $0x660] sm:$0xff] }
 0x26f   :  { %v7339_v1 = vcombine.low %v1387_v61, %v1391_v63  ;;  %v7340_v2 = vcombine.high %v1387_v61, %v1391_v63  ;;  %v1251_v3 = vld [vmem:[#allocation10 + $0x200] sm:$0xff] }
 0x270   :  { %v1255_v4 = vld [vmem:[#allocation10 + $0x220] sm:$0xff] }
 0x271   :  { %2779 = vmatpush1.bf16.msra.mxu0 %v7139_v5  ;;  %2822 = vmatpush1.bf16.msra.mxu1 %v7267_v6  ;;  %v1379_v5 = vld [vmem:[#allocation10 + $0x600] sm:$0xff]  ;;  %v7203_v6 = vcombine.low %v1251_v3, %v1255_v4  ;;  %v7204_v7 = vcombine.high %v1251_v3, %v1255_v4 }
 0x272   :  { %2780 = vmatprep.subr.bf16.mxu0 %v7260_v11  ;;  %2823 = vmatprep.subr.bf16.mxu1 %v7388_v15  ;;  %v1383_v8 = vld [vmem:[#allocation10 + $0x620] sm:$0xff]  ;;  %v9089_v11 = vld [vmem:[#allocation10 + $0x1c8] sm:$0xff] }
 0x273   :  { %v7331_v9 = vcombine.low %v1379_v5, %v1383_v8  ;;  %v7332_v10 = vcombine.high %v1379_v5, %v1383_v8  ;;  %v9097_v15 = vld [vmem:[#allocation10 + $0x5e8] sm:$0xff]  ;;  %v7197_v16 = vcombine.low %v9089_v11, %v9091_v12 }
 0x274   :  { %v131_v20 = vld [vmem:[#allocation13 + $0x4] ss:$8 sm:$0xf] }
 0x275   :  { %2781 = vmatpush2.bf16.msra.mxu0 %v7259_v13  ;;  %2824 = vmatpush2.bf16.msra.mxu1 %v7387_v14  ;;  %v9093_v13 = vld [vmem:[#allocation10 + $0x5c8] sm:$0xff]  ;;  %v7198_v14 = vcombine.high %v9089_v11, %v9091_v12  ;;  %v582_v24 = vrot.slane %v131_v20, %v9074_v41  ;;  %v586_v28 = vrot.slane %v131_v20, %v9077_v44 }
 0x276   :  { %2782 = vmatprep.subr.bf16.mxu0 %v7252_v19  ;;  %2825 = vmatprep.subr.bf16.mxu1 %v7380_v23  ;;  %v7325_v17 = vcombine.low %v9093_v13, %v9097_v15  ;;  %v7326_v18 = vcombine.high %v9093_v13, %v9097_v15  ;;  %v9106_v19 = vsub.s32 2, %v9071_v40  ;;  %v9109_v23 = vsub.s32 3, %v9071_v40 }
 0x278   :  { %v590_v25 = vrot.slane %v131_v20, %v9106_v19 }
 0x279   :  { %2783 = vmatpush2.bf16.msra.mxu0 %v7251_v21  ;;  %2826 = vmatpush2.bf16.msra.mxu1 %v7379_v22 }
 0x27a   :  { %2784 = vmatprep.subr.bf16.mxu0 %v7244_v27  ;;  %2827 = vmatprep.subr.bf16.mxu1 %v7372_v31 }
 0x27d   :  { %2785 = vmatpush2.bf16.msra.mxu0 %v7243_v29  ;;  %2828 = vmatpush2.bf16.msra.mxu1 %v7371_v30  ;;  %v594_v29 = vrot.slane %v131_v20, %v9109_v23 }
 0x27e   :  { %2786 = vmatprep.subr.bf16.mxu0 %v7236_v35  ;;  %2829 = vmatprep.subr.bf16.mxu1 %v7364_v39 }
 0x281   :  { %2787 = vmatpush2.bf16.msra.mxu0 %v7235_v37  ;;  %2830 = vmatpush2.bf16.msra.mxu1 %v7363_v38 }
 0x282   :  { %2788 = vmatprep.subr.bf16.mxu0 %v7228_v46  ;;  %2831 = vmatprep.subr.bf16.mxu1 %v7356_v50 }
 0x285   :  { %2789 = vmatpush2.bf16.msra.mxu0 %v7227_v48  ;;  %2832 = vmatpush2.bf16.msra.mxu1 %v7355_v49 }
 0x286   :  { %2790 = vmatprep.subr.bf16.mxu0 %v7220_v54  ;;  %2833 = vmatprep.subr.bf16.mxu1 %v7348_v58 }
 0x289   :  { %2791 = vmatpush2.bf16.msra.mxu0 %v7219_v56  ;;  %2834 = vmatpush2.bf16.msra.mxu1 %v7347_v57 }
 0x28a   :  { %2792 = vmatprep.subr.bf16.mxu0 %v7212_v62  ;;  %2835 = vmatprep.subr.bf16.mxu1 %v7340_v2 }
 0x28d   :  { %2793 = vmatpush2.bf16.msra.mxu0 %v7211_v0  ;;  %2836 = vmatpush2.bf16.msra.mxu1 %v7339_v1 }
 0x28e   :  { %2794 = vmatprep.subr.bf16.mxu0 %v7204_v7  ;;  %2837 = vmatprep.subr.bf16.mxu1 %v7332_v10 }
 0x291   :  { %2795 = vmatpush2.bf16.msra.mxu0 %v7203_v6  ;;  %2838 = vmatpush2.bf16.msra.mxu1 %v7331_v9 }
 0x292   :  { %2850 = vmatprep.subr.bf16.mxu0 %v7198_v14  ;;  %2893 = vmatprep.subr.bf16.mxu1 %v7326_v18 }
 0x314   :  { %v953_v21 = vpop.f32.mrf.mxu0  ;;  %v996_v22 = vpop.f32.mrf.mxu1 }
 0x315   :  { %v954_v34 = vadd.f32 %v953_v21, %v582_v24  ;;  %v997_v35 = vadd.f32 %v996_v22, %v590_v25 }
 0x316   :  { %v955_v26 = vpop.f32.mrf.mxu0  ;;  %v998_v27 = vpop.f32.mrf.mxu1 }
 0x317   :  { %v956_v45 = vadd.f32 %v955_v26, %v586_v28  ;;  %v999_v46 = vadd.f32 %v998_v27, %v594_v29 }
 0x318   :  { %v957_v30 = vpop.f32.mrf.mxu0  ;;  %v1000_v31 = vpop.f32.mrf.mxu1 }
 0x319   :  { %v958_v32 = vadd.f32 %v957_v30, %v582_v24  ;;  %v1001_v33 = vadd.f32 %v1000_v31, %v590_v25 }
 0x31a   :  { %v959_v36 = vpop.f32.mrf.mxu0  ;;  %v1002_v37 = vpop.f32.mrf.mxu1 }
 0x31b   :  { %v1005_v38 = vsel %vm420_vm1, %v958_v32, 0.0  ;;  %v1021_v39 = vsel %vm420_vm1, %v1001_v33, 0.0  ;;  %v960_v42 = vadd.f32 %v959_v36, %v586_v28  ;;  %v1003_v43 = vadd.f32 %v1002_v37, %v594_v29 }
 0x31c   :  { %v1006_v47 = vadd.f32 %v1005_v38, %v954_v34  ;;  %v1022_v48 = vadd.f32 %v1021_v39, %v997_v35 }
 0x31d   :  { %v1013_v49 = vsel %vm420_vm1, %v960_v42, 0.0  ;;  %v1029_v50 = vsel %vm420_vm1, %v1003_v43, 0.0 }
 0x31e   :  { %v1007_v51 = vrot.slane %v1006_v47, 4  ;;  %v1023_v52 = vrot.slane %v1022_v48, 4  ;;  %v1014_v53 = vadd.f32 %v1013_v49, %v956_v45  ;;  %v1030_v54 = vadd.f32 %v1029_v50, %v999_v46 }
 0x320   :  { %v1008_v55 = vadd.f32 %v1007_v51, %v1006_v47  ;;  %v1024_v56 = vadd.f32 %v1023_v52, %v1022_v48  ;;  %v1015_v57 = vrot.slane %v1014_v53, 4  ;;  %v1031_v58 = vrot.slane %v1030_v54, 4 }
 0x322   :  { %v1009_v59 = vrot.slane %v1008_v55, 2  ;;  %v1025_v60 = vrot.slane %v1024_v56, 2  ;;  %v1016_v61 = vadd.f32 %v1015_v57, %v1014_v53  ;;  %v1032_v62 = vadd.f32 %v1031_v58, %v1030_v54 }
 0x324   :  { %v1010_v63 = vadd.f32 %v1009_v59, %v1008_v55  ;;  %v1026_v0 = vadd.f32 %v1025_v60, %v1024_v56  ;;  %v1017_v1 = vrot.slane %v1016_v61, 2  ;;  %v1033_v2 = vrot.slane %v1032_v62, 2 }
 0x326   :  { %v1011_v3 = vrot.slane %v1010_v63, 1  ;;  %v1027_v4 = vrot.slane %v1026_v0, 1  ;;  %v1018_v5 = vadd.f32 %v1017_v1, %v1016_v61  ;;  %v1034_v6 = vadd.f32 %v1033_v2, %v1032_v62 }
 0x328   :  { %v1012_v7 = vadd.f32 %v1011_v3, %v1010_v63  ;;  %v1028_v8 = vadd.f32 %v1027_v4, %v1026_v0  ;;  %v1019_v9 = vrot.slane %v1018_v5, 1  ;;  %v1035_v10 = vrot.slane %v1034_v6, 1 }
 0x32a   :  { %v1037_v14 = vmul.f32 0.083333336, %v1012_v7  ;;  %v1039_v18 = vmul.f32 0.083333336, %v1028_v8  ;;  %v1020_v20 = vadd.f32 %v1019_v9, %v1018_v5  ;;  %v1036_v21 = vadd.f32 %v1035_v10, %v1034_v6 }
 0x32c   :  { %v9119_v22 = vsub.f32 %v954_v34, %v1037_v14  ;;  %v9121_v24 = vsub.f32 %v958_v32, %v1037_v14  ;;  %v9123_v25 = vsub.f32 %v997_v35, %v1039_v18  ;;  %v9125_v26 = vsub.f32 %v1001_v33, %v1039_v18 }
 0x32d   :  { %v1038_v27 = vmul.f32 0.083333336, %v1020_v20  ;;  %v1040_v28 = vmul.f32 0.083333336, %v1036_v21 }
 0x32e   :  { %v1049_v29 = vmul.f32 %v9119_v22, %v9119_v22  ;;  %v1053_v30 = vmul.f32 %v9121_v24, %v9121_v24  ;;  %v1051_v31 = vmul.f32 %v9123_v25, %v9123_v25  ;;  %v1055_v34 = vmul.f32 %v9125_v26, %v9125_v26 }
 0x32f   :  { %v9135_v32 = vsub.f32 %v956_v45, %v1038_v27  ;;  %v9137_v35 = vsub.f32 %v960_v42, %v1038_v27  ;;  %v9139_v33 = vsub.f32 %v999_v46, %v1040_v28  ;;  %v9141_v36 = vsub.f32 %v1003_v43, %v1040_v28 }
 0x330   :  { %v1057_v37 = vsel %vm420_vm1, %v1053_v30, 0.0  ;;  %v1073_v38 = vsel %vm420_vm1, %v1055_v34, 0.0  ;;  %v133_v34 = vld [vmem:[#allocation13 + $0x5] ss:$8 sm:$0xf] }
 0x331   :  { %v1058_v39 = vadd.f32 %v1057_v37, %v1049_v29  ;;  %v1074_v47 = vadd.f32 %v1073_v38, %v1051_v31  ;;  %v1050_v48 = vmul.f32 %v9135_v32, %v9135_v32  ;;  %v1054_v49 = vmul.f32 %v9137_v35, %v9137_v35  ;;  %v135_v37 = vld [vmem:[#allocation13 + $0x6] ss:$8 sm:$0xf] }
 0x332   :  { %v1052_v42 = vmul.f32 %v9139_v33, %v9139_v33  ;;  %v1056_v45 = vmul.f32 %v9141_v36, %v9141_v36  ;;  %v1113_v38 = vrot.slane %v133_v34, %v9074_v41 }
 0x333   :  { %v1059_v43 = vrot.slane %v1058_v39, 4  ;;  %v1075_v46 = vrot.slane %v1074_v47, 4  ;;  %v1065_v50 = vsel %vm420_vm1, %v1054_v49, 0.0 }
 0x334   :  { %v1066_v51 = vadd.f32 %v1065_v50, %v1050_v48  ;;  %v1081_v52 = vsel %vm420_vm1, %v1056_v45, 0.0  ;;  %v1142_v45 = vrot.slane %v135_v37, %v9074_v41 }
 0x335   :  { %v1060_v53 = vadd.f32 %v1059_v43, %v1058_v39  ;;  %v1076_v54 = vadd.f32 %v1075_v46, %v1074_v47  ;;  %v1082_v55 = vadd.f32 %v1081_v52, %v1052_v42  ;;  %v1121_v47 = vrot.slane %v133_v34, %v9106_v19 }
 0x336   :  { %v1067_v56 = vrot.slane %v1066_v51, 4  ;;  %v1150_v43 = vrot.slane %v135_v37, %v9106_v19  ;;  %v1125_v52 = vrot.slane %v133_v34, %v9109_v23 }
 0x337   :  { %v1061_v57 = vrot.slane %v1060_v53, 2  ;;  %v1077_v58 = vrot.slane %v1076_v54, 2  ;;  %v1083_v59 = vrot.slane %v1082_v55, 4 }
 0x338   :  { %v1068_v60 = vadd.f32 %v1067_v56, %v1066_v51  ;;  %v1117_v51 = vrot.slane %v133_v34, %v9077_v44  ;;  %v1146_v56 = vrot.slane %v135_v37, %v9077_v44 }
 0x339   :  { %v1062_v61 = vadd.f32 %v1061_v57, %v1060_v53  ;;  %v1078_v62 = vadd.f32 %v1077_v58, %v1076_v54  ;;  %v1084_v63 = vadd.f32 %v1083_v59, %v1082_v55 }
 0x33a   :  { %v1069_v0 = vrot.slane %v1068_v60, 2 }
 0x33b   :  { %v1063_v1 = vrot.slane %v1062_v61, 1  ;;  %v1079_v2 = vrot.slane %v1078_v62, 1  ;;  %v1085_v3 = vrot.slane %v1084_v63, 2 }
 0x33c   :  { %v1070_v4 = vadd.f32 %v1069_v0, %v1068_v60 }
 0x33d   :  { %v1064_v5 = vadd.f32 %v1063_v1, %v1062_v61  ;;  %v1080_v6 = vadd.f32 %v1079_v2, %v1078_v62  ;;  %v1086_v7 = vadd.f32 %v1085_v3, %v1084_v63 }
 0x33e   :  { %v1071_v8 = vrot.slane %v1070_v4, 1 }
 0x33f   :  { %v1089_v9 = vmul.f32 0.083333336, %v1064_v5  ;;  %v1091_v10 = vmul.f32 0.083333336, %v1080_v6  ;;  %v1087_v14 = vrot.slane %v1086_v7, 1 }
 0x340   :  { %v1072_v18 = vadd.f32 %v1071_v8, %v1070_v4 }
 0x341   :  { %v1093_v20 = vadd.f32 1e-05, %v1089_v9  ;;  %v1095_v21 = vadd.f32 1e-05, %v1091_v10  ;;  %v1088_v27 = vadd.f32 %v1087_v14, %v1086_v7 }
 0x342   :  { %v1090_v28 = vmul.f32 0.083333336, %v1072_v18 }
 0x343   :  { %8757 = vrsqrt.f32 %v1093_v20  ;;  %v1092_v29 = vmul.f32 0.083333336, %v1088_v27 }
 0x344   :  { %8759 = vrsqrt.f32 %v1095_v21  ;;  %v1094_v30 = vadd.f32 1e-05, %v1090_v28 }
 0x345   :  { %v1096_v31 = vadd.f32 1e-05, %v1092_v29 }
 0x346   :  { %8761 = vrsqrt.f32 %v1094_v30 }
 0x347   :  { %8763 = vrsqrt.f32 %v1096_v31 }
 0x350   :  { %v8758_v39 = vpop.eup %8757 }
 0x351   :  { %v8760_v48 = vpop.eup %8759  ;;  %v1101_v49 = vmul.f32 %v8758_v39, %v9119_v22  ;;  %v1105_v42 = vmul.f32 %v8758_v39, %v9121_v24  ;;  %v1154_v22 = vrot.slane %v135_v37, %v9109_v23  ;;  %v1236_v37 = vld [vmem:[#allocation10 + $0x188] sm:$0xff] }
 0x352   :  { %v1103_v46 = vmul.f32 %v8760_v48, %v9123_v25  ;;  %v1107_v50 = vmul.f32 %v8760_v48, %v9125_v26  ;;  %v1368_v48 = vld [vmem:[#allocation10 + $0x5a8] sm:$0xff] }
 0x353   :  { %v8762_v53 = vpop.eup %8761  ;;  %v1130_v54 = vmul.f32 %v1113_v38, %v1101_v49  ;;  %v1134_v55 = vmul.f32 %v1113_v38, %v1105_v42  ;;  %v1240_v38 = vld [vmem:[#allocation10 + $0x1a8] sm:$0xff] }
 0x354   :  { %v8764_v24 = vpop.eup %8763  ;;  %v1132_v57 = vmul.f32 %v1121_v47, %v1103_v46  ;;  %v1136_v58 = vmul.f32 %v1121_v47, %v1107_v50  ;;  %v1102_v59 = vmul.f32 %v8762_v53, %v9135_v32  ;;  %v1106_v25 = vmul.f32 %v8762_v53, %v9137_v35  ;;  %v1364_v47 = vld [vmem:[#allocation10 + $0x588] sm:$0xff] }
 0x355   :  { %v1163_v60 = vadd.f32 %v1142_v45, %v1134_v55  ;;  %v1104_v26 = vmul.f32 %v8764_v24, %v9139_v33  ;;  %v1108_v61 = vmul.f32 %v8764_v24, %v9141_v36  ;;  %v1159_v62 = vadd.f32 %v1142_v45, %v1130_v54  ;;  %v1228_v46 = vld [vmem:[#allocation10 + $0x148] sm:$0xff] }
 0x356   :  { %v1165_v63 = vadd.f32 %v1150_v43, %v1136_v58  ;;  %v1131_v0 = vmul.f32 %v1117_v51, %v1102_v59  ;;  %v1135_v1 = vmul.f32 %v1117_v51, %v1106_v25  ;;  %v1161_v2 = vadd.f32 %v1150_v43, %v1132_v57  ;;  %v1232_v50 = vld [vmem:[#allocation10 + $0x168] sm:$0xff] }
 0x357   :  { %v1171_v3 = vmul.f32 0.2, %v1163_v60  ;;  %v1133_v4 = vmul.f32 %v1125_v52, %v1104_v26  ;;  %v1137_v5 = vmul.f32 %v1125_v52, %v1108_v61  ;;  %v1167_v6 = vmul.f32 0.2, %v1159_v62  ;;  %v1356_v52 = vld [vmem:[#allocation10 + $0x548] sm:$0xff] }
 0x358   :  { %v1173_v7 = vmul.f32 0.2, %v1165_v63  ;;  %v1164_v8 = vadd.f32 %v1146_v56, %v1135_v1  ;;  %v1160_v9 = vadd.f32 %v1146_v56, %v1131_v0  ;;  %v1169_v32 = vmul.f32 0.2, %v1161_v2  ;;  %v1360_v53 = vld [vmem:[#allocation10 + $0x568] sm:$0xff] }
 0x359   :  { %v1166_v10 = vadd.f32 %v1154_v22, %v1137_v5  ;;  %v1162_v35 = vadd.f32 %v1154_v22, %v1133_v4  ;;  %v1175_v36 = vmax.f32 %v1159_v62, %v1167_v6  ;;  %v1179_v21 = vmax.f32 %v1163_v60, %v1171_v3  ;;  %v1220_v24 = vld [vmem:[#allocation10 + $0x108] sm:$0xff] }
 0x35a   :  { %v1172_v14 = vmul.f32 0.2, %v1164_v8  ;;  %v1168_v18 = vmul.f32 0.2, %v1160_v9  ;;  %v1177_v29 = vmax.f32 %v1161_v2, %v1169_v32  ;;  %v1181_v30 = vmax.f32 %v1165_v63, %v1173_v7  ;;  %v1224_v57 = vld [vmem:[#allocation10 + $0x128] sm:$0xff] }
 0x35b   :  { %v1174_v33 = vmul.f32 0.2, %v1166_v10  ;;  %v1170_v20 = vmul.f32 0.2, %v1162_v35  ;;  %v9175_v42 = vpack.c.bf16 %v1179_v21, %v1175_v36  ;;  %v7190_v43 = vcombine.high %v1236_v37, %v1240_v38  ;;  %v1348_v58 = vld [vmem:[#allocation10 + $0x508] sm:$0xff] }
 0x35c   :  { %v1176_v27 = vmax.f32 %v1160_v9, %v1168_v18  ;;  %v1180_v28 = vmax.f32 %v1164_v8, %v1172_v14  ;;  %v9178_v45 = vpack.c.bf16 %v1181_v30, %v1177_v29  ;;  %v7318_v51 = vcombine.high %v1364_v47, %v1368_v48  ;;  %v1352_v59 = vld [vmem:[#allocation10 + $0x528] sm:$0xff] }
 0x35d   :  { %v1178_v31 = vmax.f32 %v1162_v35, %v1170_v20  ;;  %v1182_v34 = vmax.f32 %v1166_v10, %v1174_v33  ;;  %v7189_v54 = vcombine.low %v1236_v37, %v1240_v38  ;;  %v7317_v55 = vcombine.low %v1364_v47, %v1368_v48  ;;  %v1340_v25 = vld [vmem:[#allocation10 + $0x4c8] sm:$0xff] }
 0x35e   :  { %v9171_v39 = vpack.c.bf16 %v1180_v28, %v1176_v27  ;;  %v7182_v56 = vcombine.high %v1228_v46, %v1232_v50  ;;  %v7310_v22 = vcombine.high %v1356_v52, %v1360_v53  ;;  %v7181_v11 = vcombine.low %v1228_v46, %v1232_v50  ;;  %v1344_v60 = vld [vmem:[#allocation10 + $0x4e8] sm:$0xff] }
 0x35f   :  { %v9173_v49 = vpack.c.bf16 %v1182_v34, %v1178_v31  ;;  %v7309_v12 = vcombine.low %v1356_v52, %v1360_v53  ;;  %v7174_v13 = vcombine.high %v1220_v24, %v1224_v57  ;;  %v7302_v15 = vcombine.high %v1348_v58, %v1352_v59  ;;  %v1204_v0 = vld [vmem:[#allocation10 + $0x88] sm:$0xff] }
 0x360   :  { %2796 = vmatprep.mubr.bf16.mxu0 %v9171_v39  ;;  %v7173_v26 = vcombine.low %v1220_v24, %v1224_v57  ;;  %v7301_v61 = vcombine.low %v1348_v58, %v1352_v59  ;;  %v7294_v63 = vcombine.high %v1340_v25, %v1344_v60  ;;  %v1208_v1 = vld [vmem:[#allocation10 + $0xa8] sm:$0xff]  ;;  %v7293_v5 = vcombine.low %v1340_v25, %v1344_v60 }
 0x361   :  { %2839 = vmatprep.mubr.bf16.mxu1 %v9173_v49  ;;  %2797 = vmatmul.mubr.bf16.vlgmr.msra.gmra.mxu0 %v9175_v42  ;;  %v1332_v2 = vld [vmem:[#allocation10 + $0x488] sm:$0xff]  ;;  %v7158_v6 = vcombine.high %v1204_v0, %v1208_v1  ;;  %v7157_v35 = vcombine.low %v1204_v0, %v1208_v1 }
 0x362   :  { %2840 = vmatmul.mubr.bf16.vlgmr.msra.gmra.mxu1 %v9178_v45  ;;  %2851 = vmatpush1.bf16.msra.mxu0 %v7197_v16  ;;  %v1212_v16 = vld [vmem:[#allocation10 + $0xc8] sm:$0xff] }
 0x363   :  { %2894 = vmatpush1.bf16.msra.mxu1 %v7325_v17  ;;  %2882 = vmatprep.mubr.bf16.mxu0 %v9171_v39  ;;  %v1216_v17 = vld [vmem:[#allocation10 + $0xe8] sm:$0xff] }
 0x364   :  { %2925 = vmatprep.mubr.bf16.mxu1 %v9173_v49  ;;  %2852 = vmatprep.subr.bf16.mxu0 %v7190_v43  ;;  %v7166_v62 = vcombine.high %v1212_v16, %v1216_v17  ;;  %v1336_v3 = vld [vmem:[#allocation10 + $0x4a8] sm:$0xff]  ;;  %v7165_v4 = vcombine.low %v1212_v16, %v1216_v17 }
 0x365   :  { %2895 = vmatprep.subr.bf16.mxu1 %v7318_v51  ;;  %v7286_v7 = vcombine.high %v1332_v2, %v1336_v3  ;;  %v1196_v8 = vld [vmem:[#allocation10 + $0x48] sm:$0xff]  ;;  %v7285_v14 = vcombine.low %v1332_v2, %v1336_v3 }
 0x366   :  { %2853 = vmatpush1.bf16.msra.mxu0 %v7189_v54  ;;  %v1200_v9 = vld [vmem:[#allocation10 + $0x68] sm:$0xff] }
 0x367   :  { %2896 = vmatpush1.bf16.msra.mxu1 %v7317_v55  ;;  %2854 = vmatprep.subr.bf16.mxu0 %v7182_v56  ;;  %v1324_v32 = vld [vmem:[#allocation10 + $0x448] sm:$0xff]  ;;  %v7150_v18 = vcombine.high %v1196_v8, %v1200_v9  ;;  %v7149_v28 = vcombine.low %v1196_v8, %v1200_v9 }
 0x368   :  { %2897 = vmatprep.subr.bf16.mxu1 %v7310_v22  ;;  %v1328_v10 = vld [vmem:[#allocation10 + $0x468] sm:$0xff] }
 0x369   :  { %v7278_v33 = vcombine.high %v1324_v32, %v1328_v10  ;;  %v1188_v20 = vld [vmem:[#allocation10 + $0x8] sm:$0xff]  ;;  %v7277_v29 = vcombine.low %v1324_v32, %v1328_v10 }
 0x36a   :  { %2855 = vmatpush1.bf16.msra.mxu0 %v7181_v11  ;;  %v1192_v36 = vld [vmem:[#allocation10 + $0x28] sm:$0xff] }
 0x36b   :  { %2898 = vmatpush1.bf16.msra.mxu1 %v7309_v12  ;;  %2856 = vmatprep.subr.bf16.mxu0 %v7174_v13  ;;  %v1316_v21 = vld [vmem:[#allocation10 + $0x408] sm:$0xff]  ;;  %v7142_v30 = vcombine.high %v1188_v20, %v1192_v36  ;;  %v7141_v48 = vcombine.low %v1188_v20, %v1192_v36 }
 0x36c   :  { %2899 = vmatprep.subr.bf16.mxu1 %v7302_v15  ;;  %v1320_v27 = vld [vmem:[#allocation10 + $0x428] sm:$0xff] }
 0x36d   :  { %v7270_v31 = vcombine.high %v1316_v21, %v1320_v27  ;;  %v1308_v34 = vld [vmem:[#allocation10 + $0x3c8] sm:$0xff]  ;;  %v7269_v43 = vcombine.low %v1316_v21, %v1320_v27 }
 0x36e   :  { %2857 = vmatpush1.bf16.msra.mxu0 %v7173_v26  ;;  %v1312_v37 = vld [vmem:[#allocation10 + $0x3e8] sm:$0xff] }
 0x36f   :  { %2900 = vmatpush1.bf16.msra.mxu1 %v7301_v61  ;;  %2858 = vmatprep.subr.bf16.mxu0 %v7166_v62  ;;  %v1436_v38 = vld [vmem:[#allocation10 + $0x7c8] sm:$0xff]  ;;  %v7262_v46 = vcombine.high %v1308_v34, %v1312_v37  ;;  %v7261_v55 = vcombine.low %v1308_v34, %v1312_v37 }
 0x370   :  { %2901 = vmatprep.subr.bf16.mxu1 %v7294_v63  ;;  %v1440_v47 = vld [vmem:[#allocation10 + $0x7e8] sm:$0xff] }
 0x371   :  { %v7390_v50 = vcombine.high %v1436_v38, %v1440_v47  ;;  %v1300_v51 = vld [vmem:[#allocation10 + $0x388] sm:$0xff]  ;;  %v7389_v56 = vcombine.low %v1436_v38, %v1440_v47 }
 0x372   :  { %2859 = vmatpush1.bf16.msra.mxu0 %v7165_v4  ;;  %v1304_v52 = vld [vmem:[#allocation10 + $0x3a8] sm:$0xff] }
 0x373   :  { %2902 = vmatpush1.bf16.msra.mxu1 %v7293_v5  ;;  %2860 = vmatprep.subr.bf16.mxu0 %v7158_v6  ;;  %v1428_v53 = vld [vmem:[#allocation10 + $0x788] sm:$0xff]  ;;  %v7254_v22 = vcombine.high %v1300_v51, %v1304_v52  ;;  %v7253_v12 = vcombine.low %v1300_v51, %v1304_v52  ;;  %v1245_v52 = vld [vmem:[#allocation10 + $0x1d0] sm:$0xff] }
 0x374   :  { %2903 = vmatprep.subr.bf16.mxu1 %v7286_v7  ;;  %v1432_v54 = vld [vmem:[#allocation10 + $0x7a8] sm:$0xff] }
 0x375   :  { %v7382_v24 = vcombine.high %v1428_v53, %v1432_v54  ;;  %v1292_v57 = vld [vmem:[#allocation10 + $0x348] sm:$0xff]  ;;  %v7381_v13 = vcombine.low %v1428_v53, %v1432_v54  ;;  %v1249_v53 = vld [vmem:[#allocation10 + $0x1f0] sm:$0xff] }
 0x376   :  { %2861 = vmatpush1.bf16.msra.mxu0 %v7157_v35  ;;  %v1296_v58 = vld [vmem:[#allocation10 + $0x368] sm:$0xff]  ;;  %v1373_v54 = vld [vmem:[#allocation10 + $0x5d0] sm:$0xff] }
 0x377   :  { %2904 = vmatpush1.bf16.msra.mxu1 %v7285_v14  ;;  %2862 = vmatprep.subr.bf16.mxu0 %v7150_v18  ;;  %v1420_v59 = vld [vmem:[#allocation10 + $0x748] sm:$0xff]  ;;  %v7246_v15 = vcombine.high %v1292_v57, %v1296_v58  ;;  %v7245_v61 = vcombine.low %v1292_v57, %v1296_v58  ;;  %v1237_v58 = vld [vmem:[#allocation10 + $0x190] sm:$0xff] }
 0x378   :  { %2905 = vmatprep.subr.bf16.mxu1 %v7278_v33  ;;  %v1424_v11 = vld [vmem:[#allocation10 + $0x768] sm:$0xff] }
 0x379   :  { %v7374_v16 = vcombine.high %v1420_v59, %v1424_v11  ;;  %v1284_v17 = vld [vmem:[#allocation10 + $0x308] sm:$0xff]  ;;  %v7373_v62 = vcombine.low %v1420_v59, %v1424_v11  ;;  %v1241_v59 = vld [vmem:[#allocation10 + $0x1b0] sm:$0xff]  ;;  %v7199_v11 = vcombine.low %v1245_v52, %v1249_v53 }
 0x37a   :  { %2863 = vmatpush1.bf16.msra.mxu0 %v7149_v28  ;;  %v1288_v25 = vld [vmem:[#allocation10 + $0x328] sm:$0xff] }
 0x37b   :  { %2906 = vmatpush1.bf16.msra.mxu1 %v7277_v29  ;;  %2864 = vmatprep.subr.bf16.mxu0 %v7142_v30  ;;  %v1412_v60 = vld [vmem:[#allocation10 + $0x708] sm:$0xff]  ;;  %v7238_v63 = vcombine.high %v1284_v17, %v1288_v25  ;;  %v7237_v5 = vcombine.low %v1284_v17, %v1288_v25  ;;  %v1229_v17 = vld [vmem:[#allocation10 + $0x150] sm:$0xff] }
 0x37c   :  { %2907 = vmatprep.subr.bf16.mxu1 %v7270_v31  ;;  %v1416_v26 = vld [vmem:[#allocation10 + $0x728] sm:$0xff]  ;;  %v1233_v25 = vld [vmem:[#allocation10 + $0x170] sm:$0xff] }
 0x37d   :  { %v7366_v0 = vcombine.high %v1412_v60, %v1416_v26  ;;  %v1276_v1 = vld [vmem:[#allocation10 + $0x2c8] sm:$0xff]  ;;  %v7365_v6 = vcombine.low %v1412_v60, %v1416_v26  ;;  %v1357_v26 = vld [vmem:[#allocation10 + $0x550] sm:$0xff] }
 0x37e   :  { %2865 = vmatpush1.bf16.msra.mxu0 %v7141_v48  ;;  %v1280_v2 = vld [vmem:[#allocation10 + $0x2e8] sm:$0xff] }
 0x37f   :  { %2908 = vmatpush1.bf16.msra.mxu1 %v7269_v43  ;;  %2866 = vmatprep.subr.bf16.mxu0 %v7262_v46  ;;  %v1404_v3 = vld [vmem:[#allocation10 + $0x6c8] sm:$0xff]  ;;  %v7230_v7 = vcombine.high %v1276_v1, %v1280_v2  ;;  %v7229_v14 = vcombine.low %v1276_v1, %v1280_v2  ;;  %v1221_v2 = vld [vmem:[#allocation10 + $0x110] sm:$0xff] }
 0x380   :  { %2909 = vmatprep.subr.bf16.mxu1 %v7390_v50  ;;  %v1408_v4 = vld [vmem:[#allocation10 + $0x6e8] sm:$0xff] }
 0x381   :  { %v7358_v8 = vcombine.high %v1404_v3, %v1408_v4  ;;  %v1268_v9 = vld [vmem:[#allocation10 + $0x288] sm:$0xff]  ;;  %v7357_v18 = vcombine.low %v1404_v3, %v1408_v4  ;;  %v1225_v3 = vld [vmem:[#allocation10 + $0x130] sm:$0xff] }
 0x382   :  { %2867 = vmatpush2.bf16.msra.mxu0 %v7261_v55  ;;  %v1272_v32 = vld [vmem:[#allocation10 + $0x2a8] sm:$0xff]  ;;  %v1377_v55 = vld [vmem:[#allocation10 + $0x5f0] sm:$0xff] }
 0x383   :  { %2910 = vmatpush2.bf16.msra.mxu1 %v7389_v56  ;;  %2868 = vmatprep.subr.bf16.mxu0 %v7254_v22  ;;  %v1396_v10 = vld [vmem:[#allocation10 + $0x688] sm:$0xff]  ;;  %v7222_v33 = vcombine.high %v1268_v9, %v1272_v32  ;;  %v7221_v29 = vcombine.low %v1268_v9, %v1272_v32  ;;  %v7328_v57 = vcombine.high %v1373_v54, %v1377_v55  ;;  %v1349_v4 = vld [vmem:[#allocation10 + $0x510] sm:$0xff] }
 0x384   :  { %2911 = vmatprep.subr.bf16.mxu1 %v7382_v24  ;;  %v1400_v35 = vld [vmem:[#allocation10 + $0x6a8] sm:$0xff]  ;;  %v7200_v24 = vcombine.high %v1245_v52, %v1249_v53  ;;  %v1213_v32 = vld [vmem:[#allocation10 + $0xd0] sm:$0xff] }
 0x385   :  { %v7350_v20 = vcombine.high %v1396_v10, %v1400_v35  ;;  %v1260_v36 = vld [vmem:[#allocation10 + $0x248] sm:$0xff]  ;;  %v7349_v30 = vcombine.low %v1396_v10, %v1400_v35  ;;  %v1217_v10 = vld [vmem:[#allocation10 + $0xf0] sm:$0xff] }
 0x386   :  { %2869 = vmatpush2.bf16.msra.mxu0 %v7253_v12  ;;  %v1264_v21 = vld [vmem:[#allocation10 + $0x268] sm:$0xff]  ;;  %v1365_v12 = vld [vmem:[#allocation10 + $0x590] sm:$0xff] }
 0x387   :  { %2912 = vmatpush2.bf16.msra.mxu1 %v7381_v13  ;;  %2870 = vmatprep.subr.bf16.mxu0 %v7246_v15  ;;  %v1388_v27 = vld [vmem:[#allocation10 + $0x648] sm:$0xff]  ;;  %v7214_v31 = vcombine.high %v1260_v36, %v1264_v21  ;;  %v7213_v43 = vcombine.low %v1260_v36, %v1264_v21  ;;  %v1369_v13 = vld [vmem:[#allocation10 + $0x5b0] sm:$0xff]  ;;  %v7327_v15 = vcombine.low %v1373_v54, %v1377_v55 }
 0x388   :  { %2913 = vmatprep.subr.bf16.mxu1 %v7374_v16  ;;  %v1392_v28 = vld [vmem:[#allocation10 + $0x668] sm:$0xff]  ;;  %v7192_v16 = vcombine.high %v1237_v58, %v1241_v59  ;;  %v7320_v60 = vcombine.high %v1365_v12, %v1369_v13  ;;  %v1341_v35 = vld [vmem:[#allocation10 + $0x4d0] sm:$0xff] }
 0x389   :  { %v7342_v34 = vcombine.high %v1388_v27, %v1392_v28  ;;  %v1252_v37 = vld [vmem:[#allocation10 + $0x208] sm:$0xff]  ;;  %v7341_v46 = vcombine.low %v1388_v27, %v1392_v28  ;;  %v1205_v21 = vld [vmem:[#allocation10 + $0x90] sm:$0xff] }
 0x38a   :  { %2871 = vmatpush2.bf16.msra.mxu0 %v7245_v61  ;;  %v1256_v38 = vld [vmem:[#allocation10 + $0x228] sm:$0xff]  ;;  %v1361_v61 = vld [vmem:[#allocation10 + $0x570] sm:$0xff] }
 0x38b   :  { %2914 = vmatpush2.bf16.msra.mxu1 %v7373_v62  ;;  %2872 = vmatprep.subr.bf16.mxu0 %v7238_v63  ;;  %v1380_v47 = vld [vmem:[#allocation10 + $0x608] sm:$0xff]  ;;  %v7206_v50 = vcombine.high %v1252_v37, %v1256_v38  ;;  %v7205_v56 = vcombine.low %v1252_v37, %v1256_v38  ;;  %v7191_v62 = vcombine.low %v1237_v58, %v1241_v59  ;;  %v1209_v27 = vld [vmem:[#allocation10 + $0xb0] sm:$0xff] }
 0x38c   :  { %2915 = vmatprep.subr.bf16.mxu1 %v7366_v0  ;;  %v1384_v48 = vld [vmem:[#allocation10 + $0x628] sm:$0xff]  ;;  %v7319_v63 = vcombine.low %v1365_v12, %v1369_v13  ;;  %v7184_v0 = vcombine.high %v1229_v17, %v1233_v25  ;;  %v7312_v1 = vcombine.high %v1357_v26, %v1361_v61  ;;  %v1333_v28 = vld [vmem:[#allocation10 + $0x490] sm:$0xff] }
 0x38d   :  { %v7334_v51 = vcombine.high %v1380_v47, %v1384_v48  ;;  %v7333_v22 = vcombine.low %v1380_v47, %v1384_v48  ;;  %v1197_v38 = vld [vmem:[#allocation10 + $0x50] sm:$0xff] }
 0x38e   :  { %2873 = vmatpush2.bf16.msra.mxu0 %v7237_v5  ;;  %v1353_v5 = vld [vmem:[#allocation10 + $0x530] sm:$0xff] }
 0x38f   :  { %2916 = vmatpush2.bf16.msra.mxu1 %v7365_v6  ;;  %2874 = vmatprep.subr.bf16.mxu0 %v7230_v7  ;;  %v7183_v6 = vcombine.low %v1229_v17, %v1233_v25  ;;  %v7311_v7 = vcombine.low %v1357_v26, %v1361_v61  ;;  %v7304_v9 = vcombine.high %v1349_v4, %v1353_v5  ;;  %v1201_v47 = vld [vmem:[#allocation10 + $0x70] sm:$0xff] }
 0x390   :  { %2917 = vmatprep.subr.bf16.mxu1 %v7358_v8  ;;  %v7176_v8 = vcombine.high %v1221_v2, %v1225_v3  ;;  %v1325_v48 = vld [vmem:[#allocation10 + $0x450] sm:$0xff] }
 0x391   :  { %v1189_v53 = vld [vmem:[#allocation10 + $0x10] sm:$0xff] }
 0x392   :  { %2875 = vmatpush2.bf16.msra.mxu0 %v7229_v14  ;;  %v1345_v14 = vld [vmem:[#allocation10 + $0x4f0] sm:$0xff] }
 0x393   :  { %2918 = vmatpush2.bf16.msra.mxu1 %v7357_v18  ;;  %2876 = vmatprep.subr.bf16.mxu0 %v7222_v33  ;;  %v7175_v18 = vcombine.low %v1221_v2, %v1225_v3  ;;  %v7303_v33 = vcombine.low %v1349_v4, %v1353_v5  ;;  %v7296_v36 = vcombine.high %v1341_v35, %v1345_v14  ;;  %v1193_v54 = vld [vmem:[#allocation10 + $0x30] sm:$0xff] }
 0x394   :  { %2919 = vmatprep.subr.bf16.mxu1 %v7350_v20  ;;  %v7168_v20 = vcombine.high %v1213_v32, %v1217_v10  ;;  %v1317_v55 = vld [vmem:[#allocation10 + $0x410] sm:$0xff] }
 0x395   :  { %v1309_v59 = vld [vmem:[#allocation10 + $0x3d0] sm:$0xff] }
 0x396   :  { %2877 = vmatpush2.bf16.msra.mxu0 %v7221_v29  ;;  %v1337_v29 = vld [vmem:[#allocation10 + $0x4b0] sm:$0xff] }
 0x397   :  { %2920 = vmatpush2.bf16.msra.mxu1 %v7349_v30  ;;  %2878 = vmatprep.subr.bf16.mxu0 %v7214_v31  ;;  %v7167_v30 = vcombine.low %v1213_v32, %v1217_v10  ;;  %v7295_v31 = vcombine.low %v1341_v35, %v1345_v14  ;;  %v7288_v37 = vcombine.high %v1333_v28, %v1337_v29  ;;  %v1437_v12 = vld [vmem:[#allocation10 + $0x7d0] sm:$0xff] }
 0x398   :  { %2921 = vmatprep.subr.bf16.mxu1 %v7342_v34  ;;  %v7160_v34 = vcombine.high %v1205_v21, %v1209_v27  ;;  %v1441_v13 = vld [vmem:[#allocation10 + $0x7f0] sm:$0xff] }
 0x399   :  { %v7392_v25 = vcombine.high %v1437_v12, %v1441_v13  ;;  %v1305_v26 = vld [vmem:[#allocation10 + $0x3b0] sm:$0xff] }
 0x39a   :  { %2879 = vmatpush2.bf16.msra.mxu0 %v7213_v43  ;;  %v1329_v43 = vld [vmem:[#allocation10 + $0x470] sm:$0xff] }
 0x39b   :  { %2922 = vmatpush2.bf16.msra.mxu1 %v7341_v46  ;;  %2880 = vmatprep.subr.bf16.mxu0 %v7206_v50  ;;  %v7159_v46 = vcombine.low %v1205_v21, %v1209_v27  ;;  %v7287_v50 = vcombine.low %v1333_v28, %v1337_v29  ;;  %v7280_v52 = vcombine.high %v1325_v48, %v1329_v43  ;;  %v1429_v61 = vld [vmem:[#allocation10 + $0x790] sm:$0xff] }
 0x39c   :  { %2923 = vmatprep.subr.bf16.mxu1 %v7334_v51  ;;  %v7152_v51 = vcombine.high %v1197_v38, %v1201_v47  ;;  %v1293_v3 = vld [vmem:[#allocation10 + $0x350] sm:$0xff] }
 0x39d   :  { %v1297_v4 = vld [vmem:[#allocation10 + $0x370] sm:$0xff] }
 0x39e   :  { %2881 = vmatpush2.bf16.msra.mxu0 %v7205_v56  ;;  %v1321_v56 = vld [vmem:[#allocation10 + $0x430] sm:$0xff] }
 0x39f   :  { %2924 = vmatpush2.bf16.msra.mxu1 %v7333_v22  ;;  %2936 = vmatprep.subr.bf16.mxu0 %v7200_v24  ;;  %v7151_v22 = vcombine.low %v1197_v38, %v1201_v47  ;;  %v7279_v24 = vcombine.low %v1325_v48, %v1329_v43  ;;  %v7272_v58 = vcombine.high %v1317_v55, %v1321_v56  ;;  %v1421_v5 = vld [vmem:[#allocation10 + $0x750] sm:$0xff] }
 0x3a0   :  { %2979 = vmatprep.subr.bf16.mxu1 %v7328_v57  ;;  %v7144_v57 = vcombine.high %v1189_v53, %v1193_v54  ;;  %v1285_v10 = vld [vmem:[#allocation10 + $0x310] sm:$0xff] }
 0x3a1   :  { %2883 = vmatmul.mubr.bf16.vlgmr.msra.gmra.mxu0 %v9175_v42  ;;  %v1289_v35 = vld [vmem:[#allocation10 + $0x330] sm:$0xff] }
 0x3a2   :  { %2926 = vmatmul.mubr.bf16.vlgmr.msra.gmra.mxu1 %v9178_v45  ;;  %2937 = vmatpush1.bf16.msra.mxu0 %v7199_v11  ;;  %v1313_v11 = vld [vmem:[#allocation10 + $0x3f0] sm:$0xff] }
 0x3a3   :  { %2968 = vmatprep.mubr.bf16.mxu0 %v9171_v39  ;;  %2980 = vmatpush1.bf16.msra.mxu1 %v7327_v15  ;;  %v7143_v15 = vcombine.low %v1189_v53, %v1193_v54  ;;  %v7264_v17 = vcombine.high %v1309_v59, %v1313_v11  ;;  %v1413_v14 = vld [vmem:[#allocation10 + $0x710] sm:$0xff] }
 0x3a4   :  { %3011 = vmatprep.mubr.bf16.mxu1 %v9173_v49  ;;  %2938 = vmatprep.subr.bf16.mxu0 %v7192_v16  ;;  %v7271_v16 = vcombine.low %v1317_v55, %v1321_v56  ;;  %v1277_v27 = vld [vmem:[#allocation10 + $0x2d0] sm:$0xff] }
 0x3a5   :  { %2981 = vmatprep.subr.bf16.mxu1 %v7320_v60  ;;  %v1301_v60 = vld [vmem:[#allocation10 + $0x390] sm:$0xff] }
 0x3a6   :  { %2939 = vmatpush1.bf16.msra.mxu0 %v7191_v62  ;;  %v1433_v62 = vld [vmem:[#allocation10 + $0x7b0] sm:$0xff] }
 0x3a7   :  { %2982 = vmatpush1.bf16.msra.mxu1 %v7319_v63  ;;  %2940 = vmatprep.subr.bf16.mxu0 %v7184_v0  ;;  %v7263_v63 = vcombine.low %v1309_v59, %v1313_v11  ;;  %v7391_v0 = vcombine.low %v1437_v12, %v1441_v13  ;;  %v7384_v2 = vcombine.high %v1429_v61, %v1433_v62  ;;  %v1281_v28 = vld [vmem:[#allocation10 + $0x2f0] sm:$0xff] }
 0x3a8   :  { %2983 = vmatprep.subr.bf16.mxu1 %v7312_v1  ;;  %v7256_v1 = vcombine.high %v1301_v60, %v1305_v26  ;;  %v1405_v29 = vld [vmem:[#allocation10 + $0x6d0] sm:$0xff] }
 0x3a9   :  { %v1269_v47 = vld [vmem:[#allocation10 + $0x290] sm:$0xff] }
 0x3aa   :  { %2941 = vmatpush1.bf16.msra.mxu0 %v7183_v6  ;;  %v1425_v6 = vld [vmem:[#allocation10 + $0x770] sm:$0xff] }
 0x3ab   :  { %2984 = vmatpush1.bf16.msra.mxu1 %v7311_v7  ;;  %2942 = vmatprep.subr.bf16.mxu0 %v7176_v8  ;;  %v7255_v7 = vcombine.low %v1301_v60, %v1305_v26  ;;  %v7383_v8 = vcombine.low %v1429_v61, %v1433_v62  ;;  %v7376_v32 = vcombine.high %v1421_v5, %v1425_v6  ;;  %v1273_v48 = vld [vmem:[#allocation10 + $0x2b0] sm:$0xff]  ;;  %v1246_v26 = vld [vmem:[#allocation10 + $0x1d8] sm:$0xff] }
 0x3ac   :  { %2985 = vmatprep.subr.bf16.mxu1 %v7304_v9  ;;  %v7248_v9 = vcombine.high %v1293_v3, %v1297_v4  ;;  %v1397_v43 = vld [vmem:[#allocation10 + $0x690] sm:$0xff]  ;;  %v1250_v61 = vld [vmem:[#allocation10 + $0x1f8] sm:$0xff] }
 0x3ad   :  { %v1261_v54 = vld [vmem:[#allocation10 + $0x250] sm:$0xff]  ;;  %v1374_v62 = vld [vmem:[#allocation10 + $0x5d8] sm:$0xff] }
 0x3ae   :  { %2943 = vmatpush1.bf16.msra.mxu0 %v7175_v18  ;;  %v1417_v18 = vld [vmem:[#allocation10 + $0x730] sm:$0xff] }
 0x3af   :  { %2986 = vmatpush1.bf16.msra.mxu1 %v7303_v33  ;;  %2944 = vmatprep.subr.bf16.mxu0 %v7168_v20  ;;  %v7247_v33 = vcombine.low %v1293_v3, %v1297_v4  ;;  %v7375_v20 = vcombine.low %v1421_v5, %v1425_v6  ;;  %v7368_v21 = vcombine.high %v1413_v14, %v1417_v18  ;;  %v1265_v55 = vld [vmem:[#allocation10 + $0x270] sm:$0xff]  ;;  %v1238_v4 = vld [vmem:[#allocation10 + $0x198] sm:$0xff] }
 0x3b0   :  { %2987 = vmatprep.subr.bf16.mxu1 %v7296_v36  ;;  %v7240_v36 = vcombine.high %v1285_v10, %v1289_v35  ;;  %v1389_v56 = vld [vmem:[#allocation10 + $0x650] sm:$0xff]  ;;  %v1242_v5 = vld [vmem:[#allocation10 + $0x1b8] sm:$0xff]  ;;  %v7201_v6 = vcombine.low %v1246_v26, %v1250_v61 }
 0x3b1   :  { %v1253_v11 = vld [vmem:[#allocation10 + $0x210] sm:$0xff] }
 0x3b2   :  { %2945 = vmatpush1.bf16.msra.mxu0 %v7167_v30  ;;  %v1409_v30 = vld [vmem:[#allocation10 + $0x6f0] sm:$0xff] }
 0x3b3   :  { %2988 = vmatpush1.bf16.msra.mxu1 %v7295_v31  ;;  %2946 = vmatprep.subr.bf16.mxu0 %v7160_v34  ;;  %v7239_v31 = vcombine.low %v1285_v10, %v1289_v35  ;;  %v7367_v34 = vcombine.low %v1413_v14, %v1417_v18  ;;  %v7360_v38 = vcombine.high %v1405_v29, %v1409_v30  ;;  %v1257_v12 = vld [vmem:[#allocation10 + $0x230] sm:$0xff]  ;;  %v1230_v10 = vld [vmem:[#allocation10 + $0x158] sm:$0xff] }
 0x3b4   :  { %2989 = vmatprep.subr.bf16.mxu1 %v7288_v37  ;;  %v7232_v37 = vcombine.high %v1277_v27, %v1281_v28  ;;  %v1381_v13 = vld [vmem:[#allocation10 + $0x610] sm:$0xff]  ;;  %v1234_v35 = vld [vmem:[#allocation10 + $0x178] sm:$0xff] }
 0x3b5   :  { %v1358_v18 = vld [vmem:[#allocation10 + $0x558] sm:$0xff] }
 0x3b6   :  { %2947 = vmatpush1.bf16.msra.mxu0 %v7159_v46  ;;  %v1401_v46 = vld [vmem:[#allocation10 + $0x6b0] sm:$0xff] }
 0x3b7   :  { %2990 = vmatpush1.bf16.msra.mxu1 %v7287_v50  ;;  %2948 = vmatprep.subr.bf16.mxu0 %v7152_v51  ;;  %v7231_v50 = vcombine.low %v1277_v27, %v1281_v28  ;;  %v7359_v51 = vcombine.low %v1405_v29, %v1409_v30  ;;  %v7352_v53 = vcombine.high %v1397_v43, %v1401_v46  ;;  %v1222_v28 = vld [vmem:[#allocation10 + $0x118] sm:$0xff] }
 0x3b8   :  { %2991 = vmatprep.subr.bf16.mxu1 %v7280_v52  ;;  %v7224_v52 = vcombine.high %v1269_v47, %v1273_v48  ;;  %v1226_v29 = vld [vmem:[#allocation10 + $0x138] sm:$0xff] }
 0x3b9   :  { %v1350_v30 = vld [vmem:[#allocation10 + $0x518] sm:$0xff] }
 0x3ba   :  { %2949 = vmatpush1.bf16.msra.mxu0 %v7151_v22  ;;  %v1393_v22 = vld [vmem:[#allocation10 + $0x670] sm:$0xff] }
 0x3bb   :  { %2992 = vmatpush1.bf16.msra.mxu1 %v7279_v24  ;;  %2950 = vmatprep.subr.bf16.mxu0 %v7144_v57  ;;  %v7223_v24 = vcombine.low %v1269_v47, %v1273_v48  ;;  %v7351_v57 = vcombine.low %v1397_v43, %v1401_v46  ;;  %v7344_v59 = vcombine.high %v1389_v56, %v1393_v22  ;;  %v1214_v47 = vld [vmem:[#allocation10 + $0xd8] sm:$0xff] }
 0x3bc   :  { %2993 = vmatprep.subr.bf16.mxu1 %v7272_v58  ;;  %v7216_v58 = vcombine.high %v1261_v54, %v1265_v55  ;;  %v1218_v48 = vld [vmem:[#allocation10 + $0xf8] sm:$0xff] }
 0x3bd   :  { %v1342_v43 = vld [vmem:[#allocation10 + $0x4d8] sm:$0xff] }
 0x3be   :  { %2951 = vmatpush1.bf16.msra.mxu0 %v7143_v15  ;;  %v1385_v15 = vld [vmem:[#allocation10 + $0x630] sm:$0xff]  ;;  %v1346_v46 = vld [vmem:[#allocation10 + $0x4f8] sm:$0xff] }
 0x3bf   :  { %2994 = vmatpush1.bf16.msra.mxu1 %v7271_v16  ;;  %2952 = vmatprep.subr.bf16.mxu0 %v7264_v17  ;;  %v7215_v16 = vcombine.low %v1261_v54, %v1265_v55  ;;  %v7343_v17 = vcombine.low %v1389_v56, %v1393_v22  ;;  %v7336_v60 = vcombine.high %v1381_v13, %v1385_v15  ;;  %v1210_v54 = vld [vmem:[#allocation10 + $0xb8] sm:$0xff] }
 0x3c0   :  { %2995 = vmatprep.subr.bf16.mxu1 %v7392_v25  ;;  %v7208_v25 = vcombine.high %v1253_v11, %v1257_v12  ;;  %v1334_v55 = vld [vmem:[#allocation10 + $0x498] sm:$0xff]  ;;  %v7169_v22 = vcombine.low %v1214_v47, %v1218_v48 }
 0x3c1   :  { %v1338_v56 = vld [vmem:[#allocation10 + $0x4b8] sm:$0xff] }
 0x3c2   :  { %2953 = vmatpush2.bf16.msra.mxu0 %v7263_v63  ;;  %v1378_v63 = vld [vmem:[#allocation10 + $0x5f8] sm:$0xff] }
 0x3c3   :  { %2996 = vmatpush2.bf16.msra.mxu1 %v7391_v0  ;;  %2954 = vmatprep.subr.bf16.mxu0 %v7256_v1  ;;  %v7207_v0 = vcombine.low %v1253_v11, %v1257_v12  ;;  %v7335_v1 = vcombine.low %v1381_v13, %v1385_v15  ;;  %v7330_v3 = vcombine.high %v1374_v62, %v1378_v63  ;;  %v1202_v11 = vld [vmem:[#allocation10 + $0x78] sm:$0xff] }
 0x3c4   :  { %2997 = vmatprep.subr.bf16.mxu1 %v7384_v2  ;;  %v7202_v2 = vcombine.high %v1246_v26, %v1250_v61  ;;  %v1326_v12 = vld [vmem:[#allocation10 + $0x458] sm:$0xff] }
 0x3c5   :  { %v1330_v13 = vld [vmem:[#allocation10 + $0x478] sm:$0xff] }
 0x3c6   :  { %2955 = vmatpush2.bf16.msra.mxu0 %v7255_v7  ;;  %v1366_v7 = vld [vmem:[#allocation10 + $0x598] sm:$0xff] }
 0x3c7   :  { %2998 = vmatpush2.bf16.msra.mxu1 %v7383_v8  ;;  %2956 = vmatprep.subr.bf16.mxu0 %v7248_v9  ;;  %v1370_v8 = vld [vmem:[#allocation10 + $0x5b8] sm:$0xff]  ;;  %v7329_v9 = vcombine.low %v1374_v62, %v1378_v63 }
 0x3c8   :  { %2999 = vmatprep.subr.bf16.mxu1 %v7376_v32  ;;  %v7194_v32 = vcombine.high %v1238_v4, %v1242_v5  ;;  %v7322_v14 = vcombine.high %v1366_v7, %v1370_v8  ;;  %v1194_v26 = vld [vmem:[#allocation10 + $0x38] sm:$0xff] }
 0x3c9   :  { %v1318_v61 = vld [vmem:[#allocation10 + $0x418] sm:$0xff] }
 0x3ca   :  { %2957 = vmatpush2.bf16.msra.mxu0 %v7247_v33  ;;  %v1362_v33 = vld [vmem:[#allocation10 + $0x578] sm:$0xff] }
 0x3cb   :  { %3000 = vmatpush2.bf16.msra.mxu1 %v7375_v20  ;;  %2958 = vmatprep.subr.bf16.mxu0 %v7240_v36  ;;  %v7193_v20 = vcombine.low %v1238_v4, %v1242_v5  ;;  %v7321_v36 = vcombine.low %v1366_v7, %v1370_v8  ;;  %v7314_v27 = vcombine.high %v1358_v18, %v1362_v33  ;;  %v1322_v62 = vld [vmem:[#allocation10 + $0x438] sm:$0xff] }
 0x3cc   :  { %3001 = vmatprep.subr.bf16.mxu1 %v7368_v21  ;;  %v7186_v21 = vcombine.high %v1230_v10, %v1234_v35  ;;  %v1314_v4 = vld [vmem:[#allocation10 + $0x3f8] sm:$0xff]  ;;  %v7273_v8 = vcombine.low %v1318_v61, %v1322_v62 }
 0x3cd   :  { %v1438_v5 = vld [vmem:[#allocation10 + $0x7d8] sm:$0xff] }
 0x3ce   :  { %2959 = vmatpush2.bf16.msra.mxu0 %v7239_v31  ;;  %v1354_v31 = vld [vmem:[#allocation10 + $0x538] sm:$0xff] }
 0x3cf   :  { %3002 = vmatpush2.bf16.msra.mxu1 %v7367_v34  ;;  %2960 = vmatprep.subr.bf16.mxu0 %v7232_v37  ;;  %v7185_v34 = vcombine.low %v1230_v10, %v1234_v35  ;;  %v7313_v37 = vcombine.low %v1358_v18, %v1362_v33  ;;  %v1302_v10 = vld [vmem:[#allocation10 + $0x398] sm:$0xff] }
 0x3d0   :  { %3003 = vmatprep.subr.bf16.mxu1 %v7360_v38  ;;  %v7178_v38 = vcombine.high %v1222_v28, %v1226_v29  ;;  %v1306_v35 = vld [vmem:[#allocation10 + $0x3b8] sm:$0xff] }
 0x3d1   :  { %v1434_v18 = vld [vmem:[#allocation10 + $0x7b8] sm:$0xff] }
 0x3d2   :  { %2961 = vmatpush2.bf16.msra.mxu0 %v7231_v50  ;;  %v7305_v50 = vcombine.low %v1350_v30, %v1354_v31 }
 0x3d3   :  { %3004 = vmatpush2.bf16.msra.mxu1 %v7359_v51  ;;  %2962 = vmatprep.subr.bf16.mxu0 %v7224_v52  ;;  %v7170_v51 = vcombine.high %v1214_v47, %v1218_v48  ;;  %v7298_v52 = vcombine.high %v1342_v43, %v1346_v46  ;;  %v1290_v47 = vld [vmem:[#allocation10 + $0x338] sm:$0xff] }
 0x3d4   :  { %3005 = vmatprep.subr.bf16.mxu1 %v7352_v53  ;;  %v1206_v53 = vld [vmem:[#allocation10 + $0x98] sm:$0xff] }
 0x3d5   :  { %v7161_v15 = vcombine.low %v1206_v53, %v1210_v54  ;;  %v1414_v48 = vld [vmem:[#allocation10 + $0x718] sm:$0xff] }
 0x3d6   :  { %2963 = vmatpush2.bf16.msra.mxu0 %v7223_v24  ;;  %v7297_v24 = vcombine.low %v1342_v43, %v1346_v46  ;;  %v1418_v43 = vld [vmem:[#allocation10 + $0x738] sm:$0xff] }
 0x3d7   :  { %3006 = vmatpush2.bf16.msra.mxu1 %v7351_v57  ;;  %2964 = vmatprep.subr.bf16.mxu0 %v7216_v58  ;;  %v7162_v57 = vcombine.high %v1206_v53, %v1210_v54  ;;  %v7290_v58 = vcombine.high %v1334_v55, %v1338_v56  ;;  %v1282_v53 = vld [vmem:[#allocation10 + $0x2f8] sm:$0xff] }
 0x3d8   :  { %3007 = vmatprep.subr.bf16.mxu1 %v7344_v59  ;;  %v1198_v59 = vld [vmem:[#allocation10 + $0x58] sm:$0xff] }
 0x3d9   :  { %v7153_v63 = vcombine.low %v1198_v59, %v1202_v11  ;;  %v1406_v54 = vld [vmem:[#allocation10 + $0x6d8] sm:$0xff] }
 0x3da   :  { %2965 = vmatpush2.bf16.msra.mxu0 %v7215_v16  ;;  %v7289_v16 = vcombine.low %v1334_v55, %v1338_v56  ;;  %v1410_v55 = vld [vmem:[#allocation10 + $0x6f8] sm:$0xff] }
 0x3db   :  { %3008 = vmatpush2.bf16.msra.mxu1 %v7343_v17  ;;  %2966 = vmatprep.subr.bf16.mxu0 %v7208_v25  ;;  %v7154_v17 = vcombine.high %v1198_v59, %v1202_v11  ;;  %v7282_v25 = vcombine.high %v1326_v12, %v1330_v13  ;;  %v1274_v59 = vld [vmem:[#allocation10 + $0x2b8] sm:$0xff] }
 0x3dc   :  { %3009 = vmatprep.subr.bf16.mxu1 %v7336_v60  ;;  %v1190_v60 = vld [vmem:[#allocation10 + $0x18] sm:$0xff] }
 0x3dd   :  { %v7145_v7 = vcombine.low %v1190_v60, %v1194_v26  ;;  %v1398_v11 = vld [vmem:[#allocation10 + $0x698] sm:$0xff] }
 0x3de   :  { %2967 = vmatpush2.bf16.msra.mxu0 %v7207_v0  ;;  %v7281_v0 = vcombine.low %v1326_v12, %v1330_v13  ;;  %v1402_v12 = vld [vmem:[#allocation10 + $0x6b8] sm:$0xff] }
 0x3df   :  { %3010 = vmatpush2.bf16.msra.mxu1 %v7335_v1  ;;  %3022 = vmatprep.subr.bf16.mxu0 %v7202_v2  ;;  %v7146_v1 = vcombine.high %v1190_v60, %v1194_v26  ;;  %v7274_v2 = vcombine.high %v1318_v61, %v1322_v62  ;;  %v1266_v60 = vld [vmem:[#allocation10 + $0x278] sm:$0xff] }
 0x3e0   :  { %3065 = vmatprep.subr.bf16.mxu1 %v7330_v3  ;;  %v1310_v3 = vld [vmem:[#allocation10 + $0x3d8] sm:$0xff] }
 0x3e1   :  { %2969 = vmatmul.mubr.bf16.vlgmr.msra.gmra.mxu0 %v9175_v42  ;;  %v7265_v33 = vcombine.low %v1310_v3, %v1314_v4  ;;  %v1390_v26 = vld [vmem:[#allocation10 + $0x658] sm:$0xff] }
 0x3e2   :  { %3012 = vmatmul.mubr.bf16.vlgmr.msra.gmra.mxu1 %v9178_v45  ;;  %3023 = vmatpush1.bf16.msra.mxu0 %v7201_v6  ;;  %v1442_v6 = vld [vmem:[#allocation10 + $0x7f8] sm:$0xff] }
 0x3e3   :  { %3054 = vmatprep.mubr.bf16.mxu0 %v9171_v39  ;;  %3066 = vmatpush1.bf16.msra.mxu1 %v7329_v9  ;;  %v7306_v39 = vcombine.high %v1350_v30, %v1354_v31  ;;  %v7266_v9 = vcombine.high %v1310_v3, %v1314_v4  ;;  %v1426_v30 = vld [vmem:[#allocation10 + $0x778] sm:$0xff]  ;;  %v7257_v31 = vcombine.low %v1302_v10, %v1306_v35 }
 0x3e4   :  { %3097 = vmatprep.mubr.bf16.mxu1 %v9173_v49  ;;  %3024 = vmatprep.subr.bf16.mxu0 %v7194_v32  ;;  %v7177_v49 = vcombine.low %v1222_v28, %v1226_v29  ;;  %v7394_v32 = vcombine.high %v1438_v5, %v1442_v6  ;;  %v1298_v28 = vld [vmem:[#allocation10 + $0x378] sm:$0xff] }
 0x3e5   :  { %3067 = vmatprep.subr.bf16.mxu1 %v7322_v14  ;;  %v1430_v14 = vld [vmem:[#allocation10 + $0x798] sm:$0xff] }
 0x3e6   :  { %3025 = vmatpush1.bf16.msra.mxu0 %v7193_v20  ;;  %v7393_v20 = vcombine.low %v1438_v5, %v1442_v6  ;;  %v1422_v29 = vld [vmem:[#allocation10 + $0x758] sm:$0xff] }
 0x3e7   :  { %3068 = vmatpush1.bf16.msra.mxu1 %v7321_v36  ;;  %3026 = vmatprep.subr.bf16.mxu0 %v7186_v21  ;;  %v7258_v36 = vcombine.high %v1302_v10, %v1306_v35  ;;  %v7386_v21 = vcombine.high %v1430_v14, %v1434_v18  ;;  %v1394_v61 = vld [vmem:[#allocation10 + $0x678] sm:$0xff] }
 0x3e8   :  { %3069 = vmatprep.subr.bf16.mxu1 %v7314_v27  ;;  %v1294_v27 = vld [vmem:[#allocation10 + $0x358] sm:$0xff] }
 0x3e9   :  { %v7249_v46 = vcombine.low %v1294_v27, %v1298_v28  ;;  %v1258_v3 = vld [vmem:[#allocation10 + $0x238] sm:$0xff] }
 0x3ea   :  { %3027 = vmatpush1.bf16.msra.mxu0 %v7185_v34  ;;  %v7385_v34 = vcombine.low %v1430_v14, %v1434_v18  ;;  %v1382_v4 = vld [vmem:[#allocation10 + $0x618] sm:$0xff]  ;;  %v8115_v18 = vld [vmem:[#allocation11 + $0x18c] ss:$28 sps:$4 sm:$0xff]  }
 0x3eb   :  { %3070 = vmatpush1.bf16.msra.mxu1 %v7313_v37  ;;  %3028 = vmatprep.subr.bf16.mxu0 %v7178_v38  ;;  %v7250_v37 = vcombine.high %v1294_v27, %v1298_v28  ;;  %v7378_v38 = vcombine.high %v1422_v29, %v1426_v30  ;;  %v1386_v5 = vld [vmem:[#allocation10 + $0x638] sm:$0xff]  ;;  %v8161_v27 = vld [vmem:[#allocation11 + $0x508] ss:$28 sps:$4 sm:$0xff]   ;;  %v8166_v28 = vld [vmem:[#allocation11 + $0x4d4] ss:$28 sps:$4 sm:$0xff]  }
 0x3ec   :  { %3071 = vmatprep.subr.bf16.mxu1 %v7306_v39  ;;  %v1286_v39 = vld [vmem:[#allocation10 + $0x318] sm:$0xff]  ;;  %v7337_v14 = vcombine.low %v1382_v4, %v1386_v5 }
 0x3ed   :  { %v7241_v56 = vcombine.low %v1286_v39, %v1290_v47  ;;  %v137_v10 = vld [vmem:[#allocation13 + $0x7] ss:$8 sm:$0xf] }
 0x3ee   :  { %3029 = vmatpush1.bf16.msra.mxu0 %v7177_v49  ;;  %v7377_v49 = vcombine.low %v1422_v29, %v1426_v30  ;;  %v138_v35 = vld [vmem:[#allocation13 + $0x7] ss:$8 sm:$0xf0] }
 0x3ef   :  { %3072 = vmatpush1.bf16.msra.mxu1 %v7305_v50  ;;  %3030 = vmatprep.subr.bf16.mxu0 %v7170_v51  ;;  %v7242_v50 = vcombine.high %v1286_v39, %v1290_v47  ;;  %v7370_v51 = vcombine.high %v1414_v48, %v1418_v43  ;;  %v8121_v39 = vld [vmem:[#allocation11 + $0x11c] ss:$28 sps:$4 sm:$0xff]   ;;  %v8164_v47 = vld [vmem:[#allocation11 + $0x4d0] ss:$28 sps:$4 sm:$0xff]  }
 0x3f0   :  { %3073 = vmatprep.subr.bf16.mxu1 %v7298_v52  ;;  %v1278_v52 = vld [vmem:[#allocation10 + $0x2d8] sm:$0xff] }
 0x3f1   :  { %v7233_v13 = vcombine.low %v1278_v52, %v1282_v53 }
 0x3f2   :  { %3031 = vmatpush1.bf16.msra.mxu0 %v7169_v22  ;;  %v7369_v22 = vcombine.low %v1414_v48, %v1418_v43 }
 0x3f3   :  { %3074 = vmatpush1.bf16.msra.mxu1 %v7297_v24  ;;  %3032 = vmatprep.subr.bf16.mxu0 %v7162_v57  ;;  %v7234_v24 = vcombine.high %v1278_v52, %v1282_v53  ;;  %v7362_v57 = vcombine.high %v1406_v54, %v1410_v55  ;;  %v8124_v53 = vld [vmem:[#allocation11 + $0xe4] ss:$28 sps:$4 sm:$0xff]  }
 0x3f4   :  { %3075 = vmatprep.subr.bf16.mxu1 %v7290_v58  ;;  %v1270_v58 = vld [vmem:[#allocation10 + $0x298] sm:$0xff] }
 0x3f5   :  { %v7225_v62 = vcombine.low %v1270_v58, %v1274_v59 }
 0x3f6   :  { %3033 = vmatpush1.bf16.msra.mxu0 %v7161_v15  ;;  %v7361_v15 = vcombine.low %v1406_v54, %v1410_v55  ;;  %v8167_v54 = vld [vmem:[#allocation11 + $0x498] ss:$28 sps:$4 sm:$0xff]  }
 0x3f7   :  { %3076 = vmatpush1.bf16.msra.mxu1 %v7289_v16  ;;  %3034 = vmatprep.subr.bf16.mxu0 %v7154_v17  ;;  %v7226_v16 = vcombine.high %v1270_v58, %v1274_v59  ;;  %v7354_v17 = vcombine.high %v1398_v11, %v1402_v12 }
 0x3f8   :  { %3077 = vmatprep.subr.bf16.mxu1 %v7282_v25  ;;  %v1262_v25 = vld [vmem:[#allocation10 + $0x258] sm:$0xff] }
 0x3f9   :  { %v7217_v6 = vcombine.low %v1262_v25, %v1266_v60 }
 0x3fa   :  { %3035 = vmatpush1.bf16.msra.mxu0 %v7153_v63  ;;  %v7353_v63 = vcombine.low %v1398_v11, %v1402_v12  ;;  %v8122_v11 = vld [vmem:[#allocation11 + $0xe0] ss:$28 sps:$4 sm:$0xff]  }
 0x3fb   :  { %3078 = vmatpush1.bf16.msra.mxu1 %v7281_v0  ;;  %3036 = vmatprep.subr.bf16.mxu0 %v7146_v1  ;;  %v7218_v0 = vcombine.high %v1262_v25, %v1266_v60  ;;  %v7346_v1 = vcombine.high %v1390_v26, %v1394_v61  ;;  %v8175_v25 = vld [vmem:[#allocation11 + $0x42c] ss:$28 sps:$4 sm:$0xff]  }
 0x3fc   :  { %3079 = vmatprep.subr.bf16.mxu1 %v7274_v2  ;;  %v1254_v2 = vld [vmem:[#allocation10 + $0x218] sm:$0xff] }
 0x3fe   :  { %3037 = vmatpush1.bf16.msra.mxu0 %v7145_v7  ;;  %v7345_v7 = vcombine.low %v1390_v26, %v1394_v61  ;;  %v8125_v61 = vld [vmem:[#allocation11 + $0xa8] ss:$28 sps:$4 sm:$0xff]  }
 0x3ff   :  { %3080 = vmatpush1.bf16.msra.mxu1 %v7273_v8  ;;  %3038 = vmatprep.subr.bf16.mxu0 %v7266_v9  ;;  %v7210_v8 = vcombine.high %v1254_v2, %v1258_v3  ;;  %v7338_v9 = vcombine.high %v1382_v4, %v1386_v5  ;;  %v8128_v5 = vld [vmem:[#allocation11 + $0x70] ss:$28 sps:$4 sm:$0xff]  }
 0x400   :  { %3081 = vmatprep.subr.bf16.mxu1 %v7394_v32  ;;  %v7209_v32 = vcombine.low %v1254_v2, %v1258_v3  ;;  %v8178_v2 = vld [vmem:[#allocation11 + $0x3f4] ss:$28 sps:$4 sm:$0xff]  }
 0x402   :  { %3039 = vmatpush2.bf16.msra.mxu0 %v7265_v33  ;;  %v8163_v33 = vld [vmem:[#allocation11 + $0x50c] ss:$28 sps:$4 sm:$0xff]  }
 0x403   :  { %3082 = vmatpush2.bf16.msra.mxu1 %v7393_v20  ;;  %3040 = vmatprep.subr.bf16.mxu0 %v7258_v36  ;;  %v9199_v20 = vor.u32 %v138_v35, %v137_v10  ;;  %v8113_v36 = vld [vmem:[#allocation11 + $0x188] ss:$28 sps:$4 sm:$0xff]  }
 0x404   :  { %3083 = vmatprep.subr.bf16.mxu1 %v7386_v21  ;;  %v8118_v21 = vld [vmem:[#allocation11 + $0x154] ss:$28 sps:$4 sm:$0xff]  }
 0x405   :  { %v1447_v29 = vrot.slane %v9199_v20, %v9074_v41 }
 0x406   :  { %3041 = vmatpush2.bf16.msra.mxu0 %v7257_v31 }
 0x407   :  { %3084 = vmatpush2.bf16.msra.mxu1 %v7385_v34  ;;  %3042 = vmatprep.subr.bf16.mxu0 %v7250_v37  ;;  %v8116_v34 = vld [vmem:[#allocation11 + $0x150] ss:$28 sps:$4 sm:$0xff]   ;;  %v1451_v37 = vrot.slane %v9199_v20, %v9077_v44 }
 0x408   :  { %3085 = vmatprep.subr.bf16.mxu1 %v7378_v38 }
 0x40a   :  { %3043 = vmatpush2.bf16.msra.mxu0 %v7249_v46 }
 0x40b   :  { %3086 = vmatpush2.bf16.msra.mxu1 %v7377_v49  ;;  %3044 = vmatprep.subr.bf16.mxu0 %v7242_v50 }
 0x40c   :  { %3087 = vmatprep.subr.bf16.mxu1 %v7370_v51 }
 0x40e   :  { %3045 = vmatpush2.bf16.msra.mxu0 %v7241_v56 }
 0x40f   :  { %3088 = vmatpush2.bf16.msra.mxu1 %v7369_v22  ;;  %3046 = vmatprep.subr.bf16.mxu0 %v7234_v24  ;;  %v8172_v22 = vld [vmem:[#allocation11 + $0x464] ss:$28 sps:$4 sm:$0xff]  }
 0x410   :  { %3089 = vmatprep.subr.bf16.mxu1 %v7362_v57 }
 0x412   :  { %3047 = vmatpush2.bf16.msra.mxu0 %v7233_v13 }
 0x413   :  { %3090 = vmatpush2.bf16.msra.mxu1 %v7361_v15  ;;  %3048 = vmatprep.subr.bf16.mxu0 %v7226_v16  ;;  %v8127_v15 = vld [vmem:[#allocation11 + $0xac] ss:$28 sps:$4 sm:$0xff]   ;;  %v8170_v16 = vld [vmem:[#allocation11 + $0x460] ss:$28 sps:$4 sm:$0xff]  }
 0x414   :  { %3091 = vmatprep.subr.bf16.mxu1 %v7354_v17 }
 0x416   :  { %3049 = vmatpush2.bf16.msra.mxu0 %v7225_v62 }
 0x417   :  { %3092 = vmatpush2.bf16.msra.mxu1 %v7353_v63  ;;  %3050 = vmatprep.subr.bf16.mxu0 %v7218_v0  ;;  %v8130_v0 = vld [vmem:[#allocation11 + $0x74] ss:$28 sps:$4 sm:$0xff]  }
 0x418   :  { %3093 = vmatprep.subr.bf16.mxu1 %v7346_v1  ;;  %v8173_v1 = vld [vmem:[#allocation11 + $0x428] ss:$28 sps:$4 sm:$0xff]  }
 0x41a   :  { %3051 = vmatpush2.bf16.msra.mxu0 %v7217_v6 }
 0x41b   :  { %3094 = vmatpush2.bf16.msra.mxu1 %v7345_v7  ;;  %3052 = vmatprep.subr.bf16.mxu0 %v7210_v8  ;;  %v8133_v8 = vld [vmem:[#allocation11 + $0x3c] ss:$28 sps:$4 sm:$0xff]  }
 0x41c   :  { %3095 = vmatprep.subr.bf16.mxu1 %v7338_v9  ;;  %v8176_v9 = vld [vmem:[#allocation11 + $0x3f0] ss:$28 sps:$4 sm:$0xff]  }
 0x41e   :  { %3053 = vmatpush2.bf16.msra.mxu0 %v7209_v32  ;;  %v8181_v32 = vld [vmem:[#allocation11 + $0x3bc] ss:$28 sps:$4 sm:$0xff]  }
 0x41f   :  { %3096 = vmatpush2.bf16.msra.mxu1 %v7337_v14  ;;  %6322 = vmatprep.subr.bf16.mxu0 %v8115_v18  ;;  %v8131_v14 = vld [vmem:[#allocation11 + $0x38] ss:$28 sps:$4 sm:$0xff]  }
 0x420   :  { %6365 = vmatprep.subr.bf16.mxu1 %v8163_v33 }
 0x421   :  { %3055 = vmatmul.mubr.bf16.vlgmr.msra.gmra.mxu0 %v9175_v42  ;;  %v2798_v30 = vpop.f32.mrf.mxu0  ;;  %v8169_v42 = vld [vmem:[#allocation11 + $0x49c] ss:$28 sps:$4 sm:$0xff]  }
 0x422   :  { %3098 = vmatmul.mubr.bf16.vlgmr.msra.gmra.mxu1 %v9178_v45  ;;  %v2841_v31 = vpop.f32.mrf.mxu1  ;;  %6323 = vmatpush1.bf16.msra.mxu0 %v8113_v36  ;;  %v2799_v43 = vadd.f32 %v2798_v30, %v1447_v29  ;;  %v8119_v45 = vld [vmem:[#allocation11 + $0x118] ss:$28 sps:$4 sm:$0xff]   ;;  %v8136_v36 = vld [vmem:[#allocation11 + $0x4] ss:$28 sps:$4 sm:$0xff]  }
 0x423   :  { %v2800_v38 = vpop.f32.mrf.mxu0  ;;  %6324 = vmatprep.subr.bf16.mxu0 %v8118_v21  ;;  %6366 = vmatpush1.bf16.msra.mxu1 %v8161_v27  ;;  %v8179_v21 = vld [vmem:[#allocation11 + $0x3b8] ss:$28 sps:$4 sm:$0xff]   ;;  %v8184_v27 = vld [vmem:[#allocation11 + $0x384] ss:$28 sps:$4 sm:$0xff]  }
 0x424   :  { %v2843_v48 = vpop.f32.mrf.mxu1  ;;  %6367 = vmatprep.subr.bf16.mxu1 %v8166_v28  ;;  %v2801_v51 = vadd.f32 %v2800_v38, %v1451_v37  ;;  %v2842_v24 = vadd.f32 %v2841_v31, %v2799_v43  ;;  %v8134_v30 = vld [vmem:[#allocation11] ss:$28 sps:$4 sm:$0xff]   ;;  %v8139_v38 = vld [vmem:[#allocation11 + $0x34c] ss:$28 sps:$4 sm:$0xff]  }
 0x425   :  { %v2802_v46 = vpop.f32.mrf.mxu0 }
 0x426   :  { %v2803_v49 = vadd.f32 %v2802_v46, %v1447_v29  ;;  %v2845_v50 = vpop.f32.mrf.mxu1  ;;  %6325 = vmatpush1.bf16.msra.mxu0 %v8116_v34  ;;  %v2844_v12 = vadd.f32 %v2843_v48, %v2801_v51 }
 0x427   :  { %v2804_v52 = vpop.f32.mrf.mxu0  ;;  %6326 = vmatprep.subr.bf16.mxu0 %v8121_v39  ;;  %6368 = vmatpush1.bf16.msra.mxu1 %v8164_v47  ;;  %v8182_v39 = vld [vmem:[#allocation11 + $0x380] ss:$28 sps:$4 sm:$0xff]   ;;  %v8187_v47 = vld [vmem:[#allocation11 + $0x6cc] ss:$28 sps:$4 sm:$0xff]  }
 0x428   :  { %v2846_v55 = vadd.f32 %v2845_v50, %v2803_v49  ;;  %v2805_v56 = vadd.f32 %v2804_v52, %v1451_v37  ;;  %6369 = vmatprep.subr.bf16.mxu1 %v8169_v42  ;;  %v2847_v57 = vpop.f32.mrf.mxu1  ;;  %v8137_v49 = vld [vmem:[#allocation11 + $0x348] ss:$28 sps:$4 sm:$0xff]   ;;  %v8142_v52 = vld [vmem:[#allocation11 + $0x314] ss:$28 sps:$4 sm:$0xff]  }
 0x42a   :  { %v3108_v58 = vsel %vm420_vm1, %v2846_v55, 0.0  ;;  %v9208_v59 = vadd.f32 %v2847_v57, %v2805_v56  ;;  %6327 = vmatpush1.bf16.msra.mxu0 %v8119_v45  ;;  %v8140_v57 = vld [vmem:[#allocation11 + $0x310] ss:$28 sps:$4 sm:$0xff]  }
 0x42b   :  { %v3109_v13 = vadd.f32 %v3108_v58, %v2842_v24  ;;  %6328 = vmatprep.subr.bf16.mxu0 %v8124_v53  ;;  %6370 = vmatpush1.bf16.msra.mxu1 %v8167_v54  ;;  %v8185_v53 = vld [vmem:[#allocation11 + $0x6c8] ss:$28 sps:$4 sm:$0xff]   ;;  %v8145_v58 = vld [vmem:[#allocation11 + $0x2dc] ss:$28 sps:$4 sm:$0xff]  }
 0x42c   :  { %v3116_v17 = vsel %vm420_vm1, %v9208_v59, 0.0  ;;  %6371 = vmatprep.subr.bf16.mxu1 %v8172_v22 }
 0x42d   :  { %v3110_v60 = vrot.slane %v3109_v13, 4  ;;  %v3117_v26 = vadd.f32 %v3116_v17, %v2844_v12  ;;  %v8143_v17 = vld [vmem:[#allocation11 + $0x2d8] ss:$28 sps:$4 sm:$0xff]  }
 0x42e   :  { %6329 = vmatpush1.bf16.msra.mxu0 %v8122_v11 }
 0x42f   :  { %v3111_v62 = vadd.f32 %v3110_v60, %v3109_v13  ;;  %v3118_v63 = vrot.slane %v3117_v26, 4  ;;  %6330 = vmatprep.subr.bf16.mxu0 %v8127_v15  ;;  %6372 = vmatpush1.bf16.msra.mxu1 %v8170_v16  ;;  %v8193_v13 = vld [vmem:[#allocation11 + $0x65c] ss:$28 sps:$4 sm:$0xff]  }
 0x430   :  { %6373 = vmatprep.subr.bf16.mxu1 %v8175_v25  ;;  %v8148_v25 = vld [vmem:[#allocation11 + $0x2a4] ss:$28 sps:$4 sm:$0xff]   ;;  %v8191_v60 = vld [vmem:[#allocation11 + $0x658] ss:$28 sps:$4 sm:$0xff]  }
 0x431   :  { %v3112_v3 = vrot.slane %v3111_v62, 2  ;;  %v3119_v4 = vadd.f32 %v3118_v63, %v3117_v26 }
 0x432   :  { %6331 = vmatpush1.bf16.msra.mxu0 %v8125_v61 }
 0x433   :  { %v3113_v6 = vadd.f32 %v3112_v3, %v3111_v62  ;;  %v3120_v7 = vrot.slane %v3119_v4, 2  ;;  %6332 = vmatprep.subr.bf16.mxu0 %v8130_v0  ;;  %6374 = vmatpush1.bf16.msra.mxu1 %v8173_v1  ;;  %v8196_v62 = vld [vmem:[#allocation11 + $0x624] ss:$28 sps:$4 sm:$0xff]  }
 0x434   :  { %6375 = vmatprep.subr.bf16.mxu1 %v8178_v2  ;;  %v8146_v1 = vld [vmem:[#allocation11 + $0x2a0] ss:$28 sps:$4 sm:$0xff]   ;;  %v8151_v2 = vld [vmem:[#allocation11 + $0x26c] ss:$28 sps:$4 sm:$0xff]  }
 0x435   :  { %v3114_v10 = vrot.slane %v3113_v6, 1  ;;  %v3121_v35 = vadd.f32 %v3120_v7, %v3119_v4  ;;  %v8194_v3 = vld [vmem:[#allocation11 + $0x620] ss:$28 sps:$4 sm:$0xff]  }
 0x436   :  { %6333 = vmatpush1.bf16.msra.mxu0 %v8128_v5 }
 0x437   :  { %v3115_v18 = vadd.f32 %v3114_v10, %v3113_v6  ;;  %v3122_v33 = vrot.slane %v3121_v35, 1  ;;  %6334 = vmatprep.subr.bf16.mxu0 %v8133_v8  ;;  %6376 = vmatpush1.bf16.msra.mxu1 %v8176_v9  ;;  %v8199_v6 = vld [vmem:[#allocation11 + $0x5ec] ss:$28 sps:$4 sm:$0xff]  }
 0x438   :  { %6377 = vmatprep.subr.bf16.mxu1 %v8181_v32  ;;  %v8149_v9 = vld [vmem:[#allocation11 + $0x268] ss:$28 sps:$4 sm:$0xff]   ;;  %v8154_v32 = vld [vmem:[#allocation11 + $0x234] ss:$28 sps:$4 sm:$0xff]  }
 0x439   :  { %v3172_v28 = vmul.f32 0.083333336, %v3115_v18  ;;  %v3123_v29 = vadd.f32 %v3122_v33, %v3121_v35  ;;  %v8197_v10 = vld [vmem:[#allocation11 + $0x5e8] ss:$28 sps:$4 sm:$0xff]   ;;  %v8202_v18 = vld [vmem:[#allocation11 + $0x5b4] ss:$28 sps:$4 sm:$0xff]  }
 0x43a   :  { %6335 = vmatpush1.bf16.msra.mxu0 %v8131_v14 }
 0x43b   :  { %v9212_v31 = vsub.f32 %v2842_v24, %v3172_v28  ;;  %v9214_v34 = vsub.f32 %v2846_v55, %v3172_v28  ;;  %v3173_v37 = vmul.f32 0.083333336, %v3123_v29  ;;  %6336 = vmatprep.subr.bf16.mxu0 %v8136_v36  ;;  %6378 = vmatpush1.bf16.msra.mxu1 %v8179_v21  ;;  %v8190_v55 = vld [vmem:[#allocation11 + $0x694] ss:$28 sps:$4 sm:$0xff]   ;;  %v8157_v21 = vld [vmem:[#allocation11 + $0x1fc] ss:$28 sps:$4 sm:$0xff]  }
 0x43c   :  { %6379 = vmatprep.subr.bf16.mxu1 %v8184_v27  ;;  %v8152_v36 = vld [vmem:[#allocation11 + $0x230] ss:$28 sps:$4 sm:$0xff]   ;;  %v8205_v28 = vld [vmem:[#allocation11 + $0x57c] ss:$28 sps:$4 sm:$0xff]  }
 0x43d   :  { %v3196_v48 = vmul.f32 %v9212_v31, %v9212_v31  ;;  %v3204_v42 = vmul.f32 %v9214_v34, %v9214_v34  ;;  %v9220_v43 = vsub.f32 %v2844_v12, %v3173_v37  ;;  %v9223_v46 = vsub.f32 %v9208_v59, %v3173_v37  ;;  %v8188_v59 = vld [vmem:[#allocation11 + $0x690] ss:$28 sps:$4 sm:$0xff]   ;;  %v8155_v37 = vld [vmem:[#allocation11 + $0x1f8] ss:$28 sps:$4 sm:$0xff]  }
 0x43e   :  { %6337 = vmatpush1.bf16.msra.mxu0 %v8134_v30  ;;  %v8200_v27 = vld [vmem:[#allocation11 + $0x5b0] ss:$28 sps:$4 sm:$0xff]  }
 0x43f   :  { %v3212_v50 = vsel %vm420_vm1, %v3204_v42, 0.0  ;;  %v3197_v45 = vmul.f32 %v9220_v43, %v9220_v43  ;;  %v3205_v51 = vmul.f32 %v9223_v46, %v9223_v46  ;;  %6338 = vmatprep.subr.bf16.mxu0 %v8139_v38  ;;  %6380 = vmatpush1.bf16.msra.mxu1 %v8182_v39  ;;  %v141_v29 = vld [vmem:[#allocation13 + $0x40] ss:$8 sm:$0xf] }
 0x440   :  { %v3213_v54 = vadd.f32 %v3212_v50, %v3196_v48  ;;  %6381 = vmatprep.subr.bf16.mxu1 %v8187_v47  ;;  %v142_v30 = vld [vmem:[#allocation13 + $0x40] ss:$8 sm:$0xf0]  ;;  %v145_v48 = vld [vmem:[#allocation13 + $0x41] ss:$8 sm:$0xf] }
 0x441   :  { %v3220_v56 = vsel %vm420_vm1, %v3205_v51, 0.0  ;;  %v8160_v38 = vld [vmem:[#allocation11 + $0x1c4] ss:$28 sps:$4 sm:$0xff]   ;;  %v8203_v39 = vld [vmem:[#allocation11 + $0x578] ss:$28 sps:$4 sm:$0xff]  }
 0x442   :  { %v3214_v22 = vrot.slane %v3213_v54, 4  ;;  %v3221_v24 = vadd.f32 %v3220_v56, %v3197_v45  ;;  %6339 = vmatpush2.bf16.msra.mxu0 %v8137_v49  ;;  %v8208_v47 = vld [vmem:[#allocation11 + $0x544] ss:$28 sps:$4 sm:$0xff]   ;;  %v9231_v49 = vor.u32 %v142_v30, %v141_v29  ;;  %v8211_v51 = vld [vmem:[#allocation11 + $0x88c] ss:$28 sps:$4 sm:$0xff]  }
 0x443   :  { %6340 = vmatprep.subr.bf16.mxu0 %v8142_v52  ;;  %6382 = vmatpush2.bf16.msra.mxu1 %v8185_v53  ;;  %v146_v42 = vld [vmem:[#allocation13 + $0x41] ss:$8 sm:$0xf0] }
 0x444   :  { %v3215_v11 = vadd.f32 %v3214_v22, %v3213_v54  ;;  %v3222_v12 = vrot.slane %v3221_v24, 4  ;;  %6383 = vmatprep.subr.bf16.mxu1 %v8190_v55  ;;  %v8158_v50 = vld [vmem:[#allocation11 + $0x1c0] ss:$28 sps:$4 sm:$0xff]   ;;  %v9233_v52 = vor.u32 %v146_v42, %v145_v48  ;;  %v3320_v53 = vrot.slane %v9231_v49, %v9074_v41  ;;  %v8214_v42 = vld [vmem:[#allocation11 + $0x854] ss:$28 sps:$4 sm:$0xff]  }
 0x445   :  { %v8206_v45 = vld [vmem:[#allocation11 + $0x540] ss:$28 sps:$4 sm:$0xff]  }
 0x446   :  { %v3216_v15 = vrot.slane %v3215_v11, 2  ;;  %v3223_v16 = vadd.f32 %v3222_v12, %v3221_v24  ;;  %6341 = vmatpush2.bf16.msra.mxu0 %v8140_v57  ;;  %v3377_v22 = vrot.slane %v9233_v52, %v9074_v41  ;;  %v3324_v24 = vrot.slane %v9231_v49, %v9077_v44 }
 0x447   :  { %6342 = vmatprep.subr.bf16.mxu0 %v8145_v58  ;;  %6384 = vmatpush2.bf16.msra.mxu1 %v8188_v59  ;;  %v3381_v58 = vrot.slane %v9233_v52, %v9077_v44  ;;  %v1455_v59 = vrot.slane %v9199_v20, %v9106_v19 }
 0x448   :  { %v3217_v26 = vadd.f32 %v3216_v15, %v3215_v11  ;;  %v3224_v61 = vrot.slane %v3223_v16, 2  ;;  %6385 = vmatprep.subr.bf16.mxu1 %v8193_v13 }
 0x44a   :  { %v3218_v63 = vrot.slane %v3217_v26, 1  ;;  %v3225_v0 = vadd.f32 %v3224_v61, %v3223_v16  ;;  %6343 = vmatpush2.bf16.msra.mxu0 %v8143_v17  ;;  %v1459_v16 = vrot.slane %v9199_v20, %v9109_v23 }
 0x44b   :  { %6344 = vmatprep.subr.bf16.mxu0 %v8148_v25  ;;  %6386 = vmatpush2.bf16.msra.mxu1 %v8191_v60 }
 0x44c   :  { %v3219_v4 = vadd.f32 %v3218_v63, %v3217_v26  ;;  %v3226_v5 = vrot.slane %v3225_v0, 1  ;;  %6387 = vmatprep.subr.bf16.mxu1 %v8196_v62 }
 0x44e   :  { %v3276_v7 = vmul.f32 0.083333336, %v3219_v4  ;;  %v3227_v8 = vadd.f32 %v3226_v5, %v3225_v0  ;;  %6345 = vmatpush2.bf16.msra.mxu0 %v8146_v1 }
 0x44f   :  { %6346 = vmatprep.subr.bf16.mxu0 %v8151_v2  ;;  %6388 = vmatpush2.bf16.msra.mxu1 %v8194_v3 }
 0x450   :  { %v3284_v35 = vadd.f32 1e-05, %v3276_v7  ;;  %v3277_v14 = vmul.f32 0.083333336, %v3227_v8  ;;  %6389 = vmatprep.subr.bf16.mxu1 %v8199_v6 }
 0x452   :  { %8765 = vrsqrt.f32 %v3284_v35  ;;  %v3285_v33 = vadd.f32 1e-05, %v3277_v14  ;;  %6347 = vmatpush2.bf16.msra.mxu0 %v8149_v9 }
 0x453   :  { %6348 = vmatprep.subr.bf16.mxu0 %v8154_v32  ;;  %6390 = vmatpush2.bf16.msra.mxu1 %v8197_v10 }
 0x454   :  { %8767 = vrsqrt.f32 %v3285_v33  ;;  %6391 = vmatprep.subr.bf16.mxu1 %v8202_v18 }
 0x456   :  { %6349 = vmatpush2.bf16.msra.mxu0 %v8152_v36 }
 0x457   :  { %6350 = vmatprep.subr.bf16.mxu0 %v8157_v21  ;;  %6392 = vmatpush2.bf16.msra.mxu1 %v8200_v27 }
 0x458   :  { %6393 = vmatprep.subr.bf16.mxu1 %v8205_v28 }
 0x45a   :  { %6351 = vmatpush2.bf16.msra.mxu0 %v8155_v37 }
 0x45b   :  { %6352 = vmatprep.subr.bf16.mxu0 %v8160_v38  ;;  %6394 = vmatpush2.bf16.msra.mxu1 %v8203_v39 }
 0x45c   :  { %6395 = vmatprep.subr.bf16.mxu1 %v8208_v47  ;;  %v8209_v47 = vld [vmem:[#allocation11 + $0x888] ss:$28 sps:$4 sm:$0xff]  }
 0x45e   :  { %6353 = vmatpush2.bf16.msra.mxu0 %v8158_v50  ;;  %v8259_v50 = vld [vmem:[#allocation11 + $0xc0c] ss:$28 sps:$4 sm:$0xff]  }
 0x45f   :  { %v8766_v54 = vpop.eup %8765  ;;  %6396 = vmatpush2.bf16.msra.mxu1 %v8206_v45  ;;  %6408 = vmatprep.subr.bf16.mxu0 %v8211_v51 }
 0x460   :  { %v3300_v55 = vmul.f32 %v8766_v54, %v9212_v31  ;;  %v3308_v56 = vmul.f32 %v8766_v54, %v9214_v34  ;;  %6451 = vmatprep.subr.bf16.mxu1 %v8259_v50  ;;  %v8238_v50 = vld [vmem:[#allocation11 + $0xa14] ss:$28 sps:$4 sm:$0xff]  }
 0x461   :  { %v8768_v57 = vpop.eup %8767  ;;  %v2884_v11 = vpop.f32.mrf.mxu0 }
 0x462   :  { %v3357_v12 = vmul.f32 %v3320_v53, %v3300_v55  ;;  %v3365_v13 = vmul.f32 %v3320_v53, %v3308_v56  ;;  %v3301_v31 = vmul.f32 %v8768_v57, %v9220_v43  ;;  %v3309_v34 = vmul.f32 %v8768_v57, %v9223_v46  ;;  %v2927_v15 = vpop.f32.mrf.mxu1  ;;  %v8212_v55 = vld [vmem:[#allocation11 + $0x850] ss:$28 sps:$4 sm:$0xff]   ;;  %v8217_v56 = vld [vmem:[#allocation11 + $0x81c] ss:$28 sps:$4 sm:$0xff]  }
 0x463   :  { %v2886_v17 = vpop.f32.mrf.mxu0  ;;  %v2885_v62 = vadd.f32 %v2884_v11, %v1455_v59  ;;  %v8220_v11 = vld [vmem:[#allocation11 + $0x7e4] ss:$28 sps:$4 sm:$0xff]  }
 0x464   :  { %v3422_v25 = vadd.f32 %v3377_v22, %v3365_v13  ;;  %v3358_v60 = vmul.f32 %v3324_v24, %v3301_v31  ;;  %v3366_v26 = vmul.f32 %v3324_v24, %v3309_v34  ;;  %v2929_v61 = vpop.f32.mrf.mxu1  ;;  %v3414_v0 = vadd.f32 %v3377_v22, %v3357_v12 }
 0x465   :  { %v2888_v63 = vpop.f32.mrf.mxu0  ;;  %v2887_v5 = vadd.f32 %v2886_v17, %v1459_v16  ;;  %v2928_v32 = vadd.f32 %v2927_v15, %v2885_v62  ;;  %v8218_v15 = vld [vmem:[#allocation11 + $0x7e0] ss:$28 sps:$4 sm:$0xff]  }
 0x466   :  { %v3438_v1 = vmul.f32 0.2, %v3422_v25  ;;  %v3423_v2 = vadd.f32 %v3381_v58, %v3366_v26  ;;  %v2889_v3 = vadd.f32 %v2888_v63, %v1455_v59  ;;  %v2931_v4 = vpop.f32.mrf.mxu1  ;;  %v3415_v6 = vadd.f32 %v3381_v58, %v3358_v60  ;;  %v8215_v59 = vld [vmem:[#allocation11 + $0x818] ss:$28 sps:$4 sm:$0xff]  }
 0x467   :  { %v2890_v43 = vpop.f32.mrf.mxu0  ;;  %v3430_v46 = vmul.f32 0.2, %v3414_v0  ;;  %v2930_v27 = vadd.f32 %v2929_v61, %v2887_v5 }
 0x468   :  { %v3439_v7 = vmul.f32 0.2, %v3423_v2  ;;  %v2932_v8 = vadd.f32 %v2931_v4, %v2889_v3  ;;  %v2891_v9 = vadd.f32 %v2890_v43, %v1459_v16  ;;  %v2933_v10 = vpop.f32.mrf.mxu1  ;;  %v3431_v35 = vmul.f32 0.2, %v3415_v6  ;;  %v8223_v16 = vld [vmem:[#allocation11 + $0x7ac] ss:$28 sps:$4 sm:$0xff]  }
 0x469   :  { %v3454_v14 = vmax.f32 %v3422_v25, %v3438_v1  ;;  %v3446_v21 = vmax.f32 %v3414_v0, %v3430_v46  ;;  %v8221_v0 = vld [vmem:[#allocation11 + $0x7a8] ss:$28 sps:$4 sm:$0xff]   ;;  %v8226_v1 = vld [vmem:[#allocation11 + $0x774] ss:$28 sps:$4 sm:$0xff]  }
 0x46a   :  { %v3124_v18 = vsel %vm420_vm1, %v2932_v8, 0.0  ;;  %v2934_v33 = vadd.f32 %v2933_v10, %v2891_v9  ;;  %v3455_v36 = vmax.f32 %v3423_v2, %v3439_v7  ;;  %v3447_v29 = vmax.f32 %v3415_v6, %v3431_v35  ;;  %v8224_v6 = vld [vmem:[#allocation11 + $0x770] ss:$28 sps:$4 sm:$0xff]   ;;  %v8227_v10 = vld [vmem:[#allocation11 + $0x738] ss:$28 sps:$4 sm:$0xff]  }
 0x46b   :  { %v3125_v28 = vadd.f32 %v3124_v18, %v2928_v32  ;;  %v9255_v48 = vpack.c.bf16 %v3454_v14, %v3446_v21  ;;  %v8232_v18 = vld [vmem:[#allocation11 + $0x704] ss:$28 sps:$4 sm:$0xff]  }
 0x46c   :  { %v3132_v30 = vsel %vm420_vm1, %v2934_v33, 0.0  ;;  %v9253_v39 = vpack.c.bf16 %v3455_v36, %v3447_v29  ;;  %v8230_v21 = vld [vmem:[#allocation11 + $0x700] ss:$28 sps:$4 sm:$0xff]   ;;  %v8235_v29 = vld [vmem:[#allocation11 + $0xa4c] ss:$28 sps:$4 sm:$0xff]  }
 0x46d   :  { %v3126_v37 = vrot.slane %v3125_v28, 4  ;;  %v3133_v38 = vadd.f32 %v3132_v30, %v2930_v27 }
 0x46e   :  { %6354 = vmatprep.mubr.bf16.mxu0 %v9253_v39 }
 0x46f   :  { %v3127_v45 = vadd.f32 %v3126_v37, %v3125_v28  ;;  %v3134_v51 = vrot.slane %v3133_v38, 4  ;;  %6355 = vmatmul.mubr.bf16.vlgmr.msra.gmra.mxu0 %v9255_v48 }
 0x470   :  { %6409 = vmatpush1.bf16.msra.mxu0 %v8209_v47 }
 0x471   :  { %v3128_v53 = vrot.slane %v3127_v45, 2  ;;  %v3135_v54 = vadd.f32 %v3134_v51, %v3133_v38  ;;  %6410 = vmatprep.subr.bf16.mxu0 %v8214_v42  ;;  %v8233_v38 = vld [vmem:[#allocation11 + $0xa48] ss:$28 sps:$4 sm:$0xff]  }
 0x473   :  { %v3129_v22 = vadd.f32 %v3128_v53, %v3127_v45  ;;  %v3136_v24 = vrot.slane %v3135_v54, 2  ;;  %v8236_v53 = vld [vmem:[#allocation11 + $0xa10] ss:$28 sps:$4 sm:$0xff]  }
 0x474   :  { %6411 = vmatpush1.bf16.msra.mxu0 %v8212_v55  ;;  %v8241_v55 = vld [vmem:[#allocation11 + $0x9dc] ss:$28 sps:$4 sm:$0xff]  }
 0x475   :  { %v3130_v57 = vrot.slane %v3129_v22, 1  ;;  %v3137_v58 = vadd.f32 %v3136_v24, %v3135_v54  ;;  %6412 = vmatprep.subr.bf16.mxu0 %v8217_v56  ;;  %v8239_v56 = vld [vmem:[#allocation11 + $0x9d8] ss:$28 sps:$4 sm:$0xff]   ;;  %v8242_v24 = vld [vmem:[#allocation11 + $0x9a0] ss:$28 sps:$4 sm:$0xff]  }
 0x477   :  { %v3131_v12 = vadd.f32 %v3130_v57, %v3129_v22  ;;  %v3138_v13 = vrot.slane %v3137_v58, 1  ;;  %v8244_v22 = vld [vmem:[#allocation11 + $0x9a4] ss:$28 sps:$4 sm:$0xff]   ;;  %v8247_v57 = vld [vmem:[#allocation11 + $0x96c] ss:$28 sps:$4 sm:$0xff]  }
 0x478   :  { %6413 = vmatpush1.bf16.msra.mxu0 %v8215_v59  ;;  %v8245_v59 = vld [vmem:[#allocation11 + $0x968] ss:$28 sps:$4 sm:$0xff]  }
 0x479   :  { %v3174_v31 = vmul.f32 0.083333336, %v3131_v12  ;;  %v3139_v34 = vadd.f32 %v3138_v13, %v3137_v58  ;;  %6414 = vmatprep.subr.bf16.mxu0 %v8220_v11  ;;  %v9278_v58 = vsub.s32 4, %v9071_v40  ;;  %v3328_v11 = vrot.slane %v9231_v49, %v9106_v19  ;;  %v8250_v12 = vld [vmem:[#allocation11 + $0x934] ss:$28 sps:$4 sm:$0xff]  }
 0x47b   :  { %v9259_v17 = vsub.f32 %v2928_v32, %v3174_v31  ;;  %v9261_v25 = vsub.f32 %v2932_v8, %v3174_v31  ;;  %v3175_v60 = vmul.f32 0.083333336, %v3139_v34  ;;  %v8229_v8 = vld [vmem:[#allocation11 + $0x73c] ss:$28 sps:$4 sm:$0xff]   ;;  %v9283_v31 = vsub.s32 5, %v9071_v40 }
 0x47c   :  { %6415 = vmatpush1.bf16.msra.mxu0 %v8218_v15 }
 0x47d   :  { %v3198_v26 = vmul.f32 %v9259_v17, %v9259_v17  ;;  %v3206_v61 = vmul.f32 %v9261_v25, %v9261_v25  ;;  %v9267_v62 = vsub.f32 %v2930_v27, %v3175_v60  ;;  %v9269_v63 = vsub.f32 %v2934_v33, %v3175_v60  ;;  %6416 = vmatprep.subr.bf16.mxu0 %v8223_v16 }
 0x47e   :  { %v3385_v16 = vrot.slane %v9233_v52, %v9106_v19  ;;  %v3332_v60 = vrot.slane %v9231_v49, %v9109_v23 }
 0x47f   :  { %v3228_v2 = vsel %vm420_vm1, %v3206_v61, 0.0  ;;  %v3199_v3 = vmul.f32 %v9267_v62, %v9267_v62  ;;  %v3207_v4 = vmul.f32 %v9269_v63, %v9269_v63  ;;  %v3389_v61 = vrot.slane %v9233_v52, %v9109_v23 }
 0x480   :  { %v3229_v5 = vadd.f32 %v3228_v2, %v3198_v26  ;;  %6417 = vmatpush1.bf16.msra.mxu0 %v8221_v0  ;;  %v1463_v0 = vrot.slane %v9199_v20, %v9278_v58  ;;  %v8248_v2 = vld [vmem:[#allocation11 + $0x930] ss:$28 sps:$4 sm:$0xff]  }
 0x481   :  { %v3236_v43 = vsel %vm420_vm1, %v3207_v4, 0.0  ;;  %6418 = vmatprep.subr.bf16.mxu0 %v8226_v1 }
 0x482   :  { %v3230_v46 = vrot.slane %v3229_v5, 4  ;;  %v3237_v7 = vadd.f32 %v3236_v43, %v3199_v3  ;;  %v8253_v43 = vld [vmem:[#allocation11 + $0x8fc] ss:$28 sps:$4 sm:$0xff]  }
 0x484   :  { %v3231_v9 = vadd.f32 %v3230_v46, %v3229_v5  ;;  %v3238_v32 = vrot.slane %v3237_v7, 4  ;;  %6419 = vmatpush1.bf16.msra.mxu0 %v8224_v6  ;;  %v1467_v6 = vrot.slane %v9199_v20, %v9283_v31 }
 0x485   :  { %6420 = vmatprep.subr.bf16.mxu0 %v8229_v8 }
 0x486   :  { %v3232_v35 = vrot.slane %v3231_v9, 2  ;;  %v3239_v14 = vadd.f32 %v3238_v32, %v3237_v7 }
 0x488   :  { %v3233_v33 = vadd.f32 %v3232_v35, %v3231_v9  ;;  %v3240_v36 = vrot.slane %v3239_v14, 2  ;;  %6421 = vmatpush1.bf16.msra.mxu0 %v8227_v10 }
 0x489   :  { %6422 = vmatprep.subr.bf16.mxu0 %v8232_v18  ;;  %v8251_v18 = vld [vmem:[#allocation11 + $0x8f8] ss:$28 sps:$4 sm:$0xff]  }
 0x48a   :  { %v3234_v27 = vrot.slane %v3233_v33, 1  ;;  %v3241_v28 = vadd.f32 %v3240_v36, %v3239_v14 }
 0x48c   :  { %v3235_v30 = vadd.f32 %v3234_v27, %v3233_v33  ;;  %v3242_v37 = vrot.slane %v3241_v28, 1  ;;  %6423 = vmatpush1.bf16.msra.mxu0 %v8230_v21  ;;  %v8256_v21 = vld [vmem:[#allocation11 + $0x8c4] ss:$28 sps:$4 sm:$0xff]  }
 0x48d   :  { %6424 = vmatprep.subr.bf16.mxu0 %v8235_v29 }
 0x48e   :  { %v3278_v47 = vmul.f32 0.083333336, %v3235_v30  ;;  %v3243_v42 = vadd.f32 %v3242_v37, %v3241_v28 }
 0x490   :  { %v3286_v45 = vadd.f32 1e-05, %v3278_v47  ;;  %v3279_v51 = vmul.f32 0.083333336, %v3243_v42  ;;  %6425 = vmatpush2.bf16.msra.mxu0 %v8233_v38 }
 0x491   :  { %6426 = vmatprep.subr.bf16.mxu0 %v8238_v50 }
 0x492   :  { %8769 = vrsqrt.f32 %v3286_v45  ;;  %v3287_v54 = vadd.f32 1e-05, %v3279_v51 }
 0x494   :  { %8771 = vrsqrt.f32 %v3287_v54  ;;  %6427 = vmatpush2.bf16.msra.mxu0 %v8236_v53  ;;  %v8254_v53 = vld [vmem:[#allocation11 + $0x8c0] ss:$28 sps:$4 sm:$0xff]  }
 0x495   :  { %6428 = vmatprep.subr.bf16.mxu0 %v8241_v55 }
 0x498   :  { %6429 = vmatpush2.bf16.msra.mxu0 %v8239_v56 }
 0x499   :  { %6430 = vmatprep.subr.bf16.mxu0 %v8244_v22 }
 0x49c   :  { %6431 = vmatpush2.bf16.msra.mxu0 %v8242_v24  ;;  %v8262_v24 = vld [vmem:[#allocation11 + $0x194] ss:$28 sps:$4 sm:$0xff]  }
 0x49d   :  { %6432 = vmatprep.subr.bf16.mxu0 %v8247_v57 }
 0x49f   :  { %v8770_v13 = vpop.eup %8769 }
 0x4a0   :  { %v3302_v34 = vmul.f32 %v8770_v13, %v9259_v17  ;;  %v3310_v15 = vmul.f32 %v8770_v13, %v9261_v25  ;;  %6433 = vmatpush2.bf16.msra.mxu0 %v8245_v59 }
 0x4a1   :  { %v8772_v26 = vpop.eup %8771  ;;  %v2970_v1 = vpop.f32.mrf.mxu0  ;;  %6434 = vmatprep.subr.bf16.mxu0 %v8250_v12 }
 0x4a2   :  { %v3359_v3 = vmul.f32 %v3328_v11, %v3302_v34  ;;  %v3367_v17 = vmul.f32 %v3328_v11, %v3310_v15  ;;  %v3303_v25 = vmul.f32 %v8772_v26, %v9267_v62  ;;  %v3311_v4 = vmul.f32 %v8772_v26, %v9269_v63  ;;  %v3013_v5 = vpop.f32.mrf.mxu1  ;;  %v8265_v26 = vld [vmem:[#allocation11 + $0xbd4] ss:$28 sps:$4 sm:$0xff]  }
 0x4a3   :  { %v2972_v46 = vpop.f32.mrf.mxu0  ;;  %v2971_v10 = vadd.f32 %v2970_v1, %v1463_v0 }
 0x4a4   :  { %v3424_v7 = vadd.f32 %v3385_v16, %v3367_v17  ;;  %v3360_v8 = vmul.f32 %v3332_v60, %v3303_v25  ;;  %v3368_v9 = vmul.f32 %v3332_v60, %v3311_v4  ;;  %v3015_v32 = vpop.f32.mrf.mxu1  ;;  %v3416_v14 = vadd.f32 %v3385_v16, %v3359_v3  ;;  %6435 = vmatpush2.bf16.msra.mxu0 %v8248_v2  ;;  %v8257_v16 = vld [vmem:[#allocation11 + $0xc08] ss:$28 sps:$4 sm:$0xff]   ;;  %v8263_v3 = vld [vmem:[#allocation11 + $0xbd0] ss:$28 sps:$4 sm:$0xff]   ;;  %v8271_v17 = vld [vmem:[#allocation11 + $0xb9c] ss:$28 sps:$4 sm:$0xff]  }
 0x4a5   :  { %v2974_v35 = vpop.f32.mrf.mxu0  ;;  %6436 = vmatprep.subr.bf16.mxu0 %v8253_v43  ;;  %v2973_v27 = vadd.f32 %v2972_v46, %v1467_v6  ;;  %v3014_v42 = vadd.f32 %v3013_v5, %v2971_v10  ;;  %v8277_v46 = vld [vmem:[#allocation11 + $0xb64] ss:$28 sps:$4 sm:$0xff]  }
 0x4a6   :  { %v3440_v33 = vmul.f32 0.2, %v3424_v7  ;;  %v3425_v62 = vadd.f32 %v3389_v61, %v3368_v9  ;;  %v2975_v36 = vadd.f32 %v2974_v35, %v1463_v0  ;;  %v3017_v63 = vpop.f32.mrf.mxu1  ;;  %v3417_v29 = vadd.f32 %v3389_v61, %v3360_v8  ;;  %v8275_v10 = vld [vmem:[#allocation11 + $0xb60] ss:$28 sps:$4 sm:$0xff]   ;;  %v8283_v35 = vld [vmem:[#allocation11 + $0xb2c] ss:$28 sps:$4 sm:$0xff]  }
 0x4a7   :  { %v2976_v28 = vpop.f32.mrf.mxu0  ;;  %v3432_v30 = vmul.f32 0.2, %v3416_v14  ;;  %v3016_v57 = vadd.f32 %v3015_v32, %v2973_v27  ;;  %v8281_v27 = vld [vmem:[#allocation11 + $0xb28] ss:$28 sps:$4 sm:$0xff]  }
 0x4a8   :  { %v3441_v37 = vmul.f32 0.2, %v3425_v62  ;;  %v3018_v38 = vadd.f32 %v3017_v63, %v2975_v36  ;;  %v2977_v47 = vadd.f32 %v2976_v28, %v1467_v6  ;;  %v3019_v50 = vpop.f32.mrf.mxu1  ;;  %v3433_v45 = vmul.f32 0.2, %v3417_v29  ;;  %6437 = vmatpush2.bf16.msra.mxu0 %v8251_v18  ;;  %v8269_v6 = vld [vmem:[#allocation11 + $0xb98] ss:$28 sps:$4 sm:$0xff]  }
 0x4a9   :  { %v3456_v51 = vmax.f32 %v3424_v7, %v3440_v33  ;;  %v3448_v22 = vmax.f32 %v3416_v14, %v3432_v30  ;;  %6438 = vmatprep.subr.bf16.mxu0 %v8256_v21  ;;  %v8289_v28 = vld [vmem:[#allocation11 + $0xaf4] ss:$28 sps:$4 sm:$0xff]  }
 0x4aa   :  { %v3140_v54 = vsel %vm420_vm1, %v3018_v38, 0.0  ;;  %v3020_v55 = vadd.f32 %v3019_v50, %v2977_v47  ;;  %v3457_v56 = vmax.f32 %v3425_v62, %v3441_v37  ;;  %v3449_v11 = vmax.f32 %v3417_v29, %v3433_v45 }
 0x4ab   :  { %v3141_v59 = vadd.f32 %v3140_v54, %v3014_v42  ;;  %v9303_v60 = vpack.c.bf16 %v3456_v51, %v3448_v22  ;;  %v8295_v51 = vld [vmem:[#allocation11 + $0xabc] ss:$28 sps:$4 sm:$0xff]  }
 0x4ac   :  { %v3148_v12 = vsel %vm420_vm1, %v3020_v55, 0.0  ;;  %v9301_v15 = vpack.c.bf16 %v3457_v56, %v3449_v11  ;;  %6439 = vmatpush2.bf16.msra.mxu0 %v8254_v53  ;;  %v8299_v11 = vld [vmem:[#allocation11 + $0xa80] ss:$28 sps:$4 sm:$0xff]  }
 0x4ad   :  { %v3142_v13 = vrot.slane %v3141_v59, 4  ;;  %v3149_v34 = vadd.f32 %v3148_v12, %v3016_v57  ;;  %6494 = vmatprep.subr.bf16.mxu0 %v8262_v24  ;;  %v8301_v24 = vld [vmem:[#allocation11 + $0xa84] ss:$28 sps:$4 sm:$0xff]  }
 0x4ae   :  { %6397 = vmatprep.mubr.bf16.mxu1 %v9301_v15 }
 0x4af   :  { %v3143_v61 = vadd.f32 %v3142_v13, %v3141_v59  ;;  %v3150_v0 = vrot.slane %v3149_v34, 4  ;;  %6398 = vmatmul.mubr.bf16.vlgmr.msra.gmra.mxu1 %v9303_v60 }
 0x4b0   :  { %6452 = vmatpush1.bf16.msra.mxu1 %v8257_v16 }
 0x4b1   :  { %v3144_v1 = vrot.slane %v3143_v61, 2  ;;  %v3151_v2 = vadd.f32 %v3150_v0, %v3149_v34  ;;  %6453 = vmatprep.subr.bf16.mxu1 %v8265_v26  ;;  %v8307_v34 = vld [vmem:[#allocation11 + $0xdcc] ss:$28 sps:$4 sm:$0xff]  }
 0x4b3   :  { %v3145_v25 = vadd.f32 %v3144_v1, %v3143_v61  ;;  %v3152_v4 = vrot.slane %v3151_v2, 2  ;;  %v8305_v61 = vld [vmem:[#allocation11 + $0xdc8] ss:$28 sps:$4 sm:$0xff]  }
 0x4b4   :  { %6454 = vmatpush1.bf16.msra.mxu1 %v8263_v3 }
 0x4b5   :  { %v3146_v5 = vrot.slane %v3145_v25, 1  ;;  %v3153_v43 = vadd.f32 %v3152_v4, %v3151_v2  ;;  %6455 = vmatprep.subr.bf16.mxu1 %v8271_v17  ;;  %v8313_v2 = vld [vmem:[#allocation11 + $0xd94] ss:$28 sps:$4 sm:$0xff]  }
 0x4b7   :  { %v3147_v7 = vadd.f32 %v3146_v5, %v3145_v25  ;;  %v3154_v8 = vrot.slane %v3153_v43, 1  ;;  %v8311_v25 = vld [vmem:[#allocation11 + $0xd90] ss:$28 sps:$4 sm:$0xff]   ;;  %v8319_v5 = vld [vmem:[#allocation11 + $0xd5c] ss:$28 sps:$4 sm:$0xff]  }
 0x4b8   :  { %6456 = vmatpush1.bf16.msra.mxu1 %v8269_v6  ;;  %v8325_v6 = vld [vmem:[#allocation11 + $0xd24] ss:$28 sps:$4 sm:$0xff]  }
 0x4b9   :  { %v3176_v9 = vmul.f32 0.083333336, %v3147_v7  ;;  %v3155_v32 = vadd.f32 %v3154_v8, %v3153_v43  ;;  %6457 = vmatprep.subr.bf16.mxu1 %v8277_v46  ;;  %v8317_v43 = vld [vmem:[#allocation11 + $0xd58] ss:$28 sps:$4 sm:$0xff]   ;;  %v8323_v46 = vld [vmem:[#allocation11 + $0xd20] ss:$28 sps:$4 sm:$0xff]  }
 0x4ba   :  { %v8331_v7 = vld [vmem:[#allocation11 + $0xcec] ss:$28 sps:$4 sm:$0xff]   ;;  %v9326_v8 = vsub.s32 6, %v9071_v40 }
 0x4bb   :  { %v9307_v14 = vsub.f32 %v3014_v42, %v3176_v9  ;;  %v9309_v18 = vsub.f32 %v3018_v38, %v3176_v9  ;;  %v3177_v33 = vmul.f32 0.083333336, %v3155_v32  ;;  %v8287_v42 = vld [vmem:[#allocation11 + $0xaf0] ss:$28 sps:$4 sm:$0xff]   ;;  %v8329_v9 = vld [vmem:[#allocation11 + $0xce8] ss:$28 sps:$4 sm:$0xff]   ;;  %v3336_v32 = vrot.slane %v9231_v49, %v9278_v58 }
 0x4bc   :  { %6458 = vmatpush1.bf16.msra.mxu1 %v8275_v10  ;;  %v8337_v10 = vld [vmem:[#allocation11 + $0xcb4] ss:$28 sps:$4 sm:$0xff]  }
 0x4bd   :  { %v3200_v62 = vmul.f32 %v9307_v14, %v9307_v14  ;;  %v3208_v36 = vmul.f32 %v9309_v18, %v9309_v18  ;;  %v9315_v63 = vsub.f32 %v3016_v57, %v3177_v33  ;;  %v9317_v21 = vsub.f32 %v3020_v55, %v3177_v33  ;;  %6459 = vmatprep.subr.bf16.mxu1 %v8283_v35  ;;  %v8293_v55 = vld [vmem:[#allocation11 + $0xab8] ss:$28 sps:$4 sm:$0xff]  }
 0x4be   :  { %v9331_v33 = vsub.s32 7, %v9071_v40  ;;  %v8335_v40 = vld [vmem:[#allocation11 + $0xcb0] ss:$28 sps:$4 sm:$0xff]  }
 0x4bf   :  { %v3244_v29 = vsel %vm420_vm1, %v3208_v36, 0.0  ;;  %v3201_v30 = vmul.f32 %v9315_v63, %v9315_v63  ;;  %v3209_v37 = vmul.f32 %v9317_v21, %v9317_v21 }
 0x4c0   :  { %v3245_v38 = vadd.f32 %v3244_v29, %v3200_v62  ;;  %6460 = vmatpush1.bf16.msra.mxu1 %v8281_v27  ;;  %v3393_v27 = vrot.slane %v9233_v52, %v9278_v58 }
 0x4c1   :  { %v3252_v47 = vsel %vm420_vm1, %v3209_v37, 0.0  ;;  %6461 = vmatprep.subr.bf16.mxu1 %v8289_v28  ;;  %v3340_v28 = vrot.slane %v9231_v49, %v9283_v31  ;;  %v1471_v37 = vrot.slane %v9199_v20, %v9326_v8 }
 0x4c2   :  { %v3246_v50 = vrot.slane %v3245_v38, 4  ;;  %v3253_v45 = vadd.f32 %v3252_v47, %v3201_v30  ;;  %v3397_v30 = vrot.slane %v9233_v52, %v9283_v31 }
 0x4c4   :  { %v3247_v53 = vadd.f32 %v3246_v50, %v3245_v38  ;;  %v3254_v54 = vrot.slane %v3253_v45, 4  ;;  %6462 = vmatpush1.bf16.msra.mxu1 %v8287_v42 }
 0x4c5   :  { %6463 = vmatprep.subr.bf16.mxu1 %v8295_v51  ;;  %v1475_v51 = vrot.slane %v9199_v20, %v9331_v33 }
 0x4c6   :  { %v3248_v56 = vrot.slane %v3247_v53, 2  ;;  %v3255_v22 = vadd.f32 %v3254_v54, %v3253_v45  ;;  %v8343_v45 = vld [vmem:[#allocation11 + $0xc7c] ss:$28 sps:$4 sm:$0xff]  }
 0x4c8   :  { %v3249_v57 = vadd.f32 %v3248_v56, %v3247_v53  ;;  %v3256_v59 = vrot.slane %v3255_v22, 2  ;;  %6464 = vmatpush1.bf16.msra.mxu1 %v8293_v55 }
 0x4c9   :  { %6465 = vmatprep.subr.bf16.mxu1 %v8301_v24 }
 0x4ca   :  { %v3250_v12 = vrot.slane %v3249_v57, 1  ;;  %v3257_v13 = vadd.f32 %v3256_v59, %v3255_v22 }
 0x4cc   :  { %v3251_v16 = vadd.f32 %v3250_v12, %v3249_v57  ;;  %v3258_v26 = vrot.slane %v3257_v13, 1  ;;  %6466 = vmatpush1.bf16.msra.mxu1 %v8299_v11  ;;  %v8341_v11 = vld [vmem:[#allocation11 + $0xc78] ss:$28 sps:$4 sm:$0xff]  }
 0x4cd   :  { %6467 = vmatprep.subr.bf16.mxu1 %v8307_v34  ;;  %v8349_v34 = vld [vmem:[#allocation11 + $0xc44] ss:$28 sps:$4 sm:$0xff]  }
 0x4ce   :  { %v3280_v0 = vmul.f32 0.083333336, %v3251_v16  ;;  %v3259_v1 = vadd.f32 %v3258_v26, %v3257_v13 }
 0x4d0   :  { %v3288_v3 = vadd.f32 1e-05, %v3280_v0  ;;  %v3281_v17 = vmul.f32 0.083333336, %v3259_v1  ;;  %6468 = vmatpush2.bf16.msra.mxu1 %v8305_v61 }
 0x4d1   :  { %6469 = vmatprep.subr.bf16.mxu1 %v8313_v2 }
 0x4d2   :  { %8773 = vrsqrt.f32 %v3288_v3  ;;  %v3289_v4 = vadd.f32 1e-05, %v3281_v17 }
 0x4d4   :  { %8775 = vrsqrt.f32 %v3289_v4  ;;  %6470 = vmatpush2.bf16.msra.mxu1 %v8311_v25 }
 0x4d5   :  { %6471 = vmatprep.subr.bf16.mxu1 %v8319_v5  ;;  %v8347_v5 = vld [vmem:[#allocation11 + $0xc40] ss:$28 sps:$4 sm:$0xff]  }
 0x4d8   :  { %6472 = vmatpush2.bf16.msra.mxu1 %v8317_v43 }
 0x4d9   :  { %6473 = vmatprep.subr.bf16.mxu1 %v8325_v6 }
 0x4dc   :  { %6474 = vmatpush2.bf16.msra.mxu1 %v8323_v46 }
 0x4dd   :  { %6475 = vmatprep.subr.bf16.mxu1 %v8331_v7 }
 0x4df   :  { %v8774_v35 = vpop.eup %8773 }
 0x4e0   :  { %v3304_v62 = vmul.f32 %v8774_v35, %v9307_v14  ;;  %v3312_v36 = vmul.f32 %v8774_v35, %v9309_v18  ;;  %6476 = vmatpush2.bf16.msra.mxu1 %v8329_v9  ;;  %v8355_v9 = vld [vmem:[#allocation11 + $0x514] ss:$28 sps:$4 sm:$0xff]  }
 0x4e1   :  { %v8776_v29 = vpop.eup %8775  ;;  %v3056_v38 = vpop.f32.mrf.mxu0  ;;  %6477 = vmatprep.subr.bf16.mxu1 %v8337_v10 }
 0x4e2   :  { %v3361_v47 = vmul.f32 %v3336_v32, %v3304_v62  ;;  %v3369_v14 = vmul.f32 %v3336_v32, %v3312_v36  ;;  %v3305_v18 = vmul.f32 %v8776_v29, %v9315_v63  ;;  %v3313_v42 = vmul.f32 %v8776_v29, %v9317_v21  ;;  %v3099_v50 = vpop.f32.mrf.mxu1  ;;  %v8260_v29 = vld [vmem:[#allocation11 + $0x190] ss:$28 sps:$4 sm:$0xff]  }
 0x4e3   :  { %v3058_v53 = vpop.f32.mrf.mxu0  ;;  %v3057_v24 = vadd.f32 %v3056_v38, %v1471_v37 }
 0x4e4   :  { %v3426_v54 = vadd.f32 %v3393_v27, %v3369_v14  ;;  %v3362_v55 = vmul.f32 %v3340_v28, %v3305_v18  ;;  %v3370_v56 = vmul.f32 %v3340_v28, %v3313_v42  ;;  %v3101_v22 = vpop.f32.mrf.mxu1  ;;  %v3418_v59 = vadd.f32 %v3393_v27, %v3361_v47  ;;  %6478 = vmatpush2.bf16.msra.mxu1 %v8335_v40  ;;  %v8266_v18 = vld [vmem:[#allocation11 + $0x158] ss:$28 sps:$4 sm:$0xff]   ;;  %v8274_v42 = vld [vmem:[#allocation11 + $0x124] ss:$28 sps:$4 sm:$0xff]  }
 0x4e5   :  { %v3060_v57 = vpop.f32.mrf.mxu0  ;;  %6479 = vmatprep.subr.bf16.mxu1 %v8343_v45  ;;  %v3059_v16 = vadd.f32 %v3058_v53, %v1475_v51  ;;  %v3100_v3 = vadd.f32 %v3099_v50, %v3057_v24 }
 0x4e6   :  { %v3442_v12 = vmul.f32 0.2, %v3426_v54  ;;  %v3427_v63 = vadd.f32 %v3397_v30, %v3370_v56  ;;  %v3061_v13 = vadd.f32 %v3060_v57, %v1471_v37  ;;  %v3103_v21 = vpop.f32.mrf.mxu1  ;;  %v3419_v61 = vadd.f32 %v3397_v30, %v3362_v55  ;;  %v8268_v37 = vld [vmem:[#allocation11 + $0x15c] ss:$28 sps:$4 sm:$0xff]   ;;  %v8280_v55 = vld [vmem:[#allocation11 + $0xec] ss:$28 sps:$4 sm:$0xff]  }
 0x4e7   :  { %v3062_v26 = vpop.f32.mrf.mxu0  ;;  %v3434_v20 = vmul.f32 0.2, %v3418_v59  ;;  %v3102_v32 = vadd.f32 %v3101_v22, %v3059_v16 }
 0x4e8   :  { %v3443_v0 = vmul.f32 0.2, %v3427_v63  ;;  %v3104_v1 = vadd.f32 %v3103_v21, %v3061_v13  ;;  %v3063_v2 = vadd.f32 %v3062_v26, %v1475_v51  ;;  %v3105_v17 = vpop.f32.mrf.mxu1  ;;  %v3435_v25 = vmul.f32 0.2, %v3419_v61  ;;  %6480 = vmatpush2.bf16.msra.mxu1 %v8341_v11  ;;  %v8286_v11 = vld [vmem:[#allocation11 + $0xb4] ss:$28 sps:$4 sm:$0xff]  }
 0x4e9   :  { %v3458_v4 = vmax.f32 %v3426_v54, %v3442_v12  ;;  %v3450_v7 = vmax.f32 %v3418_v59, %v3434_v20  ;;  %6481 = vmatprep.subr.bf16.mxu1 %v8349_v34  ;;  %v8272_v54 = vld [vmem:[#allocation11 + $0x120] ss:$28 sps:$4 sm:$0xff]   ;;  %v8278_v59 = vld [vmem:[#allocation11 + $0xe8] ss:$28 sps:$4 sm:$0xff]  }
 0x4ea   :  { %v3156_v43 = vsel %vm420_vm1, %v3104_v1, 0.0  ;;  %v3106_v6 = vadd.f32 %v3105_v17, %v3063_v2  ;;  %v3459_v46 = vmax.f32 %v3427_v63, %v3443_v0  ;;  %v3451_v35 = vmax.f32 %v3419_v61, %v3435_v25  ;;  %v8284_v61 = vld [vmem:[#allocation11 + $0xb0] ss:$28 sps:$4 sm:$0xff]   ;;  %v8292_v20 = vld [vmem:[#allocation11 + $0x7c] ss:$28 sps:$4 sm:$0xff]  }
 0x4eb   :  { %v3157_v10 = vadd.f32 %v3156_v43, %v3100_v3  ;;  %v9351_v30 = vpack.c.bf16 %v3458_v4, %v3450_v7  ;;  %v8290_v25 = vld [vmem:[#allocation11 + $0x78] ss:$28 sps:$4 sm:$0xff]   ;;  %v8298_v43 = vld [vmem:[#allocation11 + $0x44] ss:$28 sps:$4 sm:$0xff]  }
 0x4ec   :  { %v3164_v62 = vsel %vm420_vm1, %v3106_v6, 0.0  ;;  %v9349_v28 = vpack.c.bf16 %v3459_v46, %v3451_v35  ;;  %6482 = vmatpush2.bf16.msra.mxu1 %v8347_v5  ;;  %v8296_v7 = vld [vmem:[#allocation11 + $0x40] ss:$28 sps:$4 sm:$0xff]  }
 0x4ed   :  { %v3158_v36 = vrot.slane %v3157_v10, 4  ;;  %v3165_v27 = vadd.f32 %v3164_v62, %v3102_v32  ;;  %6537 = vmatprep.subr.bf16.mxu1 %v8355_v9 }
 0x4ee   :  { %6440 = vmatprep.mubr.bf16.mxu0 %v9349_v28 }
 0x4ef   :  { %v3159_v38 = vadd.f32 %v3158_v36, %v3157_v10  ;;  %v3166_v40 = vrot.slane %v3165_v27, 4  ;;  %6441 = vmatmul.mubr.bf16.vlgmr.msra.gmra.mxu0 %v9351_v30  ;;  %v8304_v10 = vld [vmem:[#allocation11 + $0xc] ss:$28 sps:$4 sm:$0xff]  }
 0x4f0   :  { %6495 = vmatpush1.bf16.msra.mxu0 %v8260_v29  ;;  %6526 = vmatprep.mubr.bf16.mxu0 %v9253_v39  ;;  %v8302_v36 = vld [vmem:[#allocation11 + $0x8] ss:$28 sps:$4 sm:$0xff]  }
 0x4f1   :  { %v3160_v47 = vrot.slane %v3159_v38, 2  ;;  %v3167_v14 = vadd.f32 %v3166_v40, %v3165_v27  ;;  %6496 = vmatprep.subr.bf16.mxu0 %v8268_v37  ;;  %v8310_v37 = vld [vmem:[#allocation11 + $0x354] ss:$28 sps:$4 sm:$0xff]  }
 0x4f3   :  { %v3161_v50 = vadd.f32 %v3160_v47, %v3159_v38  ;;  %v3168_v45 = vrot.slane %v3167_v14, 2  ;;  %v8308_v47 = vld [vmem:[#allocation11 + $0x350] ss:$28 sps:$4 sm:$0xff]  }
 0x4f4   :  { %6497 = vmatpush1.bf16.msra.mxu0 %v8266_v18 }
 0x4f5   :  { %v3162_v51 = vrot.slane %v3161_v50, 1  ;;  %v3169_v53 = vadd.f32 %v3168_v45, %v3167_v14  ;;  %6498 = vmatprep.subr.bf16.mxu0 %v8274_v42  ;;  %v8316_v42 = vld [vmem:[#allocation11 + $0x31c] ss:$28 sps:$4 sm:$0xff]  }
 0x4f7   :  { %v3163_v56 = vadd.f32 %v3162_v51, %v3161_v50  ;;  %v3170_v22 = vrot.slane %v3169_v53, 1  ;;  %v8314_v51 = vld [vmem:[#allocation11 + $0x318] ss:$28 sps:$4 sm:$0xff]  }
 0x4f8   :  { %6499 = vmatpush1.bf16.msra.mxu0 %v8272_v54  ;;  %v8322_v54 = vld [vmem:[#allocation11 + $0x2e4] ss:$28 sps:$4 sm:$0xff]  }
 0x4f9   :  { %v3178_v24 = vmul.f32 0.083333336, %v3163_v56  ;;  %v3171_v57 = vadd.f32 %v3170_v22, %v3169_v53  ;;  %6500 = vmatprep.subr.bf16.mxu0 %v8280_v55  ;;  %v8320_v55 = vld [vmem:[#allocation11 + $0x2e0] ss:$28 sps:$4 sm:$0xff]   ;;  %v8328_v56 = vld [vmem:[#allocation11 + $0x2ac] ss:$28 sps:$4 sm:$0xff]  }
 0x4fa   :  { %v8326_v22 = vld [vmem:[#allocation11 + $0x2a8] ss:$28 sps:$4 sm:$0xff]  }
 0x4fb   :  { %v9356_v12 = vsub.f32 %v3100_v3, %v3178_v24  ;;  %v9358_v63 = vsub.f32 %v3104_v1, %v3178_v24  ;;  %v3179_v13 = vmul.f32 0.083333336, %v3171_v57  ;;  %v8334_v24 = vld [vmem:[#allocation11 + $0x274] ss:$28 sps:$4 sm:$0xff]  }
 0x4fc   :  { %6501 = vmatpush1.bf16.msra.mxu0 %v8278_v59  ;;  %v8332_v57 = vld [vmem:[#allocation11 + $0x270] ss:$28 sps:$4 sm:$0xff]   ;;  %v3344_v59 = vrot.slane %v9231_v49, %v9326_v8 }
 0x4fd   :  { %v3202_v21 = vmul.f32 %v9356_v12, %v9356_v12  ;;  %v3210_v34 = vmul.f32 %v9358_v63, %v9358_v63  ;;  %v9364_v16 = vsub.f32 %v3102_v32, %v3179_v13  ;;  %v9366_v26 = vsub.f32 %v3106_v6, %v3179_v13  ;;  %6502 = vmatprep.subr.bf16.mxu0 %v8286_v11  ;;  %v8340_v11 = vld [vmem:[#allocation11 + $0x23c] ss:$28 sps:$4 sm:$0xff]  }
 0x4ff   :  { %v3260_v0 = vsel %vm420_vm1, %v3210_v34, 0.0  ;;  %v3203_v1 = vmul.f32 %v9364_v16, %v9364_v16  ;;  %v3211_v2 = vmul.f32 %v9366_v26, %v9366_v26 }
 0x500   :  { %v3261_v3 = vadd.f32 %v3260_v0, %v3202_v21  ;;  %6503 = vmatpush1.bf16.msra.mxu0 %v8284_v61  ;;  %v3401_v61 = vrot.slane %v9233_v52, %v9326_v8 }
 0x501   :  { %v3268_v17 = vsel %vm420_vm1, %v3211_v2, 0.0  ;;  %6504 = vmatprep.subr.bf16.mxu0 %v8292_v20  ;;  %v3348_v20 = vrot.slane %v9231_v49, %v9331_v33  ;;  %v8338_v2 = vld [vmem:[#allocation11 + $0x238] ss:$28 sps:$4 sm:$0xff]   ;;  %v8344_v49 = vld [vmem:[#allocation11 + $0x200] ss:$28 sps:$4 sm:$0xff]  }
 0x502   :  { %v3262_v4 = vrot.slane %v3261_v3, 4  ;;  %v3269_v5 = vadd.f32 %v3268_v17, %v3203_v1  ;;  %v3405_v1 = vrot.slane %v9233_v52, %v9331_v33  ;;  %v8352_v52 = vld [vmem:[#allocation11 + $0x1cc] ss:$28 sps:$4 sm:$0xff]  }
 0x504   :  { %v3263_v6 = vadd.f32 %v3262_v4, %v3261_v3  ;;  %v3270_v46 = vrot.slane %v3269_v5, 4  ;;  %6505 = vmatpush1.bf16.msra.mxu0 %v8290_v25 }
 0x505   :  { %6506 = vmatprep.subr.bf16.mxu0 %v8298_v43 }
 0x506   :  { %v3264_v9 = vrot.slane %v3263_v6, 2  ;;  %v3271_v32 = vadd.f32 %v3270_v46, %v3269_v5 }
 0x508   :  { %v3265_v35 = vadd.f32 %v3264_v9, %v3263_v6  ;;  %v3272_v62 = vrot.slane %v3271_v32, 2  ;;  %6507 = vmatpush1.bf16.msra.mxu0 %v8296_v7 }
 0x509   :  { %6508 = vmatprep.subr.bf16.mxu0 %v8304_v10 }
 0x50a   :  { %v3266_v27 = vrot.slane %v3265_v35, 1  ;;  %v3273_v29 = vadd.f32 %v3272_v62, %v3271_v32 }
 0x50c   :  { %v3267_v38 = vadd.f32 %v3266_v27, %v3265_v35  ;;  %v3274_v40 = vrot.slane %v3273_v29, 1  ;;  %6509 = vmatpush1.bf16.msra.mxu0 %v8302_v36  ;;  %v8358_v27 = vld [vmem:[#allocation11 + $0x894] ss:$28 sps:$4 sm:$0xff]  }
 0x50d   :  { %6510 = vmatprep.subr.bf16.mxu0 %v8310_v37  ;;  %v8353_v37 = vld [vmem:[#allocation11 + $0x510] ss:$28 sps:$4 sm:$0xff]  }
 0x50e   :  { %v3282_v14 = vmul.f32 0.083333336, %v3267_v38  ;;  %v3275_v18 = vadd.f32 %v3274_v40, %v3273_v29  ;;  %v8356_v38 = vld [vmem:[#allocation11 + $0x890] ss:$28 sps:$4 sm:$0xff]  }
 0x510   :  { %v3290_v50 = vadd.f32 1e-05, %v3282_v14  ;;  %v3283_v45 = vmul.f32 0.083333336, %v3275_v18  ;;  %6511 = vmatpush2.bf16.msra.mxu0 %v8308_v47  ;;  %v8361_v47 = vld [vmem:[#allocation11 + $0x4dc] ss:$28 sps:$4 sm:$0xff]  }
 0x511   :  { %6512 = vmatprep.subr.bf16.mxu0 %v8316_v42  ;;  %v8364_v14 = vld [vmem:[#allocation11 + $0x85c] ss:$28 sps:$4 sm:$0xff]  }
 0x512   :  { %8777 = vrsqrt.f32 %v3290_v50  ;;  %v3291_v53 = vadd.f32 1e-05, %v3283_v45  ;;  %v8359_v18 = vld [vmem:[#allocation11 + $0x4d8] ss:$28 sps:$4 sm:$0xff]   ;;  %v8367_v50 = vld [vmem:[#allocation11 + $0x4a4] ss:$28 sps:$4 sm:$0xff]  }
 0x513   :  { %v8362_v42 = vld [vmem:[#allocation11 + $0x858] ss:$28 sps:$4 sm:$0xff]   ;;  %v8370_v45 = vld [vmem:[#allocation11 + $0x824] ss:$28 sps:$4 sm:$0xff]  }
 0x514   :  { %8779 = vrsqrt.f32 %v3291_v53  ;;  %6513 = vmatpush2.bf16.msra.mxu0 %v8314_v51  ;;  %v8365_v51 = vld [vmem:[#allocation11 + $0x4a0] ss:$28 sps:$4 sm:$0xff]  }
 0x515   :  { %6514 = vmatprep.subr.bf16.mxu0 %v8322_v54  ;;  %v8368_v53 = vld [vmem:[#allocation11 + $0x820] ss:$28 sps:$4 sm:$0xff]   ;;  %v8373_v54 = vld [vmem:[#allocation11 + $0x46c] ss:$28 sps:$4 sm:$0xff]  }
 0x518   :  { %6515 = vmatpush2.bf16.msra.mxu0 %v8320_v55  ;;  %v8376_v55 = vld [vmem:[#allocation11 + $0x7ec] ss:$28 sps:$4 sm:$0xff]  }
 0x519   :  { %6516 = vmatprep.subr.bf16.mxu0 %v8328_v56  ;;  %v8371_v56 = vld [vmem:[#allocation11 + $0x468] ss:$28 sps:$4 sm:$0xff]  }
 0x51c   :  { %6517 = vmatpush2.bf16.msra.mxu0 %v8326_v22  ;;  %v8374_v22 = vld [vmem:[#allocation11 + $0x7e8] ss:$28 sps:$4 sm:$0xff]  }
 0x51d   :  { %6518 = vmatprep.subr.bf16.mxu0 %v8334_v24  ;;  %v8379_v24 = vld [vmem:[#allocation11 + $0x434] ss:$28 sps:$4 sm:$0xff]  }
 0x51f   :  { %v8778_v13 = vpop.eup %8777 }
 0x520   :  { %v3306_v21 = vmul.f32 %v8778_v13, %v9356_v12  ;;  %v3314_v34 = vmul.f32 %v8778_v13, %v9358_v63  ;;  %6519 = vmatpush2.bf16.msra.mxu0 %v8332_v57  ;;  %v8346_v63 = vld [vmem:[#allocation11 + $0x204] ss:$28 sps:$4 sm:$0xff]   ;;  %v8382_v57 = vld [vmem:[#allocation11 + $0x7b4] ss:$28 sps:$4 sm:$0xff]   ;;  %v8385_v13 = vld [vmem:[#allocation11 + $0x3fc] ss:$28 sps:$4 sm:$0xff]  }
 0x521   :  { %v8780_v0 = vpop.eup %8779  ;;  %6520 = vmatprep.subr.bf16.mxu0 %v8340_v11  ;;  %v8380_v11 = vld [vmem:[#allocation11 + $0x7b0] ss:$28 sps:$4 sm:$0xff]  }
 0x522   :  { %v3363_v3 = vmul.f32 %v3344_v59, %v3306_v21  ;;  %v3371_v17 = vmul.f32 %v3344_v59, %v3314_v34  ;;  %v3307_v25 = vmul.f32 %v8780_v0, %v9364_v16  ;;  %v3315_v12 = vmul.f32 %v8780_v0, %v9366_v26  ;;  %v8350_v16 = vld [vmem:[#allocation11 + $0x1c8] ss:$28 sps:$4 sm:$0xff]   ;;  %v8377_v59 = vld [vmem:[#allocation11 + $0x430] ss:$28 sps:$4 sm:$0xff]   ;;  %v8388_v21 = vld [vmem:[#allocation11 + $0x77c] ss:$28 sps:$4 sm:$0xff]  }
 0x523   :  { %v8383_v34 = vld [vmem:[#allocation11 + $0x3f8] ss:$28 sps:$4 sm:$0xff]   ;;  %v8394_v0 = vld [vmem:[#allocation11 + $0x744] ss:$28 sps:$4 sm:$0xff]  }
 0x524   :  { %v3428_v4 = vadd.f32 %v3401_v61, %v3371_v17  ;;  %v3364_v5 = vmul.f32 %v3348_v20, %v3307_v25  ;;  %v3372_v43 = vmul.f32 %v3348_v20, %v3315_v12  ;;  %v3420_v6 = vadd.f32 %v3401_v61, %v3363_v3  ;;  %6521 = vmatpush2.bf16.msra.mxu0 %v8338_v2  ;;  %v8386_v61 = vld [vmem:[#allocation11 + $0x778] ss:$28 sps:$4 sm:$0xff]   ;;  %v8391_v20 = vld [vmem:[#allocation11 + $0x3c4] ss:$28 sps:$4 sm:$0xff]   ;;  %v8397_v3 = vld [vmem:[#allocation11 + $0x38c] ss:$28 sps:$4 sm:$0xff]  }
 0x525   :  { %6522 = vmatprep.subr.bf16.mxu0 %v8346_v63  ;;  %v8392_v2 = vld [vmem:[#allocation11 + $0x740] ss:$28 sps:$4 sm:$0xff]   ;;  %v8400_v17 = vld [vmem:[#allocation11 + $0x70c] ss:$28 sps:$4 sm:$0xff]   ;;  %v8403_v63 = vld [vmem:[#allocation11 + $0x6d4] ss:$28 sps:$4 sm:$0xff]  }
 0x526   :  { %v3444_v46 = vmul.f32 0.2, %v3428_v4  ;;  %v3429_v7 = vadd.f32 %v3405_v1, %v3372_v43  ;;  %v3421_v33 = vadd.f32 %v3405_v1, %v3364_v5  ;;  %v3436_v9 = vmul.f32 0.2, %v3420_v6  ;;  %v8389_v1 = vld [vmem:[#allocation11 + $0x3c0] ss:$28 sps:$4 sm:$0xff]  }
 0x527   :  { %v8395_v25 = vld [vmem:[#allocation11 + $0x388] ss:$28 sps:$4 sm:$0xff]   ;;  %v8401_v5 = vld [vmem:[#allocation11 + $0x6d0] ss:$28 sps:$4 sm:$0xff]  }
 0x528   :  { %v3445_v32 = vmul.f32 0.2, %v3429_v7  ;;  %v3437_v10 = vmul.f32 0.2, %v3421_v33  ;;  %6523 = vmatpush2.bf16.msra.mxu0 %v8344_v49  ;;  %v3452_v35 = vmax.f32 %v3420_v6, %v3436_v9  ;;  %v3460_v26 = vmax.f32 %v3428_v4, %v3444_v46  ;;  %v8398_v12 = vld [vmem:[#allocation11 + $0x708] ss:$28 sps:$4 sm:$0xff]  }
 0x529   :  { %6524 = vmatprep.subr.bf16.mxu0 %v8352_v52  ;;  %v8406_v4 = vld [vmem:[#allocation11 + $0xa54] ss:$28 sps:$4 sm:$0xff]   ;;  %v8409_v6 = vld [vmem:[#allocation11 + $0x69c] ss:$28 sps:$4 sm:$0xff]   ;;  %v8415_v52 = vld [vmem:[#allocation11 + $0x664] ss:$28 sps:$4 sm:$0xff]  }
 0x52a   :  { %v3453_v62 = vmax.f32 %v3421_v33, %v3437_v10  ;;  %v3461_v36 = vmax.f32 %v3429_v7, %v3445_v32  ;;  %v9388_v40 = vpack.c.bf16 %v3460_v26, %v3452_v35  ;;  %v8404_v43 = vld [vmem:[#allocation11 + $0xa50] ss:$28 sps:$4 sm:$0xff]   ;;  %v8412_v49 = vld [vmem:[#allocation11 + $0xa1c] ss:$28 sps:$4 sm:$0xff]   ;;  %v8418_v33 = vld [vmem:[#allocation11 + $0x9e4] ss:$28 sps:$4 sm:$0xff]  }
 0x52b   :  { %v8407_v46 = vld [vmem:[#allocation11 + $0x698] ss:$28 sps:$4 sm:$0xff]   ;;  %v8413_v9 = vld [vmem:[#allocation11 + $0x660] ss:$28 sps:$4 sm:$0xff]   ;;  %v8421_v10 = vld [vmem:[#allocation11 + $0x62c] ss:$28 sps:$4 sm:$0xff]  }
 0x52c   :  { %v9386_v29 = vpack.c.bf16 %v3461_v36, %v3453_v62  ;;  %6525 = vmatpush2.bf16.msra.mxu0 %v8350_v16  ;;  %v8410_v7 = vld [vmem:[#allocation11 + $0xa18] ss:$28 sps:$4 sm:$0xff]   ;;  %v8416_v32 = vld [vmem:[#allocation11 + $0x9e0] ss:$28 sps:$4 sm:$0xff]   ;;  %v8424_v16 = vld [vmem:[#allocation11 + $0x9ac] ss:$28 sps:$4 sm:$0xff]  }
 0x52d   :  { %6580 = vmatprep.subr.bf16.mxu0 %v8358_v27  ;;  %v8419_v35 = vld [vmem:[#allocation11 + $0x628] ss:$28 sps:$4 sm:$0xff]   ;;  %v8427_v62 = vld [vmem:[#allocation11 + $0x5f4] ss:$28 sps:$4 sm:$0xff]  }
 0x52e   :  { %6483 = vmatprep.mubr.bf16.mxu1 %v9386_v29  ;;  %v8422_v26 = vld [vmem:[#allocation11 + $0x9a8] ss:$28 sps:$4 sm:$0xff]   ;;  %v8430_v36 = vld [vmem:[#allocation11 + $0x974] ss:$28 sps:$4 sm:$0xff]  }
 0x52f   :  { %6484 = vmatmul.mubr.bf16.vlgmr.msra.gmra.mxu1 %v9388_v40  ;;  %6527 = vmatmul.mubr.bf16.vlgmr.msra.gmra.mxu0 %v9255_v48  ;;  %v8425_v27 = vld [vmem:[#allocation11 + $0x5f0] ss:$28 sps:$4 sm:$0xff]  }
 0x530   :  { %6538 = vmatpush1.bf16.msra.mxu1 %v8353_v37  ;;  %6581 = vmatpush1.bf16.msra.mxu0 %v8356_v38  ;;  %v8428_v37 = vld [vmem:[#allocation11 + $0x970] ss:$28 sps:$4 sm:$0xff]   ;;  %v8433_v38 = vld [vmem:[#allocation11 + $0x5bc] ss:$28 sps:$4 sm:$0xff]  }
 0x531   :  { %6612 = vmatprep.mubr.bf16.mxu0 %v9349_v28  ;;  %6569 = vmatprep.mubr.bf16.mxu1 %v9301_v15 }
 0x532   :  { %6539 = vmatprep.subr.bf16.mxu1 %v8361_v47  ;;  %6582 = vmatprep.subr.bf16.mxu0 %v8364_v14  ;;  %v8436_v47 = vld [vmem:[#allocation11 + $0x93c] ss:$28 sps:$4 sm:$0xff]  }
 0x533   :  { %v8431_v14 = vld [vmem:[#allocation11 + $0x5b8] ss:$28 sps:$4 sm:$0xff]  }
 0x534   :  { %6540 = vmatpush1.bf16.msra.mxu1 %v8359_v18  ;;  %6583 = vmatpush1.bf16.msra.mxu0 %v8362_v42  ;;  %v8434_v18 = vld [vmem:[#allocation11 + $0x938] ss:$28 sps:$4 sm:$0xff]   ;;  %v8439_v42 = vld [vmem:[#allocation11 + $0x584] ss:$28 sps:$4 sm:$0xff]  }
 0x535   :  { %6541 = vmatprep.subr.bf16.mxu1 %v8367_v50  ;;  %6584 = vmatprep.subr.bf16.mxu0 %v8370_v45  ;;  %v8442_v50 = vld [vmem:[#allocation11 + $0x904] ss:$28 sps:$4 sm:$0xff]  }
 0x536   :  { %v8437_v45 = vld [vmem:[#allocation11 + $0x580] ss:$28 sps:$4 sm:$0xff]  }
 0x538   :  { %6542 = vmatpush1.bf16.msra.mxu1 %v8365_v51  ;;  %6585 = vmatpush1.bf16.msra.mxu0 %v8368_v53  ;;  %v8440_v51 = vld [vmem:[#allocation11 + $0x900] ss:$28 sps:$4 sm:$0xff]   ;;  %v8445_v53 = vld [vmem:[#allocation11 + $0x54c] ss:$28 sps:$4 sm:$0xff]  }
 0x539   :  { %6543 = vmatprep.subr.bf16.mxu1 %v8373_v54  ;;  %6586 = vmatprep.subr.bf16.mxu0 %v8376_v55  ;;  %v8448_v54 = vld [vmem:[#allocation11 + $0x8cc] ss:$28 sps:$4 sm:$0xff]  }
 0x53a   :  { %v8443_v55 = vld [vmem:[#allocation11 + $0x548] ss:$28 sps:$4 sm:$0xff]  }
 0x53c   :  { %6544 = vmatpush1.bf16.msra.mxu1 %v8371_v56  ;;  %6587 = vmatpush1.bf16.msra.mxu0 %v8374_v22  ;;  %v8446_v56 = vld [vmem:[#allocation11 + $0x8c8] ss:$28 sps:$4 sm:$0xff]   ;;  %v8451_v22 = vld [vmem:[#allocation11 + $0xc14] ss:$28 sps:$4 sm:$0xff]  }
 0x53d   :  { %6545 = vmatprep.subr.bf16.mxu1 %v8379_v24  ;;  %6588 = vmatprep.subr.bf16.mxu0 %v8382_v57  ;;  %v8454_v24 = vld [vmem:[#allocation11 + $0x19c] ss:$28 sps:$4 sm:$0xff]   ;;  %v8449_v57 = vld [vmem:[#allocation11 + $0xc10] ss:$28 sps:$4 sm:$0xff]  }
 0x540   :  { %6546 = vmatpush1.bf16.msra.mxu1 %v8377_v59  ;;  %6589 = vmatpush1.bf16.msra.mxu0 %v8380_v11  ;;  %v8452_v59 = vld [vmem:[#allocation11 + $0x198] ss:$28 sps:$4 sm:$0xff]  }
 0x541   :  { %6547 = vmatprep.subr.bf16.mxu1 %v8385_v13  ;;  %6590 = vmatprep.subr.bf16.mxu0 %v8388_v21  ;;  %v8457_v11 = vld [vmem:[#allocation11 + $0xbdc] ss:$28 sps:$4 sm:$0xff]   ;;  %v8460_v13 = vld [vmem:[#allocation11 + $0x164] ss:$28 sps:$4 sm:$0xff]  }
 0x542   :  { %v8455_v21 = vld [vmem:[#allocation11 + $0xbd8] ss:$28 sps:$4 sm:$0xff]  }
 0x544   :  { %6548 = vmatpush1.bf16.msra.mxu1 %v8383_v34  ;;  %6591 = vmatpush1.bf16.msra.mxu0 %v8386_v61  ;;  %v8458_v34 = vld [vmem:[#allocation11 + $0x160] ss:$28 sps:$4 sm:$0xff]  }
 0x545   :  { %6549 = vmatprep.subr.bf16.mxu1 %v8391_v20  ;;  %6592 = vmatprep.subr.bf16.mxu0 %v8394_v0  ;;  %v8463_v61 = vld [vmem:[#allocation11 + $0xba4] ss:$28 sps:$4 sm:$0xff]   ;;  %v8466_v20 = vld [vmem:[#allocation11 + $0x12c] ss:$28 sps:$4 sm:$0xff]  }
 0x546   :  { %v8461_v0 = vld [vmem:[#allocation11 + $0xba0] ss:$28 sps:$4 sm:$0xff]  }
 0x548   :  { %6550 = vmatpush1.bf16.msra.mxu1 %v8389_v1  ;;  %6593 = vmatpush1.bf16.msra.mxu0 %v8392_v2  ;;  %v8464_v1 = vld [vmem:[#allocation11 + $0x128] ss:$28 sps:$4 sm:$0xff]  }
 0x549   :  { %6551 = vmatprep.subr.bf16.mxu1 %v8397_v3  ;;  %6594 = vmatprep.subr.bf16.mxu0 %v8400_v17  ;;  %v8469_v2 = vld [vmem:[#allocation11 + $0xb6c] ss:$28 sps:$4 sm:$0xff]   ;;  %v8472_v3 = vld [vmem:[#allocation11 + $0xf4] ss:$28 sps:$4 sm:$0xff]  }
 0x54a   :  { %v8467_v17 = vld [vmem:[#allocation11 + $0xb68] ss:$28 sps:$4 sm:$0xff]  }
 0x54c   :  { %6552 = vmatpush1.bf16.msra.mxu1 %v8395_v25  ;;  %6595 = vmatpush1.bf16.msra.mxu0 %v8398_v12  ;;  %v8470_v25 = vld [vmem:[#allocation11 + $0xf0] ss:$28 sps:$4 sm:$0xff]  }
 0x54d   :  { %6553 = vmatprep.subr.bf16.mxu1 %v8403_v63  ;;  %6596 = vmatprep.subr.bf16.mxu0 %v8406_v4  ;;  %v8475_v12 = vld [vmem:[#allocation11 + $0xb34] ss:$28 sps:$4 sm:$0xff]   ;;  %v8478_v63 = vld [vmem:[#allocation11 + $0xbc] ss:$28 sps:$4 sm:$0xff]  }
 0x54e   :  { %v8473_v4 = vld [vmem:[#allocation11 + $0xb30] ss:$28 sps:$4 sm:$0xff]  }
 0x550   :  { %6554 = vmatpush2.bf16.msra.mxu1 %v8401_v5  ;;  %6597 = vmatpush2.bf16.msra.mxu0 %v8404_v43  ;;  %v8476_v5 = vld [vmem:[#allocation11 + $0xb8] ss:$28 sps:$4 sm:$0xff]  }
 0x551   :  { %6555 = vmatprep.subr.bf16.mxu1 %v8409_v6  ;;  %6598 = vmatprep.subr.bf16.mxu0 %v8412_v49  ;;  %v8481_v43 = vld [vmem:[#allocation11 + $0xafc] ss:$28 sps:$4 sm:$0xff]   ;;  %v8484_v6 = vld [vmem:[#allocation11 + $0x84] ss:$28 sps:$4 sm:$0xff]  }
 0x552   :  { %v8479_v49 = vld [vmem:[#allocation11 + $0xaf8] ss:$28 sps:$4 sm:$0xff]  }
 0x554   :  { %6556 = vmatpush2.bf16.msra.mxu1 %v8407_v46  ;;  %6599 = vmatpush2.bf16.msra.mxu0 %v8410_v7  ;;  %v8482_v46 = vld [vmem:[#allocation11 + $0x80] ss:$28 sps:$4 sm:$0xff]  }
 0x555   :  { %6557 = vmatprep.subr.bf16.mxu1 %v8415_v52  ;;  %6600 = vmatprep.subr.bf16.mxu0 %v8418_v33  ;;  %v8487_v7 = vld [vmem:[#allocation11 + $0xac4] ss:$28 sps:$4 sm:$0xff]   ;;  %v8490_v52 = vld [vmem:[#allocation11 + $0x4c] ss:$28 sps:$4 sm:$0xff]  }
 0x556   :  { %v8485_v33 = vld [vmem:[#allocation11 + $0xac0] ss:$28 sps:$4 sm:$0xff]  }
 0x558   :  { %6558 = vmatpush2.bf16.msra.mxu1 %v8413_v9  ;;  %6601 = vmatpush2.bf16.msra.mxu0 %v8416_v32  ;;  %v8488_v9 = vld [vmem:[#allocation11 + $0x48] ss:$28 sps:$4 sm:$0xff]  }
 0x559   :  { %6559 = vmatprep.subr.bf16.mxu1 %v8421_v10  ;;  %6602 = vmatprep.subr.bf16.mxu0 %v8424_v16  ;;  %v8493_v32 = vld [vmem:[#allocation11 + $0xa8c] ss:$28 sps:$4 sm:$0xff]   ;;  %v8496_v10 = vld [vmem:[#allocation11 + $0x14] ss:$28 sps:$4 sm:$0xff]  }
 0x55a   :  { %v8491_v16 = vld [vmem:[#allocation11 + $0xa88] ss:$28 sps:$4 sm:$0xff]  }
 0x55c   :  { %6560 = vmatpush2.bf16.msra.mxu1 %v8419_v35  ;;  %6603 = vmatpush2.bf16.msra.mxu0 %v8422_v26  ;;  %v8494_v35 = vld [vmem:[#allocation11 + $0x10] ss:$28 sps:$4 sm:$0xff]  }
 0x55d   :  { %6561 = vmatprep.subr.bf16.mxu1 %v8427_v62  ;;  %6604 = vmatprep.subr.bf16.mxu0 %v8430_v36  ;;  %v8499_v26 = vld [vmem:[#allocation11 + $0xdd4] ss:$28 sps:$4 sm:$0xff]   ;;  %v8502_v62 = vld [vmem:[#allocation11 + $0x35c] ss:$28 sps:$4 sm:$0xff]  }
 0x55e   :  { %v8497_v36 = vld [vmem:[#allocation11 + $0xdd0] ss:$28 sps:$4 sm:$0xff]  }
 0x560   :  { %6562 = vmatpush2.bf16.msra.mxu1 %v8425_v27  ;;  %6605 = vmatpush2.bf16.msra.mxu0 %v8428_v37  ;;  %v8500_v27 = vld [vmem:[#allocation11 + $0x358] ss:$28 sps:$4 sm:$0xff]  }
 0x561   :  { %6563 = vmatprep.subr.bf16.mxu1 %v8433_v38  ;;  %6606 = vmatprep.subr.bf16.mxu0 %v8436_v47  ;;  %v8505_v37 = vld [vmem:[#allocation11 + $0xd9c] ss:$28 sps:$4 sm:$0xff]   ;;  %v8508_v38 = vld [vmem:[#allocation11 + $0x324] ss:$28 sps:$4 sm:$0xff]  }
 0x562   :  { %v8503_v47 = vld [vmem:[#allocation11 + $0xd98] ss:$28 sps:$4 sm:$0xff]  }
 0x564   :  { %6564 = vmatpush2.bf16.msra.mxu1 %v8431_v14  ;;  %6607 = vmatpush2.bf16.msra.mxu0 %v8434_v18  ;;  %v8506_v14 = vld [vmem:[#allocation11 + $0x320] ss:$28 sps:$4 sm:$0xff]  }
 0x565   :  { %6565 = vmatprep.subr.bf16.mxu1 %v8439_v42  ;;  %6608 = vmatprep.subr.bf16.mxu0 %v8442_v50  ;;  %v8511_v18 = vld [vmem:[#allocation11 + $0xd64] ss:$28 sps:$4 sm:$0xff]   ;;  %v8514_v42 = vld [vmem:[#allocation11 + $0x2ec] ss:$28 sps:$4 sm:$0xff]  }
 0x566   :  { %v8509_v50 = vld [vmem:[#allocation11 + $0xd60] ss:$28 sps:$4 sm:$0xff]  }
 0x568   :  { %6566 = vmatpush2.bf16.msra.mxu1 %v8437_v45  ;;  %6609 = vmatpush2.bf16.msra.mxu0 %v8440_v51  ;;  %v8512_v45 = vld [vmem:[#allocation11 + $0x2e8] ss:$28 sps:$4 sm:$0xff]  }
 0x569   :  { %6567 = vmatprep.subr.bf16.mxu1 %v8445_v53  ;;  %6610 = vmatprep.subr.bf16.mxu0 %v8448_v54  ;;  %v8517_v51 = vld [vmem:[#allocation11 + $0xd2c] ss:$28 sps:$4 sm:$0xff]   ;;  %v8520_v53 = vld [vmem:[#allocation11 + $0x2b4] ss:$28 sps:$4 sm:$0xff]  }
 0x56a   :  { %v8515_v54 = vld [vmem:[#allocation11 + $0xd28] ss:$28 sps:$4 sm:$0xff]  }
 0x56c   :  { %6568 = vmatpush2.bf16.msra.mxu1 %v8443_v55  ;;  %6611 = vmatpush2.bf16.msra.mxu0 %v8446_v56  ;;  %v8518_v55 = vld [vmem:[#allocation11 + $0x2b0] ss:$28 sps:$4 sm:$0xff]  }
 0x56d   :  { %6623 = vmatprep.subr.bf16.mxu1 %v8451_v22  ;;  %6666 = vmatprep.subr.bf16.mxu0 %v8454_v24  ;;  %v8523_v56 = vld [vmem:[#allocation11 + $0xcf4] ss:$28 sps:$4 sm:$0xff]   ;;  %v8526_v22 = vld [vmem:[#allocation11 + $0x27c] ss:$28 sps:$4 sm:$0xff]  }
 0x56e   :  { %v8521_v24 = vld [vmem:[#allocation11 + $0xcf0] ss:$28 sps:$4 sm:$0xff]  }
 0x56f   :  { %6570 = vmatmul.mubr.bf16.vlgmr.msra.gmra.mxu1 %v9303_v60  ;;  %6613 = vmatmul.mubr.bf16.vlgmr.msra.gmra.mxu0 %v9351_v30 }
 0x570   :  { %6624 = vmatpush1.bf16.msra.mxu1 %v8449_v57  ;;  %6655 = vmatprep.mubr.bf16.mxu1 %v9386_v29  ;;  %v8524_v57 = vld [vmem:[#allocation11 + $0x278] ss:$28 sps:$4 sm:$0xff]  }
 0x571   :  { %6667 = vmatpush1.bf16.msra.mxu0 %v8452_v59  ;;  %6698 = vmatprep.mubr.bf16.mxu0 %v9253_v39  ;;  %v8529_v59 = vld [vmem:[#allocation11 + $0xcbc] ss:$28 sps:$4 sm:$0xff]  }
 0x572   :  { %6625 = vmatprep.subr.bf16.mxu1 %v8457_v11  ;;  %6668 = vmatprep.subr.bf16.mxu0 %v8460_v13  ;;  %v8532_v11 = vld [vmem:[#allocation11 + $0x244] ss:$28 sps:$4 sm:$0xff]   ;;  %v8527_v13 = vld [vmem:[#allocation11 + $0xcb8] ss:$28 sps:$4 sm:$0xff]  }
 0x574   :  { %6626 = vmatpush1.bf16.msra.mxu1 %v8455_v21  ;;  %v8530_v21 = vld [vmem:[#allocation11 + $0x240] ss:$28 sps:$4 sm:$0xff]  }
 0x575   :  { %6669 = vmatpush1.bf16.msra.mxu0 %v8458_v34  ;;  %6627 = vmatprep.subr.bf16.mxu1 %v8463_v61  ;;  %v8535_v34 = vld [vmem:[#allocation11 + $0xc84] ss:$28 sps:$4 sm:$0xff]   ;;  %v8538_v61 = vld [vmem:[#allocation11 + $0x20c] ss:$28 sps:$4 sm:$0xff]  }
 0x576   :  { %6670 = vmatprep.subr.bf16.mxu0 %v8466_v20  ;;  %v8533_v20 = vld [vmem:[#allocation11 + $0xc80] ss:$28 sps:$4 sm:$0xff]  }
 0x578   :  { %6628 = vmatpush1.bf16.msra.mxu1 %v8461_v0  ;;  %v8536_v0 = vld [vmem:[#allocation11 + $0x208] ss:$28 sps:$4 sm:$0xff]  }
 0x579   :  { %6671 = vmatpush1.bf16.msra.mxu0 %v8464_v1  ;;  %6629 = vmatprep.subr.bf16.mxu1 %v8469_v2  ;;  %v8541_v1 = vld [vmem:[#allocation11 + $0xc4c] ss:$28 sps:$4 sm:$0xff]   ;;  %v8544_v2 = vld [vmem:[#allocation11 + $0x1d4] ss:$28 sps:$4 sm:$0xff]  }
 0x57a   :  { %6672 = vmatprep.subr.bf16.mxu0 %v8472_v3  ;;  %v8539_v3 = vld [vmem:[#allocation11 + $0xc48] ss:$28 sps:$4 sm:$0xff]  }
 0x57c   :  { %6630 = vmatpush1.bf16.msra.mxu1 %v8467_v17  ;;  %v8542_v17 = vld [vmem:[#allocation11 + $0x1d0] ss:$28 sps:$4 sm:$0xff]  }
 0x57d   :  { %6673 = vmatpush1.bf16.msra.mxu0 %v8470_v25  ;;  %6631 = vmatprep.subr.bf16.mxu1 %v8475_v12  ;;  %v8547_v25 = vld [vmem:[#allocation11 + $0x51c] ss:$28 sps:$4 sm:$0xff]  }
 0x57e   :  { %6674 = vmatprep.subr.bf16.mxu0 %v8478_v63  ;;  %v8550_v12 = vld [vmem:[#allocation11 + $0x89c] ss:$28 sps:$4 sm:$0xff]  }
 0x57f   :  { %v8545_v63 = vld [vmem:[#allocation11 + $0x518] ss:$28 sps:$4 sm:$0xff]  }
 0x580   :  { %6632 = vmatpush1.bf16.msra.mxu1 %v8473_v4  ;;  %v8548_v4 = vld [vmem:[#allocation11 + $0x898] ss:$28 sps:$4 sm:$0xff]  }
 0x581   :  { %6675 = vmatpush1.bf16.msra.mxu0 %v8476_v5  ;;  %6633 = vmatprep.subr.bf16.mxu1 %v8481_v43  ;;  %v8553_v5 = vld [vmem:[#allocation11 + $0x4e4] ss:$28 sps:$4 sm:$0xff]  }
 0x582   :  { %6676 = vmatprep.subr.bf16.mxu0 %v8484_v6  ;;  %v8556_v43 = vld [vmem:[#allocation11 + $0x864] ss:$28 sps:$4 sm:$0xff]  }
 0x583   :  { %v8551_v6 = vld [vmem:[#allocation11 + $0x4e0] ss:$28 sps:$4 sm:$0xff]  }
 0x584   :  { %6634 = vmatpush1.bf16.msra.mxu1 %v8479_v49  ;;  %v8554_v49 = vld [vmem:[#allocation11 + $0x860] ss:$28 sps:$4 sm:$0xff]  }
 0x585   :  { %6677 = vmatpush1.bf16.msra.mxu0 %v8482_v46  ;;  %6635 = vmatprep.subr.bf16.mxu1 %v8487_v7  ;;  %v8559_v46 = vld [vmem:[#allocation11 + $0x4ac] ss:$28 sps:$4 sm:$0xff]  }
 0x586   :  { %6678 = vmatprep.subr.bf16.mxu0 %v8490_v52  ;;  %v8562_v7 = vld [vmem:[#allocation11 + $0x82c] ss:$28 sps:$4 sm:$0xff]  }
 0x587   :  { %v8557_v52 = vld [vmem:[#allocation11 + $0x4a8] ss:$28 sps:$4 sm:$0xff]  }
 0x588   :  { %6636 = vmatpush1.bf16.msra.mxu1 %v8485_v33  ;;  %v8560_v33 = vld [vmem:[#allocation11 + $0x828] ss:$28 sps:$4 sm:$0xff]  }
 0x589   :  { %6679 = vmatpush1.bf16.msra.mxu0 %v8488_v9  ;;  %6637 = vmatprep.subr.bf16.mxu1 %v8493_v32  ;;  %v8565_v9 = vld [vmem:[#allocation11 + $0x474] ss:$28 sps:$4 sm:$0xff]  }
 0x58a   :  { %6680 = vmatprep.subr.bf16.mxu0 %v8496_v10  ;;  %v8568_v32 = vld [vmem:[#allocation11 + $0x7f4] ss:$28 sps:$4 sm:$0xff]  }
 0x58b   :  { %v8563_v10 = vld [vmem:[#allocation11 + $0x470] ss:$28 sps:$4 sm:$0xff]  }
 0x58c   :  { %6638 = vmatpush1.bf16.msra.mxu1 %v8491_v16  ;;  %v8566_v16 = vld [vmem:[#allocation11 + $0x7f0] ss:$28 sps:$4 sm:$0xff]  }
 0x58d   :  { %6681 = vmatpush1.bf16.msra.mxu0 %v8494_v35  ;;  %6639 = vmatprep.subr.bf16.mxu1 %v8499_v26  ;;  %v8571_v35 = vld [vmem:[#allocation11 + $0x43c] ss:$28 sps:$4 sm:$0xff]  }
 0x58e   :  { %6682 = vmatprep.subr.bf16.mxu0 %v8502_v62  ;;  %v8574_v26 = vld [vmem:[#allocation11 + $0x7bc] ss:$28 sps:$4 sm:$0xff]  }
 0x58f   :  { %v8569_v62 = vld [vmem:[#allocation11 + $0x438] ss:$28 sps:$4 sm:$0xff]  }
 0x590   :  { %6640 = vmatpush2.bf16.msra.mxu1 %v8497_v36  ;;  %v8572_v36 = vld [vmem:[#allocation11 + $0x7b8] ss:$28 sps:$4 sm:$0xff]  }
 0x591   :  { %6683 = vmatpush2.bf16.msra.mxu0 %v8500_v27  ;;  %6641 = vmatprep.subr.bf16.mxu1 %v8505_v37  ;;  %v8577_v27 = vld [vmem:[#allocation11 + $0x404] ss:$28 sps:$4 sm:$0xff]  }
 0x592   :  { %6684 = vmatprep.subr.bf16.mxu0 %v8508_v38  ;;  %v8580_v37 = vld [vmem:[#allocation11 + $0x784] ss:$28 sps:$4 sm:$0xff]  }
 0x593   :  { %v8575_v38 = vld [vmem:[#allocation11 + $0x400] ss:$28 sps:$4 sm:$0xff]  }
 0x594   :  { %6642 = vmatpush2.bf16.msra.mxu1 %v8503_v47  ;;  %v8578_v47 = vld [vmem:[#allocation11 + $0x780] ss:$28 sps:$4 sm:$0xff]  }
 0x595   :  { %6685 = vmatpush2.bf16.msra.mxu0 %v8506_v14  ;;  %6643 = vmatprep.subr.bf16.mxu1 %v8511_v18  ;;  %v8583_v14 = vld [vmem:[#allocation11 + $0x3cc] ss:$28 sps:$4 sm:$0xff]  }
 0x596   :  { %6686 = vmatprep.subr.bf16.mxu0 %v8514_v42  ;;  %v8586_v18 = vld [vmem:[#allocation11 + $0x74c] ss:$28 sps:$4 sm:$0xff]  }
 0x597   :  { %v8581_v42 = vld [vmem:[#allocation11 + $0x3c8] ss:$28 sps:$4 sm:$0xff]  }
 0x598   :  { %6644 = vmatpush2.bf16.msra.mxu1 %v8509_v50  ;;  %v8584_v50 = vld [vmem:[#allocation11 + $0x748] ss:$28 sps:$4 sm:$0xff]  }
 0x599   :  { %6687 = vmatpush2.bf16.msra.mxu0 %v8512_v45  ;;  %6645 = vmatprep.subr.bf16.mxu1 %v8517_v51  ;;  %v8589_v45 = vld [vmem:[#allocation11 + $0x394] ss:$28 sps:$4 sm:$0xff]  }
 0x59a   :  { %6688 = vmatprep.subr.bf16.mxu0 %v8520_v53  ;;  %v8592_v51 = vld [vmem:[#allocation11 + $0x714] ss:$28 sps:$4 sm:$0xff]  }
 0x59b   :  { %v8587_v53 = vld [vmem:[#allocation11 + $0x390] ss:$28 sps:$4 sm:$0xff]  }
 0x59c   :  { %6646 = vmatpush2.bf16.msra.mxu1 %v8515_v54  ;;  %v8590_v54 = vld [vmem:[#allocation11 + $0x710] ss:$28 sps:$4 sm:$0xff]  }
 0x59d   :  { %6689 = vmatpush2.bf16.msra.mxu0 %v8518_v55  ;;  %6647 = vmatprep.subr.bf16.mxu1 %v8523_v56  ;;  %v8595_v55 = vld [vmem:[#allocation11 + $0x6dc] ss:$28 sps:$4 sm:$0xff]  }
 0x59e   :  { %6690 = vmatprep.subr.bf16.mxu0 %v8526_v22  ;;  %v8598_v56 = vld [vmem:[#allocation11 + $0xa5c] ss:$28 sps:$4 sm:$0xff]  }
 0x59f   :  { %v8593_v22 = vld [vmem:[#allocation11 + $0x6d8] ss:$28 sps:$4 sm:$0xff]  }
 0x5a0   :  { %6648 = vmatpush2.bf16.msra.mxu1 %v8521_v24  ;;  %v8596_v24 = vld [vmem:[#allocation11 + $0xa58] ss:$28 sps:$4 sm:$0xff]  }
 0x5a1   :  { %6691 = vmatpush2.bf16.msra.mxu0 %v8524_v57  ;;  %6649 = vmatprep.subr.bf16.mxu1 %v8529_v59  ;;  %v8601_v57 = vld [vmem:[#allocation11 + $0x6a4] ss:$28 sps:$4 sm:$0xff]  }
 0x5a2   :  { %6692 = vmatprep.subr.bf16.mxu0 %v8532_v11  ;;  %v8604_v59 = vld [vmem:[#allocation11 + $0xa24] ss:$28 sps:$4 sm:$0xff]  }
 0x5a3   :  { %v8599_v11 = vld [vmem:[#allocation11 + $0x6a0] ss:$28 sps:$4 sm:$0xff]  }
 0x5a4   :  { %6650 = vmatpush2.bf16.msra.mxu1 %v8527_v13  ;;  %v8602_v13 = vld [vmem:[#allocation11 + $0xa20] ss:$28 sps:$4 sm:$0xff]  }
 0x5a5   :  { %6693 = vmatpush2.bf16.msra.mxu0 %v8530_v21  ;;  %6651 = vmatprep.subr.bf16.mxu1 %v8535_v34  ;;  %v8607_v21 = vld [vmem:[#allocation11 + $0x66c] ss:$28 sps:$4 sm:$0xff]  }
 0x5a6   :  { %6694 = vmatprep.subr.bf16.mxu0 %v8538_v61  ;;  %v8610_v34 = vld [vmem:[#allocation11 + $0x9ec] ss:$28 sps:$4 sm:$0xff]  }
 0x5a7   :  { %v8605_v61 = vld [vmem:[#allocation11 + $0x668] ss:$28 sps:$4 sm:$0xff]  }
 0x5a8   :  { %6652 = vmatpush2.bf16.msra.mxu1 %v8533_v20  ;;  %v8608_v20 = vld [vmem:[#allocation11 + $0x9e8] ss:$28 sps:$4 sm:$0xff]  }
 0x5a9   :  { %6695 = vmatpush2.bf16.msra.mxu0 %v8536_v0  ;;  %6653 = vmatprep.subr.bf16.mxu1 %v8541_v1  ;;  %v8613_v0 = vld [vmem:[#allocation11 + $0x634] ss:$28 sps:$4 sm:$0xff]  }
 0x5aa   :  { %6696 = vmatprep.subr.bf16.mxu0 %v8544_v2  ;;  %v8616_v1 = vld [vmem:[#allocation11 + $0x9b4] ss:$28 sps:$4 sm:$0xff]   ;;  %v6356_v2 = vpop.f32.mrf.mxu0 }
 0x5ac   :  { %6654 = vmatpush2.bf16.msra.mxu1 %v8539_v3  ;;  %v8611_v3 = vld [vmem:[#allocation11 + $0x630] ss:$28 sps:$4 sm:$0xff]  }
 0x5ad   :  { %6697 = vmatpush2.bf16.msra.mxu0 %v8542_v17  ;;  %6709 = vmatprep.subr.bf16.mxu1 %v8547_v25  ;;  %v8614_v17 = vld [vmem:[#allocation11 + $0x9b0] ss:$28 sps:$4 sm:$0xff]   ;;  %v8619_v25 = vld [vmem:[#allocation11 + $0x5fc] ss:$28 sps:$4 sm:$0xff]  }
 0x5ae   :  { %6752 = vmatprep.subr.bf16.mxu0 %v8550_v12  ;;  %v8622_v12 = vld [vmem:[#allocation11 + $0x97c] ss:$28 sps:$4 sm:$0xff]  }
 0x5af   :  { %6656 = vmatmul.mubr.bf16.vlgmr.msra.gmra.mxu1 %v9388_v40 }
 0x5b0   :  { %6699 = vmatmul.mubr.bf16.vlgmr.msra.gmra.mxu0 %v9255_v48  ;;  %6710 = vmatpush1.bf16.msra.mxu1 %v8545_v63  ;;  %v6358_v63 = vpop.f32.mrf.mxu0 }
 0x5b1   :  { %6741 = vmatprep.mubr.bf16.mxu1 %v9301_v15  ;;  %6753 = vmatpush1.bf16.msra.mxu0 %v8548_v4  ;;  %v8617_v4 = vld [vmem:[#allocation11 + $0x5f8] ss:$28 sps:$4 sm:$0xff]  }
 0x5b2   :  { %6784 = vmatprep.mubr.bf16.mxu0 %v9349_v28  ;;  %6711 = vmatprep.subr.bf16.mxu1 %v8553_v5  ;;  %v8620_v5 = vld [vmem:[#allocation11 + $0x978] ss:$28 sps:$4 sm:$0xff]  }
 0x5b3   :  { %6754 = vmatprep.subr.bf16.mxu0 %v8556_v43  ;;  %v8625_v43 = vld [vmem:[#allocation11 + $0x5c4] ss:$28 sps:$4 sm:$0xff]  }
 0x5b4   :  { %6712 = vmatpush1.bf16.msra.mxu1 %v8551_v6  ;;  %v8628_v6 = vld [vmem:[#allocation11 + $0x944] ss:$28 sps:$4 sm:$0xff]  }
 0x5b5   :  { %6755 = vmatpush1.bf16.msra.mxu0 %v8554_v49  ;;  %6713 = vmatprep.subr.bf16.mxu1 %v8559_v46  ;;  %v149_v49 = vld [vmem:[#allocation13 + $0x42] ss:$8 sm:$0xf] }
 0x5b6   :  { %6756 = vmatprep.subr.bf16.mxu0 %v8562_v7  ;;  %v150_v46 = vld [vmem:[#allocation13 + $0x42] ss:$8 sm:$0xf0]  ;;  %v6360_v7 = vpop.f32.mrf.mxu0 }
 0x5b8   :  { %6714 = vmatpush1.bf16.msra.mxu1 %v8557_v52  ;;  %v8623_v52 = vld [vmem:[#allocation11 + $0x5c0] ss:$28 sps:$4 sm:$0xff]  }
 0x5b9   :  { %6757 = vmatpush1.bf16.msra.mxu0 %v8560_v33  ;;  %6715 = vmatprep.subr.bf16.mxu1 %v8565_v9  ;;  %v6399_v33 = vpop.f32.mrf.mxu1  ;;  %v8626_v9 = vld [vmem:[#allocation11 + $0x940] ss:$28 sps:$4 sm:$0xff]  }
 0x5ba   :  { %6758 = vmatprep.subr.bf16.mxu0 %v8568_v32  ;;  %v8631_v32 = vld [vmem:[#allocation11 + $0x58c] ss:$28 sps:$4 sm:$0xff]  }
 0x5bc   :  { %6716 = vmatpush1.bf16.msra.mxu1 %v8563_v10  ;;  %v9403_v10 = vor.u32 %v150_v46, %v149_v49 }
 0x5bd   :  { %6759 = vmatpush1.bf16.msra.mxu0 %v8566_v16  ;;  %6717 = vmatprep.subr.bf16.mxu1 %v8571_v35  ;;  %v8634_v16 = vld [vmem:[#allocation11 + $0x90c] ss:$28 sps:$4 sm:$0xff]   ;;  %v6362_v35 = vpop.f32.mrf.mxu0 }
 0x5be   :  { %6760 = vmatprep.subr.bf16.mxu0 %v8574_v26  ;;  %v8629_v26 = vld [vmem:[#allocation11 + $0x588] ss:$28 sps:$4 sm:$0xff]  }
 0x5c0   :  { %6718 = vmatpush1.bf16.msra.mxu1 %v8569_v62  ;;  %v6401_v62 = vpop.f32.mrf.mxu1 }
 0x5c1   :  { %6761 = vmatpush1.bf16.msra.mxu0 %v8572_v36  ;;  %6719 = vmatprep.subr.bf16.mxu1 %v8577_v27  ;;  %v6442_v36 = vpop.f32.mrf.mxu0  ;;  %v8632_v27 = vld [vmem:[#allocation11 + $0x908] ss:$28 sps:$4 sm:$0xff]  }
 0x5c2   :  { %6762 = vmatprep.subr.bf16.mxu0 %v8580_v37  ;;  %v8637_v37 = vld [vmem:[#allocation11 + $0x554] ss:$28 sps:$4 sm:$0xff]  }
 0x5c4   :  { %6720 = vmatpush1.bf16.msra.mxu1 %v8575_v38  ;;  %v3986_v38 = vrot.slane %v9403_v10, %v9074_v41  ;;  %v8641_v41 = vld [vmem:[#allocation11 + $0xc18] ss:$28 sps:$4 sm:$0xff]  }
 0x5c5   :  { %6763 = vmatpush1.bf16.msra.mxu0 %v8578_v47  ;;  %6721 = vmatprep.subr.bf16.mxu1 %v8583_v14  ;;  %v8640_v47 = vld [vmem:[#allocation11 + $0x8d4] ss:$28 sps:$4 sm:$0xff]   ;;  %v3990_v14 = vrot.slane %v9403_v10, %v9077_v44  ;;  %v8645_v44 = vld [vmem:[#allocation11 + $0x1a0] ss:$28 sps:$4 sm:$0xff]  }
 0x5c6   :  { %6764 = vmatprep.subr.bf16.mxu0 %v8586_v18  ;;  %v8635_v18 = vld [vmem:[#allocation11 + $0x550] ss:$28 sps:$4 sm:$0xff]  }
 0x5c8   :  { %6722 = vmatpush1.bf16.msra.mxu1 %v8581_v42  ;;  %v6403_v42 = vpop.f32.mrf.mxu1 }
 0x5c9   :  { %6765 = vmatpush1.bf16.msra.mxu0 %v8584_v50  ;;  %6723 = vmatprep.subr.bf16.mxu1 %v8589_v45  ;;  %v6444_v50 = vpop.f32.mrf.mxu0  ;;  %v8638_v45 = vld [vmem:[#allocation11 + $0x8d0] ss:$28 sps:$4 sm:$0xff]  }
 0x5ca   :  { %6766 = vmatprep.subr.bf16.mxu0 %v8592_v51  ;;  %v8643_v51 = vld [vmem:[#allocation11 + $0xc1c] ss:$28 sps:$4 sm:$0xff]  }
 0x5cc   :  { %6724 = vmatpush1.bf16.msra.mxu1 %v8587_v53  ;;  %v6357_v53 = vadd.f32 %v6356_v2, %v3986_v38  ;;  %v8646_v2 = vld [vmem:[#allocation11 + $0xbe0] ss:$28 sps:$4 sm:$0xff]  }
 0x5cd   :  { %6767 = vmatpush1.bf16.msra.mxu0 %v8590_v54  ;;  %6725 = vmatprep.subr.bf16.mxu1 %v8595_v55  ;;  %v8644_v54 = vld [vmem:[#allocation11 + $0x360] ss:$28 sps:$4 sm:$0xff]   ;;  %v6359_v55 = vadd.f32 %v6358_v63, %v3990_v14 }
 0x5ce   :  { %6768 = vmatprep.subr.bf16.mxu0 %v8598_v56  ;;  %v6400_v56 = vadd.f32 %v6399_v33, %v6357_v53  ;;  %v8655_v33 = vld [vmem:[#allocation11 + $0x130] ss:$28 sps:$4 sm:$0xff]   ;;  %v8671_v53 = vld [vmem:[#allocation11 + $0xac8] ss:$28 sps:$4 sm:$0xff]  }
 0x5d0   :  { %6726 = vmatpush2.bf16.msra.mxu1 %v8593_v22  ;;  %v6405_v22 = vpop.f32.mrf.mxu1 }
 0x5d1   :  { %6769 = vmatpush2.bf16.msra.mxu0 %v8596_v24  ;;  %6727 = vmatprep.subr.bf16.mxu1 %v8601_v57  ;;  %v6446_v24 = vpop.f32.mrf.mxu0  ;;  %v6361_v57 = vadd.f32 %v6360_v7, %v3986_v38  ;;  %v8651_v7 = vld [vmem:[#allocation11 + $0xba8] ss:$28 sps:$4 sm:$0xff]  }
 0x5d2   :  { %6770 = vmatprep.subr.bf16.mxu0 %v8604_v59  ;;  %v6402_v59 = vadd.f32 %v6401_v62, %v6359_v55  ;;  %v8664_v62 = vld [vmem:[#allocation11 + $0x280] ss:$28 sps:$4 sm:$0xff]   ;;  %v8669_v38 = vld [vmem:[#allocation11 + $0x248] ss:$28 sps:$4 sm:$0xff]   ;;  %v8675_v55 = vld [vmem:[#allocation11 + $0x50] ss:$28 sps:$4 sm:$0xff]  }
 0x5d4   :  { %6728 = vmatpush2.bf16.msra.mxu1 %v8599_v11  ;;  %v6443_v11 = vadd.f32 %v6442_v36, %v6400_v56  ;;  %v8661_v36 = vld [vmem:[#allocation11 + $0xb38] ss:$28 sps:$4 sm:$0xff]  }
 0x5d5   :  { %6771 = vmatpush2.bf16.msra.mxu0 %v8602_v13  ;;  %6729 = vmatprep.subr.bf16.mxu1 %v8607_v21  ;;  %v8648_v13 = vld [vmem:[#allocation11 + $0xbe4] ss:$28 sps:$4 sm:$0xff]   ;;  %v6363_v21 = vadd.f32 %v6362_v35, %v3990_v14  ;;  %v8660_v35 = vld [vmem:[#allocation11 + $0xf8] ss:$28 sps:$4 sm:$0xff]  }
 0x5d6   :  { %6772 = vmatprep.subr.bf16.mxu0 %v8610_v34  ;;  %v8666_v14 = vld [vmem:[#allocation11 + $0xb00] ss:$28 sps:$4 sm:$0xff]   ;;  %v8678_v56 = vld [vmem:[#allocation11 + $0xa94] ss:$28 sps:$4 sm:$0xff]  }
 0x5d7   :  { %v6406_v63 = vadd.f32 %v6405_v22, %v6363_v21  ;;  %v8676_v22 = vld [vmem:[#allocation11 + $0xa90] ss:$28 sps:$4 sm:$0xff]   ;;  %v8689_v21 = vld [vmem:[#allocation11 + $0xa28] ss:$28 sps:$4 sm:$0xff]  }
 0x5d8   :  { %6730 = vmatpush2.bf16.msra.mxu1 %v8605_v61  ;;  %v8649_v61 = vld [vmem:[#allocation11 + $0x328] ss:$28 sps:$4 sm:$0xff]  }
 0x5d9   :  { %6773 = vmatpush2.bf16.msra.mxu0 %v8608_v20  ;;  %6731 = vmatprep.subr.bf16.mxu1 %v8613_v0  ;;  %v6404_v20 = vadd.f32 %v6403_v42, %v6361_v57  ;;  %v6445_v0 = vadd.f32 %v6444_v50, %v6402_v59  ;;  %v8670_v42 = vld [vmem:[#allocation11 + $0x88] ss:$28 sps:$4 sm:$0xff]   ;;  %v8684_v57 = vld [vmem:[#allocation11 + $0xa60] ss:$28 sps:$4 sm:$0xff]   ;;  %v8681_v59 = vld [vmem:[#allocation11 + $0xdd8] ss:$28 sps:$4 sm:$0xff]  }
 0x5da   :  { %6774 = vmatprep.subr.bf16.mxu0 %v8616_v1  ;;  %v8673_v50 = vld [vmem:[#allocation11 + $0xacc] ss:$28 sps:$4 sm:$0xff]  }
 0x5dc   :  { %6732 = vmatpush2.bf16.msra.mxu1 %v8611_v3  ;;  %v6448_v3 = vpop.f32.mrf.mxu0 }
 0x5dd   :  { %6775 = vmatpush2.bf16.msra.mxu0 %v8614_v17  ;;  %6733 = vmatprep.subr.bf16.mxu1 %v8619_v25  ;;  %v8650_v25 = vld [vmem:[#allocation11 + $0x168] ss:$28 sps:$4 sm:$0xff]   ;;  %v6449_v49 = vadd.f32 %v6448_v3, %v6406_v63  ;;  %v8698_v3 = vld [vmem:[#allocation11 + $0xd34] ss:$28 sps:$4 sm:$0xff]  }
 0x5de   :  { %6776 = vmatprep.subr.bf16.mxu0 %v8622_v12  ;;  %v8653_v12 = vld [vmem:[#allocation11 + $0xbac] ss:$28 sps:$4 sm:$0xff]   ;;  %v8701_v63 = vld [vmem:[#allocation11 + $0xcf8] ss:$28 sps:$4 sm:$0xff]  }
 0x5e0   :  { %6734 = vmatpush2.bf16.msra.mxu1 %v8617_v4  ;;  %v6447_v4 = vadd.f32 %v6446_v24, %v6404_v20  ;;  %v8680_v24 = vld [vmem:[#allocation11 + $0x18] ss:$28 sps:$4 sm:$0xff]   ;;  %v8693_v20 = vld [vmem:[#allocation11 + $0xd6c] ss:$28 sps:$4 sm:$0xff]  }
 0x5e1   :  { %6777 = vmatpush2.bf16.msra.mxu0 %v8620_v5  ;;  %6735 = vmatprep.subr.bf16.mxu1 %v8625_v43  ;;  %v8654_v43 = vld [vmem:[#allocation11 + $0x2f0] ss:$28 sps:$4 sm:$0xff]  }
 0x5e2   :  { %6778 = vmatprep.subr.bf16.mxu0 %v8628_v6 }
 0x5e4   :  { %6736 = vmatpush2.bf16.msra.mxu1 %v8623_v52 }
 0x5e5   :  { %6779 = vmatpush2.bf16.msra.mxu0 %v8626_v9  ;;  %6737 = vmatprep.subr.bf16.mxu1 %v8631_v32  ;;  %v8658_v9 = vld [vmem:[#allocation11 + $0xb74] ss:$28 sps:$4 sm:$0xff]  }
 0x5e6   :  { %6780 = vmatprep.subr.bf16.mxu0 %v8634_v16  ;;  %v8659_v16 = vld [vmem:[#allocation11 + $0x2b8] ss:$28 sps:$4 sm:$0xff]  }
 0x5e8   :  { %6738 = vmatpush2.bf16.msra.mxu1 %v8629_v26  ;;  %v8663_v26 = vld [vmem:[#allocation11 + $0xb3c] ss:$28 sps:$4 sm:$0xff]  }
 0x5e9   :  { %6781 = vmatpush2.bf16.msra.mxu0 %v8632_v27  ;;  %6739 = vmatprep.subr.bf16.mxu1 %v8637_v37  ;;  %v8665_v27 = vld [vmem:[#allocation11 + $0xc0] ss:$28 sps:$4 sm:$0xff]  }
 0x5ea   :  { %6782 = vmatprep.subr.bf16.mxu0 %v8640_v47  ;;  %v8668_v37 = vld [vmem:[#allocation11 + $0xb04] ss:$28 sps:$4 sm:$0xff]  }
 0x5ec   :  { %6740 = vmatpush2.bf16.msra.mxu1 %v8635_v18 }
 0x5ed   :  { %6783 = vmatpush2.bf16.msra.mxu0 %v8638_v45  ;;  %6795 = vmatprep.subr.bf16.mxu1 %v8643_v51  ;;  %v8674_v45 = vld [vmem:[#allocation11 + $0x210] ss:$28 sps:$4 sm:$0xff]  }
 0x5ee   :  { %7852 = vmatprep.subr.bf16.mxu0 %v8644_v54 }
 0x5ef   :  { %6742 = vmatmul.mubr.bf16.vlgmr.msra.gmra.mxu1 %v9303_v60  ;;  %v6485_v34 = vpop.f32.mrf.mxu1 }
 0x5f0   :  { %6785 = vmatmul.mubr.bf16.vlgmr.msra.gmra.mxu0 %v9351_v30  ;;  %v6486_v1 = vadd.f32 %v6485_v34, %v6443_v11  ;;  %6796 = vmatpush1.bf16.msra.mxu1 %v8641_v41  ;;  %v8679_v41 = vld [vmem:[#allocation11 + $0x1d8] ss:$28 sps:$4 sm:$0xff]   ;;  %v8685_v11 = vld [vmem:[#allocation11 + $0x8a0] ss:$28 sps:$4 sm:$0xff]  }
 0x5f1   :  { %6827 = vmatprep.mubr.bf16.mxu1 %v9386_v29  ;;  %7853 = vmatpush3.bf16.msra.mxu0 %v8645_v44  ;;  %v6487_v17 = vpop.f32.mrf.mxu1  ;;  %v8683_v44 = vld [vmem:[#allocation11 + $0xddc] ss:$28 sps:$4 sm:$0xff]  }
 0x5f2   :  { %8781 = vtanh.f32 %v6486_v1  ;;  %6870 = vmatprep.mubr.bf16.mxu0 %v9253_v39  ;;  %v6488_v5 = vadd.f32 %v6487_v17, %v6445_v0  ;;  %6797 = vmatprep.subr.bf16.mxu1 %v8648_v13  ;;  %v8656_v39 = vld [vmem:[#allocation11 + $0xb70] ss:$28 sps:$4 sm:$0xff]   ;;  %v8688_v13 = vld [vmem:[#allocation11 + $0xda4] ss:$28 sps:$4 sm:$0xff]   ;;  %v8699_v17 = vld [vmem:[#allocation11 + $0x9b8] ss:$28 sps:$4 sm:$0xff]  }
 0x5f3   :  { %7854 = vmatprep.subr.bf16.mxu0 %v8649_v61  ;;  %v6489_v6 = vpop.f32.mrf.mxu1  ;;  %v8686_v34 = vld [vmem:[#allocation11 + $0xda0] ss:$28 sps:$4 sm:$0xff]   ;;  %v8690_v61 = vld [vmem:[#allocation11 + $0x868] ss:$28 sps:$4 sm:$0xff]   ;;  %v8694_v0 = vld [vmem:[#allocation11 + $0x9f0] ss:$28 sps:$4 sm:$0xff]  }
 0x5f4   :  { %8783 = vtanh.f32 %v6488_v5  ;;  %v6490_v46 = vadd.f32 %v6489_v6, %v6447_v4  ;;  %6798 = vmatpush1.bf16.msra.mxu1 %v8646_v2  ;;  %v8691_v1 = vld [vmem:[#allocation11 + $0xd68] ss:$28 sps:$4 sm:$0xff]   ;;  %v8695_v2 = vld [vmem:[#allocation11 + $0x830] ss:$28 sps:$4 sm:$0xff]   ;;  %v8705_v4 = vld [vmem:[#allocation11 + $0x7c0] ss:$28 sps:$4 sm:$0xff]  }
 0x5f5   :  { %7855 = vmatpush3.bf16.msra.mxu0 %v8650_v25  ;;  %v6491_v52 = vpop.f32.mrf.mxu1  ;;  %6799 = vmatprep.subr.bf16.mxu1 %v8653_v12  ;;  %v8700_v25 = vld [vmem:[#allocation11 + $0x7f8] ss:$28 sps:$4 sm:$0xff]   ;;  %v8708_v5 = vld [vmem:[#allocation11 + $0xcc4] ss:$28 sps:$4 sm:$0xff]  }
 0x5f6   :  { %8785 = vtanh.f32 %v6490_v46  ;;  %v6492_v32 = vadd.f32 %v6491_v52, %v6449_v49  ;;  %7856 = vmatprep.subr.bf16.mxu0 %v8654_v43  ;;  %v8703_v12 = vld [vmem:[#allocation11 + $0xcfc] ss:$28 sps:$4 sm:$0xff]   ;;  %v8709_v43 = vld [vmem:[#allocation11 + $0x948] ss:$28 sps:$4 sm:$0xff]  }
 0x5f7   :  { %v8706_v6 = vld [vmem:[#allocation11 + $0xcc0] ss:$28 sps:$4 sm:$0xff]   ;;  %v8710_v49 = vld [vmem:[#allocation11 + $0x788] ss:$28 sps:$4 sm:$0xff]  }
 0x5f8   :  { %8787 = vtanh.f32 %v6492_v32  ;;  %6800 = vmatpush1.bf16.msra.mxu1 %v8651_v7  ;;  %v8713_v46 = vld [vmem:[#allocation11 + $0xc8c] ss:$28 sps:$4 sm:$0xff]   ;;  %v8719_v32 = vld [vmem:[#allocation11 + $0x8d8] ss:$28 sps:$4 sm:$0xff]  }
 0x5f9   :  { %7857 = vmatpush3.bf16.msra.mxu0 %v8655_v33  ;;  %6801 = vmatprep.subr.bf16.mxu1 %v8658_v9  ;;  %v8714_v7 = vld [vmem:[#allocation11 + $0x910] ss:$28 sps:$4 sm:$0xff]   ;;  %v8711_v52 = vld [vmem:[#allocation11 + $0xc88] ss:$28 sps:$4 sm:$0xff]  }
 0x5fa   :  { %7858 = vmatprep.subr.bf16.mxu0 %v8659_v16  ;;  %v8715_v33 = vld [vmem:[#allocation11 + $0x750] ss:$28 sps:$4 sm:$0xff]  }
 0x5fb   :  { %v8718_v9 = vld [vmem:[#allocation11 + $0xc54] ss:$28 sps:$4 sm:$0xff]  }
 0x5fc   :  { %6802 = vmatpush1.bf16.msra.mxu1 %v8656_v39  ;;  %v8716_v16 = vld [vmem:[#allocation11 + $0xc50] ss:$28 sps:$4 sm:$0xff]   ;;  %v8720_v39 = vld [vmem:[#allocation11 + $0x718] ss:$28 sps:$4 sm:$0xff]  }
 0x5fd   :  { %7859 = vmatpush3.bf16.msra.mxu0 %v8660_v35  ;;  %6803 = vmatprep.subr.bf16.mxu1 %v8663_v26  ;;  %v8721_v35 = vld [vmem:[#allocation11 + $0x6e0] ss:$28 sps:$4 sm:$0xff]  }
 0x5fe   :  { %7860 = vmatprep.subr.bf16.mxu0 %v8664_v62  ;;  %v8722_v26 = vld [vmem:[#allocation11 + $0x520] ss:$28 sps:$4 sm:$0xff]   ;;  %v8723_v62 = vld [vmem:[#allocation11 + $0x6a8] ss:$28 sps:$4 sm:$0xff]  }
 0x5ff   :  { %v8782_v47 = vpop.eup %8781 }
 0x600   :  { %7016 = vst [vmem:[#allocation14] sm:$0xff] %v8782_v47  ;;  %6804 = vmatpush1.bf16.msra.mxu1 %v8661_v36  ;;  %v8724_v36 = vld [vmem:[#allocation11 + $0x4e8] ss:$28 sps:$4 sm:$0xff]   ;;  %v8728_v47 = vld [vmem:[#allocation11 + $0x478] ss:$28 sps:$4 sm:$0xff]  }
 0x601   :  { %v8784_v18 = vpop.eup %8783  ;;  %7861 = vmatpush3.bf16.msra.mxu0 %v8665_v27  ;;  %6805 = vmatprep.subr.bf16.mxu1 %v8668_v37  ;;  %v8725_v27 = vld [vmem:[#allocation11 + $0x670] ss:$28 sps:$4 sm:$0xff]  }
 0x602   :  { %7017 = vst [vmem:[#allocation14 + $0x8] sm:$0xff] %v8784_v18  ;;  %7862 = vmatprep.subr.bf16.mxu0 %v8669_v38  ;;  %v8726_v37 = vld [vmem:[#allocation11 + $0x4b0] ss:$28 sps:$4 sm:$0xff]   ;;  %v8727_v38 = vld [vmem:[#allocation11 + $0x638] ss:$28 sps:$4 sm:$0xff]  }
 0x603   :  { %v8786_v51 = vpop.eup %8785  ;;  %v8730_v18 = vld [vmem:[#allocation11 + $0x440] ss:$28 sps:$4 sm:$0xff]  }
 0x604   :  { %7023 = vst [vmem:[#allocation14 + $0x38] sm:$0xf] %v8786_v51  ;;  %6806 = vmatpush1.bf16.msra.mxu1 %v8666_v14  ;;  %v8729_v14 = vld [vmem:[#allocation11 + $0x600] ss:$28 sps:$4 sm:$0xff]   ;;  %v8736_v51 = vld [vmem:[#allocation11 + $0x398] ss:$28 sps:$4 sm:$0xff]  }
 0x605   :  { %v8788_v54 = vpop.eup %8787  ;;  %7863 = vmatpush3.bf16.msra.mxu0 %v8670_v42  ;;  %6807 = vmatprep.subr.bf16.mxu1 %v8673_v50  ;;  %v8731_v42 = vld [vmem:[#allocation11 + $0x5c8] ss:$28 sps:$4 sm:$0xff]   ;;  %v8733_v50 = vld [vmem:[#allocation11 + $0x590] ss:$28 sps:$4 sm:$0xff]  }
 0x606   :  { %7024 = vst [vmem:[#allocation14 + $0x40] sm:$0xf] %v8788_v54  ;;  %7864 = vmatprep.subr.bf16.mxu0 %v8674_v45  ;;  %v8735_v45 = vld [vmem:[#allocation11 + $0x558] ss:$28 sps:$4 sm:$0xff]   ;;  %v8738_v54 = vld [vmem:[#allocation11 + $0xc20] ss:$28 sps:$4 sm:$0xff]  }
 0x608   :  { %6808 = vmatpush1.bf16.msra.mxu1 %v8671_v53  ;;  %v8737_v53 = vld [vmem:[#allocation11 + $0xde0] ss:$28 sps:$4 sm:$0xff]  }
 0x609   :  { %7865 = vmatpush3.bf16.msra.mxu0 %v8675_v55  ;;  %6809 = vmatprep.subr.bf16.mxu1 %v8678_v56  ;;  %v8739_v55 = vld [vmem:[#allocation11 + $0xda8] ss:$28 sps:$4 sm:$0xff]  }
 0x60a   :  { %7866 = vmatprep.subr.bf16.mxu0 %v8679_v41  ;;  %v8740_v56 = vld [vmem:[#allocation11 + $0xbe8] ss:$28 sps:$4 sm:$0xff]   ;;  %v8741_v41 = vld [vmem:[#allocation11 + $0xd70] ss:$28 sps:$4 sm:$0xff]  }
 0x60c   :  { %6810 = vmatpush1.bf16.msra.mxu1 %v8676_v22  ;;  %v8742_v22 = vld [vmem:[#allocation11 + $0xbb0] ss:$28 sps:$4 sm:$0xff]  }
 0x60d   :  { %7867 = vmatpush3.bf16.msra.mxu0 %v8680_v24  ;;  %6811 = vmatprep.subr.bf16.mxu1 %v8683_v44  ;;  %v8743_v24 = vld [vmem:[#allocation11 + $0xd38] ss:$28 sps:$4 sm:$0xff]  }
 0x60e   :  { %7896 = vmatprep.subr.bf16.mxu0 %v8684_v57  ;;  %v8744_v44 = vld [vmem:[#allocation11 + $0xb78] ss:$28 sps:$4 sm:$0xff]   ;;  %v6528_v57 = vpop.f32.mrf.mxu0 }
 0x610   :  { %6871 = vmatmul.mubr.bf16.vlgmr.msra.gmra.mxu0 %v9255_v48  ;;  %6812 = vmatpush2.bf16.msra.mxu1 %v8681_v59  ;;  %v8696_v48 = vld [vmem:[#allocation11 + $0xd30] ss:$28 sps:$4 sm:$0xff]   ;;  %v8745_v59 = vld [vmem:[#allocation11 + $0xd00] ss:$28 sps:$4 sm:$0xff]  }
 0x611   :  { %7897 = vmatpush3.bf16.msra.mxu0 %v8685_v11  ;;  %6952 = vmatprep.mubr.bf16.mxu0 %v9349_v28  ;;  %v8704_v28 = vld [vmem:[#allocation11 + $0x980] ss:$28 sps:$4 sm:$0xff]  }
 0x612   :  { %6813 = vmatprep.subr.bf16.mxu1 %v8688_v13  ;;  %7898 = vmatprep.subr.bf16.mxu0 %v8689_v21  ;;  %v8746_v11 = vld [vmem:[#allocation11 + $0xb40] ss:$28 sps:$4 sm:$0xff]   ;;  %v6530_v13 = vpop.f32.mrf.mxu0  ;;  %v8748_v21 = vld [vmem:[#allocation11 + $0xb08] ss:$28 sps:$4 sm:$0xff]  }
 0x614   :  { %6814 = vmatpush2.bf16.msra.mxu1 %v8686_v34 }
 0x615   :  { %7899 = vmatpush3.bf16.msra.mxu0 %v8690_v61  ;;  %6815 = vmatprep.subr.bf16.mxu1 %v8693_v20  ;;  %v8749_v61 = vld [vmem:[#allocation11 + $0xc90] ss:$28 sps:$4 sm:$0xff]   ;;  %v3994_v20 = vrot.slane %v9403_v10, %v9106_v19 }
 0x616   :  { %7900 = vmatprep.subr.bf16.mxu0 %v8694_v0  ;;  %v8750_v0 = vld [vmem:[#allocation11 + $0xad0] ss:$28 sps:$4 sm:$0xff]  }
 0x618   :  { %6816 = vmatpush2.bf16.msra.mxu1 %v8691_v1 }
 0x619   :  { %7901 = vmatpush3.bf16.msra.mxu0 %v8695_v2  ;;  %6817 = vmatprep.subr.bf16.mxu1 %v8698_v3  ;;  %v8751_v3 = vld [vmem:[#allocation11 + $0xc58] ss:$28 sps:$4 sm:$0xff]  }
 0x61a   :  { %7902 = vmatprep.subr.bf16.mxu0 %v8699_v17  ;;  %v3998_v17 = vrot.slane %v9403_v10, %v9109_v23 }
 0x61c   :  { %6818 = vmatpush2.bf16.msra.mxu1 %v8696_v48 }
 0x61d   :  { %7903 = vmatpush3.bf16.msra.mxu0 %v8700_v25  ;;  %6819 = vmatprep.subr.bf16.mxu1 %v8703_v12  ;;  %v6529_v25 = vadd.f32 %v6528_v57, %v3994_v20  ;;  %v8752_v12 = vld [vmem:[#allocation11 + $0xa98] ss:$28 sps:$4 sm:$0xff]  }
 0x61e   :  { %7904 = vmatprep.subr.bf16.mxu0 %v8704_v28 }
 0x620   :  { %6820 = vmatpush2.bf16.msra.mxu1 %v8701_v63  ;;  %v6531_v63 = vadd.f32 %v6530_v13, %v3998_v17 }
 0x621   :  { %7905 = vmatpush3.bf16.msra.mxu0 %v8705_v4  ;;  %6821 = vmatprep.subr.bf16.mxu1 %v8708_v5 }
 0x622   :  { %7906 = vmatprep.subr.bf16.mxu0 %v8709_v43 }
 0x624   :  { %6822 = vmatpush2.bf16.msra.mxu1 %v8706_v6 }
 0x625   :  { %7907 = vmatpush3.bf16.msra.mxu0 %v8710_v49  ;;  %6823 = vmatprep.subr.bf16.mxu1 %v8713_v46 }
 0x626   :  { %7908 = vmatprep.subr.bf16.mxu0 %v8714_v7 }
 0x628   :  { %6824 = vmatpush2.bf16.msra.mxu1 %v8711_v52 }
 0x629   :  { %7909 = vmatpush3.bf16.msra.mxu0 %v8715_v33  ;;  %6825 = vmatprep.subr.bf16.mxu1 %v8718_v9 }
 0x62a   :  { %7910 = vmatprep.subr.bf16.mxu0 %v8719_v32 }
 0x62c   :  { %6826 = vmatpush2.bf16.msra.mxu1 %v8716_v16 }
 0x62d   :  { %7911 = vmatpush3.bf16.msra.mxu0 %v8720_v39  ;;  %7874 = vmatprep.subr.bf16.mxu1 %v8721_v35 }
 0x62f   :  { %6828 = vmatmul.mubr.bf16.vlgmr.msra.gmra.mxu1 %v9388_v40  ;;  %v6571_v34 = vpop.f32.mrf.mxu1 }
 0x630   :  { %6953 = vmatmul.mubr.bf16.vlgmr.msra.gmra.mxu0 %v9351_v30  ;;  %7875 = vmatpush3.bf16.msra.mxu1 %v8722_v26  ;;  %v8732_v30 = vld [vmem:[#allocation11 + $0x408] ss:$28 sps:$4 sm:$0xff]   ;;  %v6572_v4 = vadd.f32 %v6571_v34, %v6529_v25 }
 0x631   :  { %6911 = vmatprep.mubr.bf16.mxu1 %v9301_v15  ;;  %7876 = vmatprep.subr.bf16.mxu1 %v8723_v62  ;;  %v8734_v15 = vld [vmem:[#allocation11 + $0x3d0] ss:$28 sps:$4 sm:$0xff]   ;;  %v6573_v2 = vpop.f32.mrf.mxu1 }
 0x632   :  { %v6574_v19 = vadd.f32 %v6573_v2, %v6531_v63 }
 0x633   :  { %v6575_v28 = vpop.f32.mrf.mxu1 }
 0x634   :  { %7877 = vmatpush3.bf16.msra.mxu1 %v8724_v36 }
 0x635   :  { %7878 = vmatprep.subr.bf16.mxu1 %v8725_v27  ;;  %v6577_v6 = vpop.f32.mrf.mxu1 }
 0x638   :  { %7879 = vmatpush3.bf16.msra.mxu1 %v8726_v37 }
 0x639   :  { %7880 = vmatprep.subr.bf16.mxu1 %v8727_v38 }
 0x63c   :  { %7881 = vmatpush3.bf16.msra.mxu1 %v8728_v47 }
 0x63d   :  { %7882 = vmatprep.subr.bf16.mxu1 %v8729_v14 }
 0x640   :  { %7883 = vmatpush3.bf16.msra.mxu1 %v8730_v18 }
 0x641   :  { %7884 = vmatprep.subr.bf16.mxu1 %v8731_v42 }
 0x644   :  { %7885 = vmatpush3.bf16.msra.mxu1 %v8732_v30 }
 0x645   :  { %7886 = vmatprep.subr.bf16.mxu1 %v8733_v50 }
 0x648   :  { %7887 = vmatpush3.bf16.msra.mxu1 %v8734_v15 }
 0x649   :  { %7888 = vmatprep.subr.bf16.mxu1 %v8735_v45  ;;  %v4002_v45 = vrot.slane %v9403_v10, %v9278_v58 }
 0x64c   :  { %7889 = vmatpush3.bf16.msra.mxu1 %v8736_v51 }
 0x64d   :  { %7918 = vmatprep.subr.bf16.mxu1 %v8737_v53 }
 0x64f   :  { %6912 = vmatmul.mubr.bf16.vlgmr.msra.gmra.mxu1 %v9303_v60  ;;  %v8747_v60 = vld [vmem:[#allocation11 + $0xcc8] ss:$28 sps:$4 sm:$0xff]  }
 0x650   :  { %7919 = vmatpush3.bf16.msra.mxu1 %v8738_v54  ;;  %6993 = vmatprep.mubr.bf16.mxu1 %v9386_v29  ;;  %v6532_v29 = vpop.f32.mrf.mxu0  ;;  %v4006_v54 = vrot.slane %v9403_v10, %v9283_v31 }
 0x651   :  { %7920 = vmatprep.subr.bf16.mxu1 %v8739_v55  ;;  %v6533_v43 = vadd.f32 %v6532_v29, %v3994_v20 }
 0x652   :  { %v6534_v1 = vpop.f32.mrf.mxu0 }
 0x653   :  { %v6535_v49 = vadd.f32 %v6534_v1, %v3998_v17  ;;  %v6576_v7 = vadd.f32 %v6575_v28, %v6533_v43 }
 0x654   :  { %7921 = vmatpush3.bf16.msra.mxu1 %v8740_v56  ;;  %v6614_v48 = vpop.f32.mrf.mxu0 }
 0x655   :  { %7922 = vmatprep.subr.bf16.mxu1 %v8741_v41  ;;  %v6615_v46 = vadd.f32 %v6614_v48, %v6572_v4  ;;  %v6578_v9 = vadd.f32 %v6577_v6, %v6535_v49 }
 0x656   :  { %v6616_v5 = vpop.f32.mrf.mxu0 }
 0x657   :  { %v6617_v23 = vadd.f32 %v6616_v5, %v6574_v19 }
 0x658   :  { %7923 = vmatpush3.bf16.msra.mxu1 %v8742_v22  ;;  %v6618_v52 = vpop.f32.mrf.mxu0 }
 0x659   :  { %7924 = vmatprep.subr.bf16.mxu1 %v8743_v24  ;;  %v6619_v39 = vadd.f32 %v6618_v52, %v6576_v7 }
 0x65a   :  { %v6620_v26 = vpop.f32.mrf.mxu0 }
 0x65b   :  { %v6621_v36 = vadd.f32 %v6620_v26, %v6578_v9 }
 0x65c   :  { %7925 = vmatpush3.bf16.msra.mxu1 %v8744_v44 }
 0x65d   :  { %7926 = vmatprep.subr.bf16.mxu1 %v8745_v59 }
 0x660   :  { %7927 = vmatpush3.bf16.msra.mxu1 %v8746_v11 }
 0x661   :  { %7928 = vmatprep.subr.bf16.mxu1 %v8747_v60 }
 0x664   :  { %7929 = vmatpush3.bf16.msra.mxu1 %v8748_v21 }
 0x665   :  { %7930 = vmatprep.subr.bf16.mxu1 %v8749_v61 }
 0x668   :  { %7931 = vmatpush3.bf16.msra.mxu1 %v8750_v0 }
 0x669   :  { %7932 = vmatprep.subr.bf16.mxu1 %v8751_v3 }
 0x66c   :  { %7933 = vmatpush3.bf16.msra.mxu1 %v8752_v12 }
 0x66f   :  { %v6657_v33 = vpop.f32.mrf.mxu1  ;;  %6994 = vmatmul.mubr.bf16.vlgmr.msra.gmra.mxu1 %v9388_v40 }
 0x670   :  { %v6658_v32 = vadd.f32 %v6657_v33, %v6615_v46  ;;  %v6700_v42 = vpop.f32.mrf.mxu0 }
 0x671   :  { %v6659_v16 = vpop.f32.mrf.mxu1  ;;  %v6701_v56 = vadd.f32 %v6700_v42, %v4002_v45 }
 0x672   :  { %8789 = vtanh.f32 %v6658_v32  ;;  %v6660_v35 = vadd.f32 %v6659_v16, %v6617_v23  ;;  %v6702_v30 = vpop.f32.mrf.mxu0  ;;  %v4010_v23 = vrot.slane %v9403_v10, %v9326_v8 }
 0x673   :  { %v6661_v62 = vpop.f32.mrf.mxu1  ;;  %v6703_v22 = vadd.f32 %v6702_v30, %v4006_v54 }
 0x674   :  { %8791 = vtanh.f32 %v6660_v35  ;;  %v6662_v27 = vadd.f32 %v6661_v62, %v6619_v39  ;;  %v6704_v50 = vpop.f32.mrf.mxu0 }
 0x675   :  { %v6663_v37 = vpop.f32.mrf.mxu1  ;;  %v6705_v57 = vadd.f32 %v6704_v50, %v4002_v45 }
 0x676   :  { %8793 = vtanh.f32 %v6662_v27  ;;  %v6664_v38 = vadd.f32 %v6663_v37, %v6621_v36  ;;  %v6706_v51 = vpop.f32.mrf.mxu0 }
 0x677   :  { %v6707_v13 = vadd.f32 %v6706_v51, %v4006_v54 }
 0x678   :  { %8795 = vtanh.f32 %v6664_v38 }
 0x67f   :  { %v8790_v47 = vpop.eup %8789 }
 0x680   :  { %7018 = vst [vmem:[#allocation14 + $0x10] sm:$0xff] %v8790_v47 }
 0x681   :  { %v8792_v14 = vpop.eup %8791 }
 0x682   :  { %7019 = vst [vmem:[#allocation14 + $0x18] sm:$0xff] %v8792_v14 }
 0x683   :  { %v8794_v40 = vpop.eup %8793 }
 0x684   :  { %7025 = vst [vmem:[#allocation14 + $0x48] sm:$0xf] %v8794_v40 }
 0x685   :  { %v8796_v18 = vpop.eup %8795 }
 0x686   :  { %7026 = vst [vmem:[#allocation14 + $0x50] sm:$0xf] %v8796_v18 }
 0x6af   :  { %v6743_v15 = vpop.f32.mrf.mxu1 }
 0x6b0   :  { %v6786_v55 = vpop.f32.mrf.mxu0  ;;  %v6744_v24 = vadd.f32 %v6743_v15, %v6701_v56 }
 0x6b1   :  { %v6745_v53 = vpop.f32.mrf.mxu1 }
 0x6b2   :  { %v6788_v44 = vpop.f32.mrf.mxu0  ;;  %v6746_v59 = vadd.f32 %v6745_v53, %v6703_v22  ;;  %v6787_v60 = vadd.f32 %v6786_v55, %v6744_v24 }
 0x6b3   :  { %v6747_v41 = vpop.f32.mrf.mxu1 }
 0x6b4   :  { %v6748_v21 = vadd.f32 %v6747_v41, %v6705_v57  ;;  %v6790_v29 = vpop.f32.mrf.mxu0  ;;  %v6789_v58 = vadd.f32 %v6788_v44, %v6746_v59 }
 0x6b5   :  { %v6749_v11 = vpop.f32.mrf.mxu1 }
 0x6b6   :  { %v6750_v61 = vadd.f32 %v6749_v11, %v6707_v13  ;;  %v6791_v1 = vadd.f32 %v6790_v29, %v6748_v21  ;;  %v6792_v2 = vpop.f32.mrf.mxu0 }
 0x6b8   :  { %v6793_v17 = vadd.f32 %v6792_v2, %v6750_v61 }
 0x6d0   :  { %v7868_v43 = vpop.f32.mrf.mxu0 }
 0x6d2   :  { %v7869_v19 = vpop.f32.mrf.mxu0 }
 0x6d3   :  { %v7870_v9 = vadd.f32 %v7869_v19, %v7868_v43 }
 0x6d4   :  { %v7871_v6 = vpop.f32.mrf.mxu0 }
 0x6d5   :  { %v6873_v35 = vadd.f32 %v7870_v9, %v4010_v23 }
 0x6d6   :  { %v7872_v46 = vpop.f32.mrf.mxu0 }
 0x6d7   :  { %v7873_v26 = vadd.f32 %v7872_v46, %v7871_v6 }
 0x6d9   :  { %v6876_v38 = vadd.f32 %v7873_v26, %v4010_v23 }
 0x6ef   :  { %v6829_v34 = vpop.f32.mrf.mxu1 }
 0x6f0   :  { %v6830_v20 = vadd.f32 %v6829_v34, %v6787_v60  ;;  %v7912_v52 = vpop.f32.mrf.mxu0 }
 0x6f1   :  { %v6831_v0 = vpop.f32.mrf.mxu1 }
 0x6f2   :  { %8797 = vtanh.f32 %v6830_v20  ;;  %v6832_v31 = vadd.f32 %v6831_v0, %v6789_v58  ;;  %v7913_v32 = vpop.f32.mrf.mxu0 }
 0x6f3   :  { %v6833_v3 = vpop.f32.mrf.mxu1  ;;  %v7914_v47 = vadd.f32 %v7913_v32, %v7912_v52 }
 0x6f4   :  { %8799 = vtanh.f32 %v6832_v31  ;;  %v6834_v48 = vadd.f32 %v6833_v3, %v6791_v1  ;;  %v7915_v62 = vpop.f32.mrf.mxu0 }
 0x6f5   :  { %v6835_v25 = vpop.f32.mrf.mxu1 }
 0x6f6   :  { %8801 = vtanh.f32 %v6834_v48  ;;  %v6836_v12 = vadd.f32 %v6835_v25, %v6793_v17  ;;  %v7916_v14 = vpop.f32.mrf.mxu0 }
 0x6f7   :  { %v7917_v15 = vadd.f32 %v7916_v14, %v7915_v62 }
 0x6f8   :  { %8803 = vtanh.f32 %v6836_v12 }
 0x6ff   :  { %v8798_v28 = vpop.eup %8797 }
 0x700   :  { %7020 = vst [vmem:[#allocation14 + $0x20] sm:$0xff] %v8798_v28 }
 0x701   :  { %v8800_v63 = vpop.eup %8799 }
 0x702   :  { %7021 = vst [vmem:[#allocation14 + $0x28] sm:$0xff] %v8800_v63 }
 0x703   :  { %v8802_v4 = vpop.eup %8801 }
 0x704   :  { %7027 = vst [vmem:[#allocation14 + $0x58] sm:$0xf] %v8802_v4 }
 0x705   :  { %v8804_v5 = vpop.eup %8803 }
 0x706   :  { %7028 = vst [vmem:[#allocation14 + $0x60] sm:$0xf] %v8804_v5 }
 0x70f   :  { %v7890_v49 = vpop.f32.mrf.mxu1 }
 0x711   :  { %v7891_v7 = vpop.f32.mrf.mxu1 }
 0x712   :  { %v7892_v16 = vadd.f32 %v7891_v7, %v7890_v49 }
 0x713   :  { %v7893_v33 = vpop.f32.mrf.mxu1 }
 0x714   :  { %v6914_v36 = vadd.f32 %v7892_v16, %v6873_v35 }
 0x715   :  { %v7894_v39 = vpop.f32.mrf.mxu1 }
 0x716   :  { %v7895_v27 = vadd.f32 %v7894_v39, %v7893_v33  ;;  %v6955_v42 = vadd.f32 %v7914_v47, %v6914_v36 }
 0x718   :  { %v6917_v18 = vadd.f32 %v7895_v27, %v6876_v38 }
 0x71a   :  { %v6958_v45 = vadd.f32 %v7917_v15, %v6917_v18 }
 0x72f   :  { %v7934_v37 = vpop.f32.mrf.mxu1 }
 0x731   :  { %v7935_v40 = vpop.f32.mrf.mxu1 }
 0x732   :  { %v7936_v30 = vadd.f32 %v7935_v40, %v7934_v37 }
 0x733   :  { %v7937_v50 = vpop.f32.mrf.mxu1 }
 0x734   :  { %v6996_v8 = vadd.f32 %v7936_v30, %v6955_v42 }
 0x735   :  { %v7938_v10 = vpop.f32.mrf.mxu1 }
 0x736   :  { %8805 = vtanh.f32 %v6996_v8  ;;  %v7939_v51 = vadd.f32 %v7938_v10, %v7937_v50 }
 0x738   :  { %v6999_v53 = vadd.f32 %v7939_v51, %v6958_v45 }
 0x73a   :  { %8807 = vtanh.f32 %v6999_v53 }
 0x743   :  { %v8806_v54 = vpop.eup %8805 }
 0x744   :  { %7022 = vst [vmem:[#allocation14 + $0x30] sm:$0xff] %v8806_v54 }
 0x747   :  { %v8808_v55 = vpop.eup %8807 }
 0x748   :  { %7029 = vst [vmem:[#allocation14 + $0x68] sm:$0xf] %v8808_v55 }
 0x749   :  { %8960 = shalt.err (!%p8957_p11)
}
 0x74a   :  { %s9001_s19 = smov 896   ;;  %s9002_s20 = smov 56  }
 0x74b   :  { %7041 = dma.vmem_to_hbm [thread:$0]  %s7036_s6, 1792, %s9441_s7, [#allocation4], %s9001_s19, %s9001_s19, %s9002_s20  }
 0x74c   :  { %8977 = dma.done.wait [#allocation4], 1792  }
 0x74d   :  { %8978 = vsyncadd [#allocation4], 4294965504 }
 0x74e   :  { %7045 = vsyncpa [#allocation3], 1 }
 0x74f   :  { %7046 = vsyncpa [#allocation6], 1 }
 0x750   :  { %7047 = vsyncpa [#allocation9], 1 }
 0x751   :  { %7048 = vsyncpa [#allocation12], 1 }
 0x752   :  { %7049 = vsyncpa [#allocation4], 1 }

</bundles_post_ra>
